<compile_context>
chip_gen: v7x
topology: tpu7x:2x2x1
jax: 0.10.0
libtpu: 0.0.40
codegen_flags: <defaults>
</compile_context>

<pallas_src>
import math

import jax
import jax.numpy as jnp
from jax.experimental import pallas as pl
from jax.experimental.pallas import tpu as pltpu

# ----------------------------- module hyper-parameters -----------------------------
IN_DIM = 32                      # in_dim
H_DIM = 32                       # h_dim (must equal in_dim, see note above)
NUM_HEADS = 8                    # nn.MultiheadAttention default in the module
HEAD_DIM = IN_DIM // NUM_HEADS   # 4
HID = H_DIM // 2                 # per-direction LSTM hidden size = 16
NUM_GATES = 4                    # LSTM gates i, f, g, o (PyTorch order)
LN_EPS = 1e-5                    # nn.LayerNorm default eps
ATTN_SCALE = 1.0 / math.sqrt(HEAD_DIM)
NEG_INF = -1e30

BATCH = 2
SEQ = 8
SB = SEQ * BATCH                 # rows after folding batch into the sequence-major dim


def _sigmoid(z):
    return 1.0 / (1.0 + jnp.exp(-z))


# ------------------------------------ kernel ---------------------------------------
def _lstm_attn_kernel(
    x_ref,              # (SB, IN_DIM)      sequence-major rows: row = s*BATCH + b
    mask_ref,           # (SB, SB)          0 within batch, -1e30 across batches
    w_ih_ref,           # (IN_DIM, 8*HID)   [fwd i|f|g|o , bwd i|f|g|o] columns
    w_hh_ref,           # (2*HID, 8*HID)    block-diag(fwd recurrent, bwd recurrent)
    b_lstm_ref,         # (1, 8*HID)        (b_ih + b_hh), fwd then bwd
    wq_ref, bq_ref,     # (E, E), (1, E)
    wkv_ref, bkv_ref,   # (E, 2E), (1, 2E)  -> [k | v] columns
    wo_ref, bo_ref,     # (E, E), (1, E)
    gamma_ref, beta_ref,  # (1, E)
    out_ref,            # (SB, E)
):
    f32 = jnp.float32
    x = x_ref[...]                                                       # (SB, E)

    # ------------------------- bidirectional LSTM -------------------------
    # Input projection for BOTH directions and all timesteps in one matmul.
    gx = jnp.dot(x, w_ih_ref[...], preferred_element_type=f32) + b_lstm_ref[...]
    whh = w_hh_ref[...]                                                  # (2*HID, 8*HID)

    G = NUM_GATES * HID              # 64: per-direction gate width
    h = jnp.zeros((BATCH, 2 * HID), f32)       # [h_fwd | h_bwd]
    c = jnp.zeros((BATCH, 2 * HID), f32)       # [c_fwd | c_bwd]
    outs_f = [None] * SEQ
    outs_b = [None] * SEQ

    # Static 8-step unroll.  Forward walks t = 0..S-1 while backward walks S-1..0;
    # one block-diagonal (BATCH, 2*HID) @ (2*HID, 8*HID) matmul per step serves both
    # directions, halving the serial matmul chain of the dominant recurrent region.
    for t in range(SEQ):
        tb = SEQ - 1 - t
        rec = jnp.dot(h, whh, preferred_element_type=f32)                # (BATCH, 8*HID)
        g_f = gx[t * BATCH:(t + 1) * BATCH, :G] + rec[:, :G]             # fwd gates @ t
        g_b = gx[tb * BATCH:(tb + 1) * BATCH, G:] + rec[:, G:]           # bwd gates @ tb

        def gate(fw, bw):            # pair fwd/bwd lanes of one gate -> (BATCH, 2*HID)
            return jnp.concatenate([fw, bw], axis=-1)

        i_g = _sigmoid(gate(g_f[:, 0 * HID:1 * HID], g_b[:, 0 * HID:1 * HID]))
        f_g = _sigmoid(gate(g_f[:, 1 * HID:2 * HID], g_b[:, 1 * HID:2 * HID]))
        c_g = jnp.tanh(gate(g_f[:, 2 * HID:3 * HID], g_b[:, 2 * HID:3 * HID]))
        o_g = _sigmoid(gate(g_f[:, 3 * HID:4 * HID], g_b[:, 3 * HID:4 * HID]))
        c = f_g * c + i_g * c_g
        h = o_g * jnp.tanh(c)
        outs_f[t] = h[:, :HID]
        outs_b[tb] = h[:, HID:]

    lstm_out = jnp.concatenate(
        [jnp.concatenate(outs_f, axis=0), jnp.concatenate(outs_b, axis=0)],
        axis=-1)                                                         # (SB, H_DIM)

    # --------------- MultiheadAttention(query=lstm_out, key=value=x) ---------------
    q = jnp.dot(lstm_out, wq_ref[...], preferred_element_type=f32) + bq_ref[...]
    kv = jnp.dot(x, wkv_ref[...], preferred_element_type=f32) + bkv_ref[...]
    k = kv[:, :IN_DIM]
    v = kv[:, IN_DIM:]

    # Head-batched attention: build (NUM_HEADS, SB, HEAD_DIM) once, then one batched
    # score matmul, one softmax and one batched context matmul.
    def to_heads(m):
        return jnp.stack(
            [m[:, hd * HEAD_DIM:(hd + 1) * HEAD_DIM] for hd in range(NUM_HEADS)],
            axis=0)

    qh, kh, vh = to_heads(q), to_heads(k), to_heads(v)

    scores = jnp.einsum("hqd,hkd->hqk", qh, kh,
                        preferred_element_type=f32) * ATTN_SCALE         # (H, SB, SB)
    # Batch is folded into the row dim -> mask cross-batch attention (additive mask).
    scores = scores + mask_ref[...][None, :, :]
    scores = scores - jnp.max(scores, axis=-1, keepdims=True)
    p = jnp.exp(scores)
    p = p / jnp.sum(p, axis=-1, keepdims=True)
    ctx = jnp.einsum("hqk,hkd->hqd", p, vh, preferred_element_type=f32)  # (H, SB, D)
    ctx2d = jnp.concatenate([ctx[hd] for hd in range(NUM_HEADS)], axis=-1)  # (SB, E)
    attn = jnp.dot(ctx2d, wo_ref[...], preferred_element_type=f32) + bo_ref[...]

    # ------------------------- LayerNorm + residual -------------------------
    mu = jnp.mean(attn, axis=-1, keepdims=True)
    var = jnp.mean(jnp.square(attn - mu), axis=-1, keepdims=True)
    ln = (attn - mu) * jax.lax.rsqrt(var + LN_EPS) * gamma_ref[...] + beta_ref[...]
    out_ref[...] = x + ln


# ------------------------------------ wrapper ---------------------------------------
def lstm_attn_mapping(x, params):
    """x: (BATCH, SEQ, IN_DIM) f32 -> (BATCH, SEQ, IN_DIM) f32."""
    B_, S_, E = x.shape
    assert (B_, S_, E) == (BATCH, SEQ, IN_DIM)
    sb = S_ * B_

    # Fold batch into sequence-major rows (row = s*B + b): one grid=() invocation,
    # the LSTM recurrence runs its 8 steps once over (B, hidden) rows.
    x_sm = jnp.transpose(x, (1, 0, 2)).reshape(sb, E)

    # Additive cross-batch attention mask.
    rows = jnp.arange(sb, dtype=jnp.int32) % B_
    mask = jnp.where(rows[:, None] == rows[None, :], 0.0, NEG_INF).astype(jnp.float32)

    # LSTM weights: concatenate / block-diagonalize the two directions so the kernel
    # issues one input-projection matmul and one recurrent matmul per step for both.
    w_ih = jnp.concatenate([params["w_ih_f"].T, params["w_ih_b"].T], axis=1)   # (E, 8*HID)
    z = jnp.zeros((HID, NUM_GATES * HID), jnp.float32)
    w_hh = jnp.concatenate(
        [jnp.concatenate([params["w_hh_f"].T, z], axis=1),
         jnp.concatenate([z, params["w_hh_b"].T], axis=1)], axis=0)            # (2*HID, 8*HID)
    b_lstm = jnp.concatenate([params["b_ih_f"] + params["b_hh_f"],
                              params["b_ih_b"] + params["b_hh_b"]]).reshape(1, -1)

    # MultiheadAttention packed in_proj -> pre-transposed q and fused [k|v] operands.
    wq = params["in_proj_w"][:E].T
    bq = params["in_proj_b"][:E].reshape(1, E)
    wkv = params["in_proj_w"][E:].T                                            # (E, 2E)
    bkv = params["in_proj_b"][E:].reshape(1, 2 * E)
    wo = params["out_proj_w"].T
    bo = params["out_proj_b"].reshape(1, E)
    gamma = params["ln_w"].reshape(1, E)
    beta = params["ln_b"].reshape(1, E)

    inputs = (x_sm, mask, w_ih, w_hh, b_lstm, wq, bq, wkv, bkv, wo, bo, gamma, beta)

    vmem = pltpu.MemorySpace.VMEM
    out2d = pl.pallas_call(
        _lstm_attn_kernel,
        out_shape=jax.ShapeDtypeStruct((sb, E), jnp.float32),
        in_specs=[pl.BlockSpec(memory_space=vmem) for _ in inputs],
        out_specs=pl.BlockSpec(memory_space=vmem),
        compiler_params=pltpu.CompilerParams(vmem_limit_bytes=16 * 1024 * 1024),
    )(*inputs)

    return out2d.reshape(S_, B_, E).transpose(1, 0, 2)


# --------------------------- pure-JAX reference (PyTorch layout) ---------------------
def lstm_attn_mapping_ref(x, p):
    B_, S_, E = x.shape
    xt = jnp.transpose(x, (1, 0, 2))                                   # (S, B, E)

    def run_dir(w_ih, w_hh, b_ih, b_hh, reverse):
        h = jnp.zeros((B_, HID), jnp.float32)
        c = jnp.zeros((B_, HID), jnp.float32)
        outs = [None] * S_
        order = range(S_ - 1, -1, -1) if reverse else range(S_)
        for t in order:
            g = xt[t] @ w_ih.T + b_ih + h @ w_hh.T + b_hh
            i = jax.nn.sigmoid(g[:, :HID])
            f = jax.nn.sigmoid(g[:, HID:2 * HID])
            gg = jnp.tanh(g[:, 2 * HID:3 * HID])
            o = jax.nn.sigmoid(g[:, 3 * HID:])
            c = f * c + i * gg
            h = o * jnp.tanh(c)
            outs[t] = h
        return jnp.stack(outs, axis=0)                                 # (S, B, HID)

    hf = run_dir(p["w_ih_f"], p["w_hh_f"], p["b_ih_f"], p["b_hh_f"], False)
    hb = run_dir(p["w_ih_b"], p["w_hh_b"], p["b_ih_b"], p["b_hh_b"], True)
    lstm = jnp.concatenate([hf, hb], axis=-1)                          # (S, B, E)

    wq, wk, wv = p["in_proj_w"][:E], p["in_proj_w"][E:2 * E], p["in_proj_w"][2 * E:]
    bq, bk, bv = p["in_proj_b"][:E], p["in_proj_b"][E:2 * E], p["in_proj_b"][2 * E:]
    q = lstm @ wq.T + bq
    k = xt @ wk.T + bk
    v = xt @ wv.T + bv
    qh = q.reshape(S_, B_, NUM_HEADS, HEAD_DIM).transpose(1, 2, 0, 3)
    kh = k.reshape(S_, B_, NUM_HEADS, HEAD_DIM).transpose(1, 2, 0, 3)
    vh = v.reshape(S_, B_, NUM_HEADS, HEAD_DIM).transpose(1, 2, 0, 3)
    sc = jnp.einsum("bhqd,bhkd->bhqk", qh, kh) * ATTN_SCALE
    pr = jax.nn.softmax(sc, axis=-1)
    ctx = jnp.einsum("bhqk,bhkd->bhqd", pr, vh)
    ctx = ctx.transpose(2, 0, 1, 3).reshape(S_, B_, E)
    attn = ctx @ p["out_proj_w"].T + p["out_proj_b"]

    mu = attn.mean(axis=-1, keepdims=True)
    var = jnp.square(attn - mu).mean(axis=-1, keepdims=True)
    ln = (attn - mu) * jax.lax.rsqrt(var + LN_EPS) * p["ln_w"] + p["ln_b"]
    return (xt + ln).transpose(1, 0, 2)


# --------------------------------- deterministic init --------------------------------
def init_params(key):
    ks = jax.random.split(key, 12)

    def u(k, shape, s):
        return jax.random.uniform(k, shape, jnp.float32, -s, s)

    kb = 1.0 / math.sqrt(HID)
    return dict(
        # nn.LSTM(IN_DIM, HID, bidirectional=True) parameters (PyTorch layout).
        w_ih_f=u(ks[0], (NUM_GATES * HID, IN_DIM), kb),
        w_hh_f=u(ks[1], (NUM_GATES * HID, HID), kb),
        b_ih_f=u(ks[2], (NUM_GATES * HID,), kb),
        b_hh_f=u(ks[3], (NUM_GATES * HID,), kb),
        w_ih_b=u(ks[4], (NUM_GATES * HID, IN_DIM), kb),
        w_hh_b=u(ks[5], (NUM_GATES * HID, HID), kb),
        b_ih_b=u(ks[6], (NUM_GATES * HID,), kb),
        b_hh_b=u(ks[7], (NUM_GATES * HID,), kb),
        # nn.MultiheadAttention(IN_DIM, 8): packed in_proj + out_proj.
        in_proj_w=u(ks[8], (3 * IN_DIM, IN_DIM), 0.2),
        in_proj_b=u(ks[9], (3 * IN_DIM,), 0.1),
        out_proj_w=u(ks[10], (IN_DIM, IN_DIM), 0.2),
        out_proj_b=u(ks[11], (IN_DIM,), 0.1),
        # nn.LayerNorm(IN_DIM).
        ln_w=jnp.ones((IN_DIM,), jnp.float32),
        ln_b=jnp.zeros((IN_DIM,), jnp.float32),
    )


if __name__ == "__main__":
    key = jax.random.PRNGKey(0)
    pkey, xkey = jax.random.split(key)
    params = init_params(pkey)
    x = jax.random.normal(xkey, (BATCH, SEQ, IN_DIM), dtype=jnp.float32)

    out = jax.block_until_ready(lstm_attn_mapping(x, params))
    assert out.shape == (BATCH, SEQ, IN_DIM)
    assert bool(jnp.all(jnp.isfinite(out)))

    with jax.default_matmul_precision("highest"):
        ref = jax.block_until_ready(lstm_attn_mapping_ref(x, params))
    max_err = float(jnp.max(jnp.abs(out - ref)))
    assert max_err < 5e-2, f"kernel vs reference mismatch: {max_err}"

    print("KERNEL_OK")
</pallas_src>

<mosaic_0001>
module attributes {stable_mosaic.version = 11 : i64} {
  func.func @_lstm_attn_kernel(%arg0: memref<16x32xf32, #tpu.memory_space<vmem>>, %arg1: memref<16x16xf32, #tpu.memory_space<vmem>>, %arg2: memref<32x128xf32, #tpu.memory_space<vmem>>, %arg3: memref<32x128xf32, #tpu.memory_space<vmem>>, %arg4: memref<1x128xf32, #tpu.memory_space<vmem>>, %arg5: memref<32x32xf32, #tpu.memory_space<vmem>>, %arg6: memref<1x32xf32, #tpu.memory_space<vmem>>, %arg7: memref<32x64xf32, #tpu.memory_space<vmem>>, %arg8: memref<1x64xf32, #tpu.memory_space<vmem>>, %arg9: memref<32x32xf32, #tpu.memory_space<vmem>>, %arg10: memref<1x32xf32, #tpu.memory_space<vmem>>, %arg11: memref<1x32xf32, #tpu.memory_space<vmem>>, %arg12: memref<1x32xf32, #tpu.memory_space<vmem>>, %arg13: memref<16x32xf32, #tpu.memory_space<vmem>>) attributes {dimension_semantics = [], scalar_prefetch = 0 : i64, scratch_operands = 0 : i64, tpu.core_type = #tpu.core_type<tc>} {
    %c0 = arith.constant 0 : index
    %c0_0 = arith.constant 0 : index
    %0 = vector.load %arg0[%c0, %c0_0] : memref<16x32xf32, #tpu.memory_space<vmem>>, vector<16x32xf32>
    %c0_1 = arith.constant 0 : index
    %c0_2 = arith.constant 0 : index
    %1 = vector.load %arg2[%c0_1, %c0_2] : memref<32x128xf32, #tpu.memory_space<vmem>>, vector<32x128xf32>
    %cst = arith.constant dense<0.000000e+00> : vector<16x128xf32>
    %2 = tpu.matmul %0, %1, %cst {dimension_numbers = #tpu.dot_dimension_numbers<[1], [0], [0], [1], [0, 0, 1, 1], [], []>} : vector<16x32xf32>, vector<32x128xf32>, vector<16x128xf32> -> vector<16x128xf32>
    %c0_3 = arith.constant 0 : index
    %c0_4 = arith.constant 0 : index
    %3 = vector.load %arg4[%c0_3, %c0_4] : memref<1x128xf32, #tpu.memory_space<vmem>>, vector<1x128xf32>
    %4 = vector.broadcast %3 : vector<1x128xf32> to vector<16x128xf32>
    %5 = arith.addf %2, %4 : vector<16x128xf32>
    %c0_5 = arith.constant 0 : index
    %c0_6 = arith.constant 0 : index
    %6 = vector.load %arg3[%c0_5, %c0_6] : memref<32x128xf32, #tpu.memory_space<vmem>>, vector<32x128xf32>
    %cst_7 = arith.constant 0.000000e+00 : f32
    %7 = vector.broadcast %cst_7 : f32 to vector<2x32xf32>
    %cst_8 = arith.constant 0.000000e+00 : f32
    %8 = vector.broadcast %cst_8 : f32 to vector<2x32xf32>
    %cst_9 = arith.constant dense<0.000000e+00> : vector<2x128xf32>
    %9 = tpu.matmul %7, %6, %cst_9 {dimension_numbers = #tpu.dot_dimension_numbers<[1], [0], [0], [1], [0, 0, 1, 1], [], []>} : vector<2x32xf32>, vector<32x128xf32>, vector<2x128xf32> -> vector<2x128xf32>
    %10 = vector.extract_strided_slice %5 {offsets = [0, 0], sizes = [2, 64], strides = [1, 1]} : vector<16x128xf32> to vector<2x64xf32>
    %11 = vector.extract_strided_slice %9 {offsets = [0, 0], sizes = [2, 64], strides = [1, 1]} : vector<2x128xf32> to vector<2x64xf32>
    %12 = arith.addf %10, %11 : vector<2x64xf32>
    %13 = vector.extract_strided_slice %5 {offsets = [14, 64], sizes = [2, 64], strides = [1, 1]} : vector<16x128xf32> to vector<2x64xf32>
    %14 = vector.extract_strided_slice %9 {offsets = [0, 64], sizes = [2, 64], strides = [1, 1]} : vector<2x128xf32> to vector<2x64xf32>
    %15 = arith.addf %13, %14 : vector<2x64xf32>
    %16 = vector.extract_strided_slice %12 {offsets = [0, 0], sizes = [2, 16], strides = [1, 1]} : vector<2x64xf32> to vector<2x16xf32>
    %17 = vector.extract_strided_slice %15 {offsets = [0, 0], sizes = [2, 16], strides = [1, 1]} : vector<2x64xf32> to vector<2x16xf32>
    %18 = tpu.concatenate %16, %17 in 1 : vector<2x16xf32>, vector<2x16xf32> -> vector<2x32xf32>
    %cst_10 = arith.constant 0.000000e+00 : f32
    %19 = vector.broadcast %cst_10 : f32 to vector<2x32xf32>
    %20 = arith.subf %19, %18 : vector<2x32xf32>
    %21 = math.exp %20 : vector<2x32xf32>
    %cst_11 = arith.constant 1.000000e+00 : f32
    %22 = vector.broadcast %cst_11 : f32 to vector<2x32xf32>
    %23 = arith.addf %22, %21 : vector<2x32xf32>
    %cst_12 = arith.constant 1.000000e+00 : f32
    %24 = vector.broadcast %cst_12 : f32 to vector<2x32xf32>
    %25 = arith.divf %24, %23 : vector<2x32xf32>
    %26 = vector.extract_strided_slice %12 {offsets = [0, 16], sizes = [2, 16], strides = [1, 1]} : vector<2x64xf32> to vector<2x16xf32>
    %27 = vector.extract_strided_slice %15 {offsets = [0, 16], sizes = [2, 16], strides = [1, 1]} : vector<2x64xf32> to vector<2x16xf32>
    %28 = tpu.concatenate %26, %27 in 1 : vector<2x16xf32>, vector<2x16xf32> -> vector<2x32xf32>
    %cst_13 = arith.constant 0.000000e+00 : f32
    %29 = vector.broadcast %cst_13 : f32 to vector<2x32xf32>
    %30 = arith.subf %29, %28 : vector<2x32xf32>
    %31 = math.exp %30 : vector<2x32xf32>
    %cst_14 = arith.constant 1.000000e+00 : f32
    %32 = vector.broadcast %cst_14 : f32 to vector<2x32xf32>
    %33 = arith.addf %32, %31 : vector<2x32xf32>
    %cst_15 = arith.constant 1.000000e+00 : f32
    %34 = vector.broadcast %cst_15 : f32 to vector<2x32xf32>
    %35 = arith.divf %34, %33 : vector<2x32xf32>
    %36 = vector.extract_strided_slice %12 {offsets = [0, 32], sizes = [2, 16], strides = [1, 1]} : vector<2x64xf32> to vector<2x16xf32>
    %37 = vector.extract_strided_slice %15 {offsets = [0, 32], sizes = [2, 16], strides = [1, 1]} : vector<2x64xf32> to vector<2x16xf32>
    %38 = tpu.concatenate %36, %37 in 1 : vector<2x16xf32>, vector<2x16xf32> -> vector<2x32xf32>
    %39 = math.tanh %38 : vector<2x32xf32>
    %40 = vector.extract_strided_slice %12 {offsets = [0, 48], sizes = [2, 16], strides = [1, 1]} : vector<2x64xf32> to vector<2x16xf32>
    %41 = vector.extract_strided_slice %15 {offsets = [0, 48], sizes = [2, 16], strides = [1, 1]} : vector<2x64xf32> to vector<2x16xf32>
    %42 = tpu.concatenate %40, %41 in 1 : vector<2x16xf32>, vector<2x16xf32> -> vector<2x32xf32>
    %cst_16 = arith.constant 0.000000e+00 : f32
    %43 = vector.broadcast %cst_16 : f32 to vector<2x32xf32>
    %44 = arith.subf %43, %42 : vector<2x32xf32>
    %45 = math.exp %44 : vector<2x32xf32>
    %cst_17 = arith.constant 1.000000e+00 : f32
    %46 = vector.broadcast %cst_17 : f32 to vector<2x32xf32>
    %47 = arith.addf %46, %45 : vector<2x32xf32>
    %cst_18 = arith.constant 1.000000e+00 : f32
    %48 = vector.broadcast %cst_18 : f32 to vector<2x32xf32>
    %49 = arith.divf %48, %47 : vector<2x32xf32>
    %50 = arith.mulf %35, %8 : vector<2x32xf32>
    %51 = arith.mulf %25, %39 : vector<2x32xf32>
    %52 = arith.addf %50, %51 : vector<2x32xf32>
    %53 = math.tanh %52 : vector<2x32xf32>
    %54 = arith.mulf %49, %53 : vector<2x32xf32>
    %55 = vector.extract_strided_slice %54 {offsets = [0, 0], sizes = [2, 16], strides = [1, 1]} : vector<2x32xf32> to vector<2x16xf32>
    %56 = vector.extract_strided_slice %54 {offsets = [0, 16], sizes = [2, 16], strides = [1, 1]} : vector<2x32xf32> to vector<2x16xf32>
    %cst_19 = arith.constant dense<0.000000e+00> : vector<2x128xf32>
    %57 = tpu.matmul %54, %6, %cst_19 {dimension_numbers = #tpu.dot_dimension_numbers<[1], [0], [0], [1], [0, 0, 1, 1], [], []>} : vector<2x32xf32>, vector<32x128xf32>, vector<2x128xf32> -> vector<2x128xf32>
    %58 = vector.extract_strided_slice %5 {offsets = [2, 0], sizes = [2, 64], strides = [1, 1]} : vector<16x128xf32> to vector<2x64xf32>
    %59 = vector.extract_strided_slice %57 {offsets = [0, 0], sizes = [2, 64], strides = [1, 1]} : vector<2x128xf32> to vector<2x64xf32>
    %60 = arith.addf %58, %59 : vector<2x64xf32>
    %61 = vector.extract_strided_slice %5 {offsets = [12, 64], sizes = [2, 64], strides = [1, 1]} : vector<16x128xf32> to vector<2x64xf32>
    %62 = vector.extract_strided_slice %57 {offsets = [0, 64], sizes = [2, 64], strides = [1, 1]} : vector<2x128xf32> to vector<2x64xf32>
    %63 = arith.addf %61, %62 : vector<2x64xf32>
    %64 = vector.extract_strided_slice %60 {offsets = [0, 0], sizes = [2, 16], strides = [1, 1]} : vector<2x64xf32> to vector<2x16xf32>
    %65 = vector.extract_strided_slice %63 {offsets = [0, 0], sizes = [2, 16], strides = [1, 1]} : vector<2x64xf32> to vector<2x16xf32>
    %66 = tpu.concatenate %64, %65 in 1 : vector<2x16xf32>, vector<2x16xf32> -> vector<2x32xf32>
    %cst_20 = arith.constant 0.000000e+00 : f32
    %67 = vector.broadcast %cst_20 : f32 to vector<2x32xf32>
    %68 = arith.subf %67, %66 : vector<2x32xf32>
    %69 = math.exp %68 : vector<2x32xf32>
    %cst_21 = arith.constant 1.000000e+00 : f32
    %70 = vector.broadcast %cst_21 : f32 to vector<2x32xf32>
    %71 = arith.addf %70, %69 : vector<2x32xf32>
    %cst_22 = arith.constant 1.000000e+00 : f32
    %72 = vector.broadcast %cst_22 : f32 to vector<2x32xf32>
    %73 = arith.divf %72, %71 : vector<2x32xf32>
    %74 = vector.extract_strided_slice %60 {offsets = [0, 16], sizes = [2, 16], strides = [1, 1]} : vector<2x64xf32> to vector<2x16xf32>
    %75 = vector.extract_strided_slice %63 {offsets = [0, 16], sizes = [2, 16], strides = [1, 1]} : vector<2x64xf32> to vector<2x16xf32>
    %76 = tpu.concatenate %74, %75 in 1 : vector<2x16xf32>, vector<2x16xf32> -> vector<2x32xf32>
    %cst_23 = arith.constant 0.000000e+00 : f32
    %77 = vector.broadcast %cst_23 : f32 to vector<2x32xf32>
    %78 = arith.subf %77, %76 : vector<2x32xf32>
    %79 = math.exp %78 : vector<2x32xf32>
    %cst_24 = arith.constant 1.000000e+00 : f32
    %80 = vector.broadcast %cst_24 : f32 to vector<2x32xf32>
    %81 = arith.addf %80, %79 : vector<2x32xf32>
    %cst_25 = arith.constant 1.000000e+00 : f32
    %82 = vector.broadcast %cst_25 : f32 to vector<2x32xf32>
    %83 = arith.divf %82, %81 : vector<2x32xf32>
    %84 = vector.extract_strided_slice %60 {offsets = [0, 32], sizes = [2, 16], strides = [1, 1]} : vector<2x64xf32> to vector<2x16xf32>
    %85 = vector.extract_strided_slice %63 {offsets = [0, 32], sizes = [2, 16], strides = [1, 1]} : vector<2x64xf32> to vector<2x16xf32>
    %86 = tpu.concatenate %84, %85 in 1 : vector<2x16xf32>, vector<2x16xf32> -> vector<2x32xf32>
    %87 = math.tanh %86 : vector<2x32xf32>
    %88 = vector.extract_strided_slice %60 {offsets = [0, 48], sizes = [2, 16], strides = [1, 1]} : vector<2x64xf32> to vector<2x16xf32>
    %89 = vector.extract_strided_slice %63 {offsets = [0, 48], sizes = [2, 16], strides = [1, 1]} : vector<2x64xf32> to vector<2x16xf32>
    %90 = tpu.concatenate %88, %89 in 1 : vector<2x16xf32>, vector<2x16xf32> -> vector<2x32xf32>
    %cst_26 = arith.constant 0.000000e+00 : f32
    %91 = vector.broadcast %cst_26 : f32 to vector<2x32xf32>
    %92 = arith.subf %91, %90 : vector<2x32xf32>
    %93 = math.exp %92 : vector<2x32xf32>
    %cst_27 = arith.constant 1.000000e+00 : f32
    %94 = vector.broadcast %cst_27 : f32 to vector<2x32xf32>
    %95 = arith.addf %94, %93 : vector<2x32xf32>
    %cst_28 = arith.constant 1.000000e+00 : f32
    %96 = vector.broadcast %cst_28 : f32 to vector<2x32xf32>
    %97 = arith.divf %96, %95 : vector<2x32xf32>
    %98 = arith.mulf %83, %52 : vector<2x32xf32>
    %99 = arith.mulf %73, %87 : vector<2x32xf32>
    %100 = arith.addf %98, %99 : vector<2x32xf32>
    %101 = math.tanh %100 : vector<2x32xf32>
    %102 = arith.mulf %97, %101 : vector<2x32xf32>
    %103 = vector.extract_strided_slice %102 {offsets = [0, 0], sizes = [2, 16], strides = [1, 1]} : vector<2x32xf32> to vector<2x16xf32>
    %104 = vector.extract_strided_slice %102 {offsets = [0, 16], sizes = [2, 16], strides = [1, 1]} : vector<2x32xf32> to vector<2x16xf32>
    %cst_29 = arith.constant dense<0.000000e+00> : vector<2x128xf32>
    %105 = tpu.matmul %102, %6, %cst_29 {dimension_numbers = #tpu.dot_dimension_numbers<[1], [0], [0], [1], [0, 0, 1, 1], [], []>} : vector<2x32xf32>, vector<32x128xf32>, vector<2x128xf32> -> vector<2x128xf32>
    %106 = vector.extract_strided_slice %5 {offsets = [4, 0], sizes = [2, 64], strides = [1, 1]} : vector<16x128xf32> to vector<2x64xf32>
    %107 = vector.extract_strided_slice %105 {offsets = [0, 0], sizes = [2, 64], strides = [1, 1]} : vector<2x128xf32> to vector<2x64xf32>
    %108 = arith.addf %106, %107 : vector<2x64xf32>
    %109 = vector.extract_strided_slice %5 {offsets = [10, 64], sizes = [2, 64], strides = [1, 1]} : vector<16x128xf32> to vector<2x64xf32>
    %110 = vector.extract_strided_slice %105 {offsets = [0, 64], sizes = [2, 64], strides = [1, 1]} : vector<2x128xf32> to vector<2x64xf32>
    %111 = arith.addf %109, %110 : vector<2x64xf32>
    %112 = vector.extract_strided_slice %108 {offsets = [0, 0], sizes = [2, 16], strides = [1, 1]} : vector<2x64xf32> to vector<2x16xf32>
    %113 = vector.extract_strided_slice %111 {offsets = [0, 0], sizes = [2, 16], strides = [1, 1]} : vector<2x64xf32> to vector<2x16xf32>
    %114 = tpu.concatenate %112, %113 in 1 : vector<2x16xf32>, vector<2x16xf32> -> vector<2x32xf32>
    %cst_30 = arith.constant 0.000000e+00 : f32
    %115 = vector.broadcast %cst_30 : f32 to vector<2x32xf32>
    %116 = arith.subf %115, %114 : vector<2x32xf32>
    %117 = math.exp %116 : vector<2x32xf32>
    %cst_31 = arith.constant 1.000000e+00 : f32
    %118 = vector.broadcast %cst_31 : f32 to vector<2x32xf32>
    %119 = arith.addf %118, %117 : vector<2x32xf32>
    %cst_32 = arith.constant 1.000000e+00 : f32
    %120 = vector.broadcast %cst_32 : f32 to vector<2x32xf32>
    %121 = arith.divf %120, %119 : vector<2x32xf32>
    %122 = vector.extract_strided_slice %108 {offsets = [0, 16], sizes = [2, 16], strides = [1, 1]} : vector<2x64xf32> to vector<2x16xf32>
    %123 = vector.extract_strided_slice %111 {offsets = [0, 16], sizes = [2, 16], strides = [1, 1]} : vector<2x64xf32> to vector<2x16xf32>
    %124 = tpu.concatenate %122, %123 in 1 : vector<2x16xf32>, vector<2x16xf32> -> vector<2x32xf32>
    %cst_33 = arith.constant 0.000000e+00 : f32
    %125 = vector.broadcast %cst_33 : f32 to vector<2x32xf32>
    %126 = arith.subf %125, %124 : vector<2x32xf32>
    %127 = math.exp %126 : vector<2x32xf32>
    %cst_34 = arith.constant 1.000000e+00 : f32
    %128 = vector.broadcast %cst_34 : f32 to vector<2x32xf32>
    %129 = arith.addf %128, %127 : vector<2x32xf32>
    %cst_35 = arith.constant 1.000000e+00 : f32
    %130 = vector.broadcast %cst_35 : f32 to vector<2x32xf32>
    %131 = arith.divf %130, %129 : vector<2x32xf32>
    %132 = vector.extract_strided_slice %108 {offsets = [0, 32], sizes = [2, 16], strides = [1, 1]} : vector<2x64xf32> to vector<2x16xf32>
    %133 = vector.extract_strided_slice %111 {offsets = [0, 32], sizes = [2, 16], strides = [1, 1]} : vector<2x64xf32> to vector<2x16xf32>
    %134 = tpu.concatenate %132, %133 in 1 : vector<2x16xf32>, vector<2x16xf32> -> vector<2x32xf32>
    %135 = math.tanh %134 : vector<2x32xf32>
    %136 = vector.extract_strided_slice %108 {offsets = [0, 48], sizes = [2, 16], strides = [1, 1]} : vector<2x64xf32> to vector<2x16xf32>
    %137 = vector.extract_strided_slice %111 {offsets = [0, 48], sizes = [2, 16], strides = [1, 1]} : vector<2x64xf32> to vector<2x16xf32>
    %138 = tpu.concatenate %136, %137 in 1 : vector<2x16xf32>, vector<2x16xf32> -> vector<2x32xf32>
    %cst_36 = arith.constant 0.000000e+00 : f32
    %139 = vector.broadcast %cst_36 : f32 to vector<2x32xf32>
    %140 = arith.subf %139, %138 : vector<2x32xf32>
    %141 = math.exp %140 : vector<2x32xf32>
    %cst_37 = arith.constant 1.000000e+00 : f32
    %142 = vector.broadcast %cst_37 : f32 to vector<2x32xf32>
    %143 = arith.addf %142, %141 : vector<2x32xf32>
    %cst_38 = arith.constant 1.000000e+00 : f32
    %144 = vector.broadcast %cst_38 : f32 to vector<2x32xf32>
    %145 = arith.divf %144, %143 : vector<2x32xf32>
    %146 = arith.mulf %131, %100 : vector<2x32xf32>
    %147 = arith.mulf %121, %135 : vector<2x32xf32>
    %148 = arith.addf %146, %147 : vector<2x32xf32>
    %149 = math.tanh %148 : vector<2x32xf32>
    %150 = arith.mulf %145, %149 : vector<2x32xf32>
    %151 = vector.extract_strided_slice %150 {offsets = [0, 0], sizes = [2, 16], strides = [1, 1]} : vector<2x32xf32> to vector<2x16xf32>
    %152 = vector.extract_strided_slice %150 {offsets = [0, 16], sizes = [2, 16], strides = [1, 1]} : vector<2x32xf32> to vector<2x16xf32>
    %cst_39 = arith.constant dense<0.000000e+00> : vector<2x128xf32>
    %153 = tpu.matmul %150, %6, %cst_39 {dimension_numbers = #tpu.dot_dimension_numbers<[1], [0], [0], [1], [0, 0, 1, 1], [], []>} : vector<2x32xf32>, vector<32x128xf32>, vector<2x128xf32> -> vector<2x128xf32>
    %154 = vector.extract_strided_slice %5 {offsets = [6, 0], sizes = [2, 64], strides = [1, 1]} : vector<16x128xf32> to vector<2x64xf32>
    %155 = vector.extract_strided_slice %153 {offsets = [0, 0], sizes = [2, 64], strides = [1, 1]} : vector<2x128xf32> to vector<2x64xf32>
    %156 = arith.addf %154, %155 : vector<2x64xf32>
    %157 = vector.extract_strided_slice %5 {offsets = [8, 64], sizes = [2, 64], strides = [1, 1]} : vector<16x128xf32> to vector<2x64xf32>
    %158 = vector.extract_strided_slice %153 {offsets = [0, 64], sizes = [2, 64], strides = [1, 1]} : vector<2x128xf32> to vector<2x64xf32>
    %159 = arith.addf %157, %158 : vector<2x64xf32>
    %160 = vector.extract_strided_slice %156 {offsets = [0, 0], sizes = [2, 16], strides = [1, 1]} : vector<2x64xf32> to vector<2x16xf32>
    %161 = vector.extract_strided_slice %159 {offsets = [0, 0], sizes = [2, 16], strides = [1, 1]} : vector<2x64xf32> to vector<2x16xf32>
    %162 = tpu.concatenate %160, %161 in 1 : vector<2x16xf32>, vector<2x16xf32> -> vector<2x32xf32>
    %cst_40 = arith.constant 0.000000e+00 : f32
    %163 = vector.broadcast %cst_40 : f32 to vector<2x32xf32>
    %164 = arith.subf %163, %162 : vector<2x32xf32>
    %165 = math.exp %164 : vector<2x32xf32>
    %cst_41 = arith.constant 1.000000e+00 : f32
    %166 = vector.broadcast %cst_41 : f32 to vector<2x32xf32>
    %167 = arith.addf %166, %165 : vector<2x32xf32>
    %cst_42 = arith.constant 1.000000e+00 : f32
    %168 = vector.broadcast %cst_42 : f32 to vector<2x32xf32>
    %169 = arith.divf %168, %167 : vector<2x32xf32>
    %170 = vector.extract_strided_slice %156 {offsets = [0, 16], sizes = [2, 16], strides = [1, 1]} : vector<2x64xf32> to vector<2x16xf32>
    %171 = vector.extract_strided_slice %159 {offsets = [0, 16], sizes = [2, 16], strides = [1, 1]} : vector<2x64xf32> to vector<2x16xf32>
    %172 = tpu.concatenate %170, %171 in 1 : vector<2x16xf32>, vector<2x16xf32> -> vector<2x32xf32>
    %cst_43 = arith.constant 0.000000e+00 : f32
    %173 = vector.broadcast %cst_43 : f32 to vector<2x32xf32>
    %174 = arith.subf %173, %172 : vector<2x32xf32>
    %175 = math.exp %174 : vector<2x32xf32>
    %cst_44 = arith.constant 1.000000e+00 : f32
    %176 = vector.broadcast %cst_44 : f32 to vector<2x32xf32>
    %177 = arith.addf %176, %175 : vector<2x32xf32>
    %cst_45 = arith.constant 1.000000e+00 : f32
    %178 = vector.broadcast %cst_45 : f32 to vector<2x32xf32>
    %179 = arith.divf %178, %177 : vector<2x32xf32>
    %180 = vector.extract_strided_slice %156 {offsets = [0, 32], sizes = [2, 16], strides = [1, 1]} : vector<2x64xf32> to vector<2x16xf32>
    %181 = vector.extract_strided_slice %159 {offsets = [0, 32], sizes = [2, 16], strides = [1, 1]} : vector<2x64xf32> to vector<2x16xf32>
    %182 = tpu.concatenate %180, %181 in 1 : vector<2x16xf32>, vector<2x16xf32> -> vector<2x32xf32>
    %183 = math.tanh %182 : vector<2x32xf32>
    %184 = vector.extract_strided_slice %156 {offsets = [0, 48], sizes = [2, 16], strides = [1, 1]} : vector<2x64xf32> to vector<2x16xf32>
    %185 = vector.extract_strided_slice %159 {offsets = [0, 48], sizes = [2, 16], strides = [1, 1]} : vector<2x64xf32> to vector<2x16xf32>
    %186 = tpu.concatenate %184, %185 in 1 : vector<2x16xf32>, vector<2x16xf32> -> vector<2x32xf32>
    %cst_46 = arith.constant 0.000000e+00 : f32
    %187 = vector.broadcast %cst_46 : f32 to vector<2x32xf32>
    %188 = arith.subf %187, %186 : vector<2x32xf32>
    %189 = math.exp %188 : vector<2x32xf32>
    %cst_47 = arith.constant 1.000000e+00 : f32
    %190 = vector.broadcast %cst_47 : f32 to vector<2x32xf32>
    %191 = arith.addf %190, %189 : vector<2x32xf32>
    %cst_48 = arith.constant 1.000000e+00 : f32
    %192 = vector.broadcast %cst_48 : f32 to vector<2x32xf32>
    %193 = arith.divf %192, %191 : vector<2x32xf32>
    %194 = arith.mulf %179, %148 : vector<2x32xf32>
    %195 = arith.mulf %169, %183 : vector<2x32xf32>
    %196 = arith.addf %194, %195 : vector<2x32xf32>
    %197 = math.tanh %196 : vector<2x32xf32>
    %198 = arith.mulf %193, %197 : vector<2x32xf32>
    %199 = vector.extract_strided_slice %198 {offsets = [0, 0], sizes = [2, 16], strides = [1, 1]} : vector<2x32xf32> to vector<2x16xf32>
    %200 = vector.extract_strided_slice %198 {offsets = [0, 16], sizes = [2, 16], strides = [1, 1]} : vector<2x32xf32> to vector<2x16xf32>
    %cst_49 = arith.constant dense<0.000000e+00> : vector<2x128xf32>
    %201 = tpu.matmul %198, %6, %cst_49 {dimension_numbers = #tpu.dot_dimension_numbers<[1], [0], [0], [1], [0, 0, 1, 1], [], []>} : vector<2x32xf32>, vector<32x128xf32>, vector<2x128xf32> -> vector<2x128xf32>
    %202 = vector.extract_strided_slice %5 {offsets = [8, 0], sizes = [2, 64], strides = [1, 1]} : vector<16x128xf32> to vector<2x64xf32>
    %203 = vector.extract_strided_slice %201 {offsets = [0, 0], sizes = [2, 64], strides = [1, 1]} : vector<2x128xf32> to vector<2x64xf32>
    %204 = arith.addf %202, %203 : vector<2x64xf32>
    %205 = vector.extract_strided_slice %5 {offsets = [6, 64], sizes = [2, 64], strides = [1, 1]} : vector<16x128xf32> to vector<2x64xf32>
    %206 = vector.extract_strided_slice %201 {offsets = [0, 64], sizes = [2, 64], strides = [1, 1]} : vector<2x128xf32> to vector<2x64xf32>
    %207 = arith.addf %205, %206 : vector<2x64xf32>
    %208 = vector.extract_strided_slice %204 {offsets = [0, 0], sizes = [2, 16], strides = [1, 1]} : vector<2x64xf32> to vector<2x16xf32>
    %209 = vector.extract_strided_slice %207 {offsets = [0, 0], sizes = [2, 16], strides = [1, 1]} : vector<2x64xf32> to vector<2x16xf32>
    %210 = tpu.concatenate %208, %209 in 1 : vector<2x16xf32>, vector<2x16xf32> -> vector<2x32xf32>
    %cst_50 = arith.constant 0.000000e+00 : f32
    %211 = vector.broadcast %cst_50 : f32 to vector<2x32xf32>
    %212 = arith.subf %211, %210 : vector<2x32xf32>
    %213 = math.exp %212 : vector<2x32xf32>
    %cst_51 = arith.constant 1.000000e+00 : f32
    %214 = vector.broadcast %cst_51 : f32 to vector<2x32xf32>
    %215 = arith.addf %214, %213 : vector<2x32xf32>
    %cst_52 = arith.constant 1.000000e+00 : f32
    %216 = vector.broadcast %cst_52 : f32 to vector<2x32xf32>
    %217 = arith.divf %216, %215 : vector<2x32xf32>
    %218 = vector.extract_strided_slice %204 {offsets = [0, 16], sizes = [2, 16], strides = [1, 1]} : vector<2x64xf32> to vector<2x16xf32>
    %219 = vector.extract_strided_slice %207 {offsets = [0, 16], sizes = [2, 16], strides = [1, 1]} : vector<2x64xf32> to vector<2x16xf32>
    %220 = tpu.concatenate %218, %219 in 1 : vector<2x16xf32>, vector<2x16xf32> -> vector<2x32xf32>
    %cst_53 = arith.constant 0.000000e+00 : f32
    %221 = vector.broadcast %cst_53 : f32 to vector<2x32xf32>
    %222 = arith.subf %221, %220 : vector<2x32xf32>
    %223 = math.exp %222 : vector<2x32xf32>
    %cst_54 = arith.constant 1.000000e+00 : f32
    %224 = vector.broadcast %cst_54 : f32 to vector<2x32xf32>
    %225 = arith.addf %224, %223 : vector<2x32xf32>
    %cst_55 = arith.constant 1.000000e+00 : f32
    %226 = vector.broadcast %cst_55 : f32 to vector<2x32xf32>
    %227 = arith.divf %226, %225 : vector<2x32xf32>
    %228 = vector.extract_strided_slice %204 {offsets = [0, 32], sizes = [2, 16], strides = [1, 1]} : vector<2x64xf32> to vector<2x16xf32>
    %229 = vector.extract_strided_slice %207 {offsets = [0, 32], sizes = [2, 16], strides = [1, 1]} : vector<2x64xf32> to vector<2x16xf32>
    %230 = tpu.concatenate %228, %229 in 1 : vector<2x16xf32>, vector<2x16xf32> -> vector<2x32xf32>
    %231 = math.tanh %230 : vector<2x32xf32>
    %232 = vector.extract_strided_slice %204 {offsets = [0, 48], sizes = [2, 16], strides = [1, 1]} : vector<2x64xf32> to vector<2x16xf32>
    %233 = vector.extract_strided_slice %207 {offsets = [0, 48], sizes = [2, 16], strides = [1, 1]} : vector<2x64xf32> to vector<2x16xf32>
    %234 = tpu.concatenate %232, %233 in 1 : vector<2x16xf32>, vector<2x16xf32> -> vector<2x32xf32>
    %cst_56 = arith.constant 0.000000e+00 : f32
    %235 = vector.broadcast %cst_56 : f32 to vector<2x32xf32>
    %236 = arith.subf %235, %234 : vector<2x32xf32>
    %237 = math.exp %236 : vector<2x32xf32>
    %cst_57 = arith.constant 1.000000e+00 : f32
    %238 = vector.broadcast %cst_57 : f32 to vector<2x32xf32>
    %239 = arith.addf %238, %237 : vector<2x32xf32>
    %cst_58 = arith.constant 1.000000e+00 : f32
    %240 = vector.broadcast %cst_58 : f32 to vector<2x32xf32>
    %241 = arith.divf %240, %239 : vector<2x32xf32>
    %242 = arith.mulf %227, %196 : vector<2x32xf32>
    %243 = arith.mulf %217, %231 : vector<2x32xf32>
    %244 = arith.addf %242, %243 : vector<2x32xf32>
    %245 = math.tanh %244 : vector<2x32xf32>
    %246 = arith.mulf %241, %245 : vector<2x32xf32>
    %247 = vector.extract_strided_slice %246 {offsets = [0, 0], sizes = [2, 16], strides = [1, 1]} : vector<2x32xf32> to vector<2x16xf32>
    %248 = vector.extract_strided_slice %246 {offsets = [0, 16], sizes = [2, 16], strides = [1, 1]} : vector<2x32xf32> to vector<2x16xf32>
    %cst_59 = arith.constant dense<0.000000e+00> : vector<2x128xf32>
    %249 = tpu.matmul %246, %6, %cst_59 {dimension_numbers = #tpu.dot_dimension_numbers<[1], [0], [0], [1], [0, 0, 1, 1], [], []>} : vector<2x32xf32>, vector<32x128xf32>, vector<2x128xf32> -> vector<2x128xf32>
    %250 = vector.extract_strided_slice %5 {offsets = [10, 0], sizes = [2, 64], strides = [1, 1]} : vector<16x128xf32> to vector<2x64xf32>
    %251 = vector.extract_strided_slice %249 {offsets = [0, 0], sizes = [2, 64], strides = [1, 1]} : vector<2x128xf32> to vector<2x64xf32>
    %252 = arith.addf %250, %251 : vector<2x64xf32>
    %253 = vector.extract_strided_slice %5 {offsets = [4, 64], sizes = [2, 64], strides = [1, 1]} : vector<16x128xf32> to vector<2x64xf32>
    %254 = vector.extract_strided_slice %249 {offsets = [0, 64], sizes = [2, 64], strides = [1, 1]} : vector<2x128xf32> to vector<2x64xf32>
    %255 = arith.addf %253, %254 : vector<2x64xf32>
    %256 = vector.extract_strided_slice %252 {offsets = [0, 0], sizes = [2, 16], strides = [1, 1]} : vector<2x64xf32> to vector<2x16xf32>
    %257 = vector.extract_strided_slice %255 {offsets = [0, 0], sizes = [2, 16], strides = [1, 1]} : vector<2x64xf32> to vector<2x16xf32>
    %258 = tpu.concatenate %256, %257 in 1 : vector<2x16xf32>, vector<2x16xf32> -> vector<2x32xf32>
    %cst_60 = arith.constant 0.000000e+00 : f32
    %259 = vector.broadcast %cst_60 : f32 to vector<2x32xf32>
    %260 = arith.subf %259, %258 : vector<2x32xf32>
    %261 = math.exp %260 : vector<2x32xf32>
    %cst_61 = arith.constant 1.000000e+00 : f32
    %262 = vector.broadcast %cst_61 : f32 to vector<2x32xf32>
    %263 = arith.addf %262, %261 : vector<2x32xf32>
    %cst_62 = arith.constant 1.000000e+00 : f32
    %264 = vector.broadcast %cst_62 : f32 to vector<2x32xf32>
    %265 = arith.divf %264, %263 : vector<2x32xf32>
    %266 = vector.extract_strided_slice %252 {offsets = [0, 16], sizes = [2, 16], strides = [1, 1]} : vector<2x64xf32> to vector<2x16xf32>
    %267 = vector.extract_strided_slice %255 {offsets = [0, 16], sizes = [2, 16], strides = [1, 1]} : vector<2x64xf32> to vector<2x16xf32>
    %268 = tpu.concatenate %266, %267 in 1 : vector<2x16xf32>, vector<2x16xf32> -> vector<2x32xf32>
    %cst_63 = arith.constant 0.000000e+00 : f32
    %269 = vector.broadcast %cst_63 : f32 to vector<2x32xf32>
    %270 = arith.subf %269, %268 : vector<2x32xf32>
    %271 = math.exp %270 : vector<2x32xf32>
    %cst_64 = arith.constant 1.000000e+00 : f32
    %272 = vector.broadcast %cst_64 : f32 to vector<2x32xf32>
    %273 = arith.addf %272, %271 : vector<2x32xf32>
    %cst_65 = arith.constant 1.000000e+00 : f32
    %274 = vector.broadcast %cst_65 : f32 to vector<2x32xf32>
    %275 = arith.divf %274, %273 : vector<2x32xf32>
    %276 = vector.extract_strided_slice %252 {offsets = [0, 32], sizes = [2, 16], strides = [1, 1]} : vector<2x64xf32> to vector<2x16xf32>
    %277 = vector.extract_strided_slice %255 {offsets = [0, 32], sizes = [2, 16], strides = [1, 1]} : vector<2x64xf32> to vector<2x16xf32>
    %278 = tpu.concatenate %276, %277 in 1 : vector<2x16xf32>, vector<2x16xf32> -> vector<2x32xf32>
    %279 = math.tanh %278 : vector<2x32xf32>
    %280 = vector.extract_strided_slice %252 {offsets = [0, 48], sizes = [2, 16], strides = [1, 1]} : vector<2x64xf32> to vector<2x16xf32>
    %281 = vector.extract_strided_slice %255 {offsets = [0, 48], sizes = [2, 16], strides = [1, 1]} : vector<2x64xf32> to vector<2x16xf32>
    %282 = tpu.concatenate %280, %281 in 1 : vector<2x16xf32>, vector<2x16xf32> -> vector<2x32xf32>
    %cst_66 = arith.constant 0.000000e+00 : f32
    %283 = vector.broadcast %cst_66 : f32 to vector<2x32xf32>
    %284 = arith.subf %283, %282 : vector<2x32xf32>
    %285 = math.exp %284 : vector<2x32xf32>
    %cst_67 = arith.constant 1.000000e+00 : f32
    %286 = vector.broadcast %cst_67 : f32 to vector<2x32xf32>
    %287 = arith.addf %286, %285 : vector<2x32xf32>
    %cst_68 = arith.constant 1.000000e+00 : f32
    %288 = vector.broadcast %cst_68 : f32 to vector<2x32xf32>
    %289 = arith.divf %288, %287 : vector<2x32xf32>
    %290 = arith.mulf %275, %244 : vector<2x32xf32>
    %291 = arith.mulf %265, %279 : vector<2x32xf32>
    %292 = arith.addf %290, %291 : vector<2x32xf32>
    %293 = math.tanh %292 : vector<2x32xf32>
    %294 = arith.mulf %289, %293 : vector<2x32xf32>
    %295 = vector.extract_strided_slice %294 {offsets = [0, 0], sizes = [2, 16], strides = [1, 1]} : vector<2x32xf32> to vector<2x16xf32>
    %296 = vector.extract_strided_slice %294 {offsets = [0, 16], sizes = [2, 16], strides = [1, 1]} : vector<2x32xf32> to vector<2x16xf32>
    %cst_69 = arith.constant dense<0.000000e+00> : vector<2x128xf32>
    %297 = tpu.matmul %294, %6, %cst_69 {dimension_numbers = #tpu.dot_dimension_numbers<[1], [0], [0], [1], [0, 0, 1, 1], [], []>} : vector<2x32xf32>, vector<32x128xf32>, vector<2x128xf32> -> vector<2x128xf32>
    %298 = vector.extract_strided_slice %5 {offsets = [12, 0], sizes = [2, 64], strides = [1, 1]} : vector<16x128xf32> to vector<2x64xf32>
    %299 = vector.extract_strided_slice %297 {offsets = [0, 0], sizes = [2, 64], strides = [1, 1]} : vector<2x128xf32> to vector<2x64xf32>
    %300 = arith.addf %298, %299 : vector<2x64xf32>
    %301 = vector.extract_strided_slice %5 {offsets = [2, 64], sizes = [2, 64], strides = [1, 1]} : vector<16x128xf32> to vector<2x64xf32>
    %302 = vector.extract_strided_slice %297 {offsets = [0, 64], sizes = [2, 64], strides = [1, 1]} : vector<2x128xf32> to vector<2x64xf32>
    %303 = arith.addf %301, %302 : vector<2x64xf32>
    %304 = vector.extract_strided_slice %300 {offsets = [0, 0], sizes = [2, 16], strides = [1, 1]} : vector<2x64xf32> to vector<2x16xf32>
    %305 = vector.extract_strided_slice %303 {offsets = [0, 0], sizes = [2, 16], strides = [1, 1]} : vector<2x64xf32> to vector<2x16xf32>
    %306 = tpu.concatenate %304, %305 in 1 : vector<2x16xf32>, vector<2x16xf32> -> vector<2x32xf32>
    %cst_70 = arith.constant 0.000000e+00 : f32
    %307 = vector.broadcast %cst_70 : f32 to vector<2x32xf32>
    %308 = arith.subf %307, %306 : vector<2x32xf32>
    %309 = math.exp %308 : vector<2x32xf32>
    %cst_71 = arith.constant 1.000000e+00 : f32
    %310 = vector.broadcast %cst_71 : f32 to vector<2x32xf32>
    %311 = arith.addf %310, %309 : vector<2x32xf32>
    %cst_72 = arith.constant 1.000000e+00 : f32
    %312 = vector.broadcast %cst_72 : f32 to vector<2x32xf32>
    %313 = arith.divf %312, %311 : vector<2x32xf32>
    %314 = vector.extract_strided_slice %300 {offsets = [0, 16], sizes = [2, 16], strides = [1, 1]} : vector<2x64xf32> to vector<2x16xf32>
    %315 = vector.extract_strided_slice %303 {offsets = [0, 16], sizes = [2, 16], strides = [1, 1]} : vector<2x64xf32> to vector<2x16xf32>
    %316 = tpu.concatenate %314, %315 in 1 : vector<2x16xf32>, vector<2x16xf32> -> vector<2x32xf32>
    %cst_73 = arith.constant 0.000000e+00 : f32
    %317 = vector.broadcast %cst_73 : f32 to vector<2x32xf32>
    %318 = arith.subf %317, %316 : vector<2x32xf32>
    %319 = math.exp %318 : vector<2x32xf32>
    %cst_74 = arith.constant 1.000000e+00 : f32
    %320 = vector.broadcast %cst_74 : f32 to vector<2x32xf32>
    %321 = arith.addf %320, %319 : vector<2x32xf32>
    %cst_75 = arith.constant 1.000000e+00 : f32
    %322 = vector.broadcast %cst_75 : f32 to vector<2x32xf32>
    %323 = arith.divf %322, %321 : vector<2x32xf32>
    %324 = vector.extract_strided_slice %300 {offsets = [0, 32], sizes = [2, 16], strides = [1, 1]} : vector<2x64xf32> to vector<2x16xf32>
    %325 = vector.extract_strided_slice %303 {offsets = [0, 32], sizes = [2, 16], strides = [1, 1]} : vector<2x64xf32> to vector<2x16xf32>
    %326 = tpu.concatenate %324, %325 in 1 : vector<2x16xf32>, vector<2x16xf32> -> vector<2x32xf32>
    %327 = math.tanh %326 : vector<2x32xf32>
    %328 = vector.extract_strided_slice %300 {offsets = [0, 48], sizes = [2, 16], strides = [1, 1]} : vector<2x64xf32> to vector<2x16xf32>
    %329 = vector.extract_strided_slice %303 {offsets = [0, 48], sizes = [2, 16], strides = [1, 1]} : vector<2x64xf32> to vector<2x16xf32>
    %330 = tpu.concatenate %328, %329 in 1 : vector<2x16xf32>, vector<2x16xf32> -> vector<2x32xf32>
    %cst_76 = arith.constant 0.000000e+00 : f32
    %331 = vector.broadcast %cst_76 : f32 to vector<2x32xf32>
    %332 = arith.subf %331, %330 : vector<2x32xf32>
    %333 = math.exp %332 : vector<2x32xf32>
    %cst_77 = arith.constant 1.000000e+00 : f32
    %334 = vector.broadcast %cst_77 : f32 to vector<2x32xf32>
    %335 = arith.addf %334, %333 : vector<2x32xf32>
    %cst_78 = arith.constant 1.000000e+00 : f32
    %336 = vector.broadcast %cst_78 : f32 to vector<2x32xf32>
    %337 = arith.divf %336, %335 : vector<2x32xf32>
    %338 = arith.mulf %323, %292 : vector<2x32xf32>
    %339 = arith.mulf %313, %327 : vector<2x32xf32>
    %340 = arith.addf %338, %339 : vector<2x32xf32>
    %341 = math.tanh %340 : vector<2x32xf32>
    %342 = arith.mulf %337, %341 : vector<2x32xf32>
    %343 = vector.extract_strided_slice %342 {offsets = [0, 0], sizes = [2, 16], strides = [1, 1]} : vector<2x32xf32> to vector<2x16xf32>
    %344 = vector.extract_strided_slice %342 {offsets = [0, 16], sizes = [2, 16], strides = [1, 1]} : vector<2x32xf32> to vector<2x16xf32>
    %cst_79 = arith.constant dense<0.000000e+00> : vector<2x128xf32>
    %345 = tpu.matmul %342, %6, %cst_79 {dimension_numbers = #tpu.dot_dimension_numbers<[1], [0], [0], [1], [0, 0, 1, 1], [], []>} : vector<2x32xf32>, vector<32x128xf32>, vector<2x128xf32> -> vector<2x128xf32>
    %346 = vector.extract_strided_slice %5 {offsets = [14, 0], sizes = [2, 64], strides = [1, 1]} : vector<16x128xf32> to vector<2x64xf32>
    %347 = vector.extract_strided_slice %345 {offsets = [0, 0], sizes = [2, 64], strides = [1, 1]} : vector<2x128xf32> to vector<2x64xf32>
    %348 = arith.addf %346, %347 : vector<2x64xf32>
    %349 = vector.extract_strided_slice %5 {offsets = [0, 64], sizes = [2, 64], strides = [1, 1]} : vector<16x128xf32> to vector<2x64xf32>
    %350 = vector.extract_strided_slice %345 {offsets = [0, 64], sizes = [2, 64], strides = [1, 1]} : vector<2x128xf32> to vector<2x64xf32>
    %351 = arith.addf %349, %350 : vector<2x64xf32>
    %352 = vector.extract_strided_slice %348 {offsets = [0, 0], sizes = [2, 16], strides = [1, 1]} : vector<2x64xf32> to vector<2x16xf32>
    %353 = vector.extract_strided_slice %351 {offsets = [0, 0], sizes = [2, 16], strides = [1, 1]} : vector<2x64xf32> to vector<2x16xf32>
    %354 = tpu.concatenate %352, %353 in 1 : vector<2x16xf32>, vector<2x16xf32> -> vector<2x32xf32>
    %cst_80 = arith.constant 0.000000e+00 : f32
    %355 = vector.broadcast %cst_80 : f32 to vector<2x32xf32>
    %356 = arith.subf %355, %354 : vector<2x32xf32>
    %357 = math.exp %356 : vector<2x32xf32>
    %cst_81 = arith.constant 1.000000e+00 : f32
    %358 = vector.broadcast %cst_81 : f32 to vector<2x32xf32>
    %359 = arith.addf %358, %357 : vector<2x32xf32>
    %cst_82 = arith.constant 1.000000e+00 : f32
    %360 = vector.broadcast %cst_82 : f32 to vector<2x32xf32>
    %361 = arith.divf %360, %359 : vector<2x32xf32>
    %362 = vector.extract_strided_slice %348 {offsets = [0, 16], sizes = [2, 16], strides = [1, 1]} : vector<2x64xf32> to vector<2x16xf32>
    %363 = vector.extract_strided_slice %351 {offsets = [0, 16], sizes = [2, 16], strides = [1, 1]} : vector<2x64xf32> to vector<2x16xf32>
    %364 = tpu.concatenate %362, %363 in 1 : vector<2x16xf32>, vector<2x16xf32> -> vector<2x32xf32>
    %cst_83 = arith.constant 0.000000e+00 : f32
    %365 = vector.broadcast %cst_83 : f32 to vector<2x32xf32>
    %366 = arith.subf %365, %364 : vector<2x32xf32>
    %367 = math.exp %366 : vector<2x32xf32>
    %cst_84 = arith.constant 1.000000e+00 : f32
    %368 = vector.broadcast %cst_84 : f32 to vector<2x32xf32>
    %369 = arith.addf %368, %367 : vector<2x32xf32>
    %cst_85 = arith.constant 1.000000e+00 : f32
    %370 = vector.broadcast %cst_85 : f32 to vector<2x32xf32>
    %371 = arith.divf %370, %369 : vector<2x32xf32>
    %372 = vector.extract_strided_slice %348 {offsets = [0, 32], sizes = [2, 16], strides = [1, 1]} : vector<2x64xf32> to vector<2x16xf32>
    %373 = vector.extract_strided_slice %351 {offsets = [0, 32], sizes = [2, 16], strides = [1, 1]} : vector<2x64xf32> to vector<2x16xf32>
    %374 = tpu.concatenate %372, %373 in 1 : vector<2x16xf32>, vector<2x16xf32> -> vector<2x32xf32>
    %375 = math.tanh %374 : vector<2x32xf32>
    %376 = vector.extract_strided_slice %348 {offsets = [0, 48], sizes = [2, 16], strides = [1, 1]} : vector<2x64xf32> to vector<2x16xf32>
    %377 = vector.extract_strided_slice %351 {offsets = [0, 48], sizes = [2, 16], strides = [1, 1]} : vector<2x64xf32> to vector<2x16xf32>
    %378 = tpu.concatenate %376, %377 in 1 : vector<2x16xf32>, vector<2x16xf32> -> vector<2x32xf32>
    %cst_86 = arith.constant 0.000000e+00 : f32
    %379 = vector.broadcast %cst_86 : f32 to vector<2x32xf32>
    %380 = arith.subf %379, %378 : vector<2x32xf32>
    %381 = math.exp %380 : vector<2x32xf32>
    %cst_87 = arith.constant 1.000000e+00 : f32
    %382 = vector.broadcast %cst_87 : f32 to vector<2x32xf32>
    %383 = arith.addf %382, %381 : vector<2x32xf32>
    %cst_88 = arith.constant 1.000000e+00 : f32
    %384 = vector.broadcast %cst_88 : f32 to vector<2x32xf32>
    %385 = arith.divf %384, %383 : vector<2x32xf32>
    %386 = arith.mulf %371, %340 : vector<2x32xf32>
    %387 = arith.mulf %361, %375 : vector<2x32xf32>
    %388 = arith.addf %386, %387 : vector<2x32xf32>
    %389 = math.tanh %388 : vector<2x32xf32>
    %390 = arith.mulf %385, %389 : vector<2x32xf32>
    %391 = vector.extract_strided_slice %390 {offsets = [0, 0], sizes = [2, 16], strides = [1, 1]} : vector<2x32xf32> to vector<2x16xf32>
    %392 = vector.extract_strided_slice %390 {offsets = [0, 16], sizes = [2, 16], strides = [1, 1]} : vector<2x32xf32> to vector<2x16xf32>
    %393 = tpu.concatenate %55, %103, %151, %199, %247, %295, %343, %391 in 0 : vector<2x16xf32>, vector<2x16xf32>, vector<2x16xf32>, vector<2x16xf32>, vector<2x16xf32>, vector<2x16xf32>, vector<2x16xf32>, vector<2x16xf32> -> vector<16x16xf32>
    %394 = tpu.concatenate %392, %344, %296, %248, %200, %152, %104, %56 in 0 : vector<2x16xf32>, vector<2x16xf32>, vector<2x16xf32>, vector<2x16xf32>, vector<2x16xf32>, vector<2x16xf32>, vector<2x16xf32>, vector<2x16xf32> -> vector<16x16xf32>
    %395 = tpu.concatenate %393, %394 in 1 : vector<16x16xf32>, vector<16x16xf32> -> vector<16x32xf32>
    %c0_89 = arith.constant 0 : index
    %c0_90 = arith.constant 0 : index
    %396 = vector.load %arg5[%c0_89, %c0_90] : memref<32x32xf32, #tpu.memory_space<vmem>>, vector<32x32xf32>
    %cst_91 = arith.constant dense<0.000000e+00> : vector<16x32xf32>
    %397 = tpu.matmul %395, %396, %cst_91 {dimension_numbers = #tpu.dot_dimension_numbers<[1], [0], [0], [1], [0, 0, 1, 1], [], []>} : vector<16x32xf32>, vector<32x32xf32>, vector<16x32xf32> -> vector<16x32xf32>
    %c0_92 = arith.constant 0 : index
    %c0_93 = arith.constant 0 : index
    %398 = vector.load %arg6[%c0_92, %c0_93] : memref<1x32xf32, #tpu.memory_space<vmem>>, vector<1x32xf32>
    %399 = vector.broadcast %398 : vector<1x32xf32> to vector<16x32xf32>
    %400 = arith.addf %397, %399 : vector<16x32xf32>
    %c0_94 = arith.constant 0 : index
    %c0_95 = arith.constant 0 : index
    %401 = vector.load %arg7[%c0_94, %c0_95] : memref<32x64xf32, #tpu.memory_space<vmem>>, vector<32x64xf32>
    %cst_96 = arith.constant dense<0.000000e+00> : vector<16x64xf32>
    %402 = tpu.matmul %0, %401, %cst_96 {dimension_numbers = #tpu.dot_dimension_numbers<[1], [0], [0], [1], [0, 0, 1, 1], [], []>} : vector<16x32xf32>, vector<32x64xf32>, vector<16x64xf32> -> vector<16x64xf32>
    %c0_97 = arith.constant 0 : index
    %c0_98 = arith.constant 0 : index
    %403 = vector.load %arg8[%c0_97, %c0_98] : memref<1x64xf32, #tpu.memory_space<vmem>>, vector<1x64xf32>
    %404 = vector.broadcast %403 : vector<1x64xf32> to vector<16x64xf32>
    %405 = arith.addf %402, %404 : vector<16x64xf32>
    %406 = vector.extract_strided_slice %405 {offsets = [0, 0], sizes = [16, 32], strides = [1, 1]} : vector<16x64xf32> to vector<16x32xf32>
    %407 = vector.extract_strided_slice %405 {offsets = [0, 32], sizes = [16, 32], strides = [1, 1]} : vector<16x64xf32> to vector<16x32xf32>
    %408 = vector.extract_strided_slice %400 {offsets = [0, 0], sizes = [16, 4], strides = [1, 1]} : vector<16x32xf32> to vector<16x4xf32>
    %409 = vector.extract_strided_slice %400 {offsets = [0, 4], sizes = [16, 4], strides = [1, 1]} : vector<16x32xf32> to vector<16x4xf32>
    %410 = vector.extract_strided_slice %400 {offsets = [0, 8], sizes = [16, 4], strides = [1, 1]} : vector<16x32xf32> to vector<16x4xf32>
    %411 = vector.extract_strided_slice %400 {offsets = [0, 12], sizes = [16, 4], strides = [1, 1]} : vector<16x32xf32> to vector<16x4xf32>
    %412 = vector.extract_strided_slice %400 {offsets = [0, 16], sizes = [16, 4], strides = [1, 1]} : vector<16x32xf32> to vector<16x4xf32>
    %413 = vector.extract_strided_slice %400 {offsets = [0, 20], sizes = [16, 4], strides = [1, 1]} : vector<16x32xf32> to vector<16x4xf32>
    %414 = vector.extract_strided_slice %400 {offsets = [0, 24], sizes = [16, 4], strides = [1, 1]} : vector<16x32xf32> to vector<16x4xf32>
    %415 = vector.extract_strided_slice %400 {offsets = [0, 28], sizes = [16, 4], strides = [1, 1]} : vector<16x32xf32> to vector<16x4xf32>
    %416 = vector.shape_cast %408 : vector<16x4xf32> to vector<1x16x4xf32>
    %417 = vector.shape_cast %409 : vector<16x4xf32> to vector<1x16x4xf32>
    %418 = vector.shape_cast %410 : vector<16x4xf32> to vector<1x16x4xf32>
    %419 = vector.shape_cast %411 : vector<16x4xf32> to vector<1x16x4xf32>
    %420 = vector.shape_cast %412 : vector<16x4xf32> to vector<1x16x4xf32>
    %421 = vector.shape_cast %413 : vector<16x4xf32> to vector<1x16x4xf32>
    %422 = vector.shape_cast %414 : vector<16x4xf32> to vector<1x16x4xf32>
    %423 = vector.shape_cast %415 : vector<16x4xf32> to vector<1x16x4xf32>
    %424 = tpu.concatenate %416, %417, %418, %419, %420, %421, %422, %423 in 0 : vector<1x16x4xf32>, vector<1x16x4xf32>, vector<1x16x4xf32>, vector<1x16x4xf32>, vector<1x16x4xf32>, vector<1x16x4xf32>, vector<1x16x4xf32>, vector<1x16x4xf32> -> vector<8x16x4xf32>
    %425 = vector.extract_strided_slice %406 {offsets = [0, 0], sizes = [16, 4], strides = [1, 1]} : vector<16x32xf32> to vector<16x4xf32>
    %426 = vector.extract_strided_slice %406 {offsets = [0, 4], sizes = [16, 4], strides = [1, 1]} : vector<16x32xf32> to vector<16x4xf32>
    %427 = vector.extract_strided_slice %406 {offsets = [0, 8], sizes = [16, 4], strides = [1, 1]} : vector<16x32xf32> to vector<16x4xf32>
    %428 = vector.extract_strided_slice %406 {offsets = [0, 12], sizes = [16, 4], strides = [1, 1]} : vector<16x32xf32> to vector<16x4xf32>
    %429 = vector.extract_strided_slice %406 {offsets = [0, 16], sizes = [16, 4], strides = [1, 1]} : vector<16x32xf32> to vector<16x4xf32>
    %430 = vector.extract_strided_slice %406 {offsets = [0, 20], sizes = [16, 4], strides = [1, 1]} : vector<16x32xf32> to vector<16x4xf32>
    %431 = vector.extract_strided_slice %406 {offsets = [0, 24], sizes = [16, 4], strides = [1, 1]} : vector<16x32xf32> to vector<16x4xf32>
    %432 = vector.extract_strided_slice %406 {offsets = [0, 28], sizes = [16, 4], strides = [1, 1]} : vector<16x32xf32> to vector<16x4xf32>
    %433 = vector.shape_cast %425 : vector<16x4xf32> to vector<1x16x4xf32>
    %434 = vector.shape_cast %426 : vector<16x4xf32> to vector<1x16x4xf32>
    %435 = vector.shape_cast %427 : vector<16x4xf32> to vector<1x16x4xf32>
    %436 = vector.shape_cast %428 : vector<16x4xf32> to vector<1x16x4xf32>
    %437 = vector.shape_cast %429 : vector<16x4xf32> to vector<1x16x4xf32>
    %438 = vector.shape_cast %430 : vector<16x4xf32> to vector<1x16x4xf32>
    %439 = vector.shape_cast %431 : vector<16x4xf32> to vector<1x16x4xf32>
    %440 = vector.shape_cast %432 : vector<16x4xf32> to vector<1x16x4xf32>
    %441 = tpu.concatenate %433, %434, %435, %436, %437, %438, %439, %440 in 0 : vector<1x16x4xf32>, vector<1x16x4xf32>, vector<1x16x4xf32>, vector<1x16x4xf32>, vector<1x16x4xf32>, vector<1x16x4xf32>, vector<1x16x4xf32>, vector<1x16x4xf32> -> vector<8x16x4xf32>
    %442 = vector.extract_strided_slice %407 {offsets = [0, 0], sizes = [16, 4], strides = [1, 1]} : vector<16x32xf32> to vector<16x4xf32>
    %443 = vector.extract_strided_slice %407 {offsets = [0, 4], sizes = [16, 4], strides = [1, 1]} : vector<16x32xf32> to vector<16x4xf32>
    %444 = vector.extract_strided_slice %407 {offsets = [0, 8], sizes = [16, 4], strides = [1, 1]} : vector<16x32xf32> to vector<16x4xf32>
    %445 = vector.extract_strided_slice %407 {offsets = [0, 12], sizes = [16, 4], strides = [1, 1]} : vector<16x32xf32> to vector<16x4xf32>
    %446 = vector.extract_strided_slice %407 {offsets = [0, 16], sizes = [16, 4], strides = [1, 1]} : vector<16x32xf32> to vector<16x4xf32>
    %447 = vector.extract_strided_slice %407 {offsets = [0, 20], sizes = [16, 4], strides = [1, 1]} : vector<16x32xf32> to vector<16x4xf32>
    %448 = vector.extract_strided_slice %407 {offsets = [0, 24], sizes = [16, 4], strides = [1, 1]} : vector<16x32xf32> to vector<16x4xf32>
    %449 = vector.extract_strided_slice %407 {offsets = [0, 28], sizes = [16, 4], strides = [1, 1]} : vector<16x32xf32> to vector<16x4xf32>
    %450 = vector.shape_cast %442 : vector<16x4xf32> to vector<1x16x4xf32>
    %451 = vector.shape_cast %443 : vector<16x4xf32> to vector<1x16x4xf32>
    %452 = vector.shape_cast %444 : vector<16x4xf32> to vector<1x16x4xf32>
    %453 = vector.shape_cast %445 : vector<16x4xf32> to vector<1x16x4xf32>
    %454 = vector.shape_cast %446 : vector<16x4xf32> to vector<1x16x4xf32>
    %455 = vector.shape_cast %447 : vector<16x4xf32> to vector<1x16x4xf32>
    %456 = vector.shape_cast %448 : vector<16x4xf32> to vector<1x16x4xf32>
    %457 = vector.shape_cast %449 : vector<16x4xf32> to vector<1x16x4xf32>
    %458 = tpu.concatenate %450, %451, %452, %453, %454, %455, %456, %457 in 0 : vector<1x16x4xf32>, vector<1x16x4xf32>, vector<1x16x4xf32>, vector<1x16x4xf32>, vector<1x16x4xf32>, vector<1x16x4xf32>, vector<1x16x4xf32>, vector<1x16x4xf32> -> vector<8x16x4xf32>
    "tpu.trace_start"() <{level = 10 : i32, message = "hqd,hkd->hqk"}> : () -> ()
    %cst_99 = arith.constant dense<0.000000e+00> : vector<8x16x16xf32>
    %459 = tpu.matmul %424, %441, %cst_99 {dimension_numbers = #tpu.dot_dimension_numbers<[2], [2], [1], [1], [0, 0, 0, 1, 1, 1], [0], [0]>} : vector<8x16x4xf32>, vector<8x16x4xf32>, vector<8x16x16xf32> -> vector<8x16x16xf32>
    "tpu.trace_stop"() : () -> ()
    %cst_100 = arith.constant 5.000000e-01 : f32
    %460 = vector.broadcast %cst_100 : f32 to vector<8x16x16xf32>
    %461 = arith.mulf %459, %460 : vector<8x16x16xf32>
    %c0_101 = arith.constant 0 : index
    %c0_102 = arith.constant 0 : index
    %462 = vector.load %arg1[%c0_101, %c0_102] : memref<16x16xf32, #tpu.memory_space<vmem>>, vector<16x16xf32>
    %463 = vector.shape_cast %462 : vector<16x16xf32> to vector<1x16x16xf32>
    %464 = vector.broadcast %463 : vector<1x16x16xf32> to vector<8x16x16xf32>
    %465 = arith.addf %461, %464 : vector<8x16x16xf32>
    %cst_103 = arith.constant dense<0xFF800000> : vector<8x16xf32>
    %466 = vector.multi_reduction <maximumf>, %465, %cst_103 [2] : vector<8x16x16xf32> to vector<8x16xf32>
    %467 = vector.shape_cast %466 : vector<8x16xf32> to vector<8x16x1xf32>
    %468 = vector.broadcast %467 : vector<8x16x1xf32> to vector<8x16x16xf32>
    %469 = arith.subf %465, %468 : vector<8x16x16xf32>
    %470 = math.exp %469 : vector<8x16x16xf32>
    %cst_104 = arith.constant dense<0.000000e+00> : vector<8x16xf32>
    %471 = vector.multi_reduction <add>, %470, %cst_104 [2] : vector<8x16x16xf32> to vector<8x16xf32>
    %472 = vector.shape_cast %471 : vector<8x16xf32> to vector<8x16x1xf32>
    %473 = vector.broadcast %472 : vector<8x16x1xf32> to vector<8x16x16xf32>
    %474 = arith.divf %470, %473 : vector<8x16x16xf32>
    "tpu.trace_start"() <{level = 10 : i32, message = "hqk,hkd->hqd"}> : () -> ()
    %cst_105 = arith.constant dense<0.000000e+00> : vector<8x16x4xf32>
    %475 = tpu.matmul %474, %458, %cst_105 {dimension_numbers = #tpu.dot_dimension_numbers<[2], [1], [1], [2], [0, 0, 0, 1, 1, 2], [0], [0]>} : vector<8x16x16xf32>, vector<8x16x4xf32>, vector<8x16x4xf32> -> vector<8x16x4xf32>
    "tpu.trace_stop"() : () -> ()
    %476 = vector.extract_strided_slice %475 {offsets = [0, 0, 0], sizes = [1, 16, 4], strides = [1, 1, 1]} : vector<8x16x4xf32> to vector<1x16x4xf32>
    %477 = vector.shape_cast %476 : vector<1x16x4xf32> to vector<16x4xf32>
    %478 = vector.extract_strided_slice %475 {offsets = [1, 0, 0], sizes = [1, 16, 4], strides = [1, 1, 1]} : vector<8x16x4xf32> to vector<1x16x4xf32>
    %479 = vector.shape_cast %478 : vector<1x16x4xf32> to vector<16x4xf32>
    %480 = vector.extract_strided_slice %475 {offsets = [2, 0, 0], sizes = [1, 16, 4], strides = [1, 1, 1]} : vector<8x16x4xf32> to vector<1x16x4xf32>
    %481 = vector.shape_cast %480 : vector<1x16x4xf32> to vector<16x4xf32>
    %482 = vector.extract_strided_slice %475 {offsets = [3, 0, 0], sizes = [1, 16, 4], strides = [1, 1, 1]} : vector<8x16x4xf32> to vector<1x16x4xf32>
    %483 = vector.shape_cast %482 : vector<1x16x4xf32> to vector<16x4xf32>
    %484 = vector.extract_strided_slice %475 {offsets = [4, 0, 0], sizes = [1, 16, 4], strides = [1, 1, 1]} : vector<8x16x4xf32> to vector<1x16x4xf32>
    %485 = vector.shape_cast %484 : vector<1x16x4xf32> to vector<16x4xf32>
    %486 = vector.extract_strided_slice %475 {offsets = [5, 0, 0], sizes = [1, 16, 4], strides = [1, 1, 1]} : vector<8x16x4xf32> to vector<1x16x4xf32>
    %487 = vector.shape_cast %486 : vector<1x16x4xf32> to vector<16x4xf32>
    %488 = vector.extract_strided_slice %475 {offsets = [6, 0, 0], sizes = [1, 16, 4], strides = [1, 1, 1]} : vector<8x16x4xf32> to vector<1x16x4xf32>
    %489 = vector.shape_cast %488 : vector<1x16x4xf32> to vector<16x4xf32>
    %490 = vector.extract_strided_slice %475 {offsets = [7, 0, 0], sizes = [1, 16, 4], strides = [1, 1, 1]} : vector<8x16x4xf32> to vector<1x16x4xf32>
    %491 = vector.shape_cast %490 : vector<1x16x4xf32> to vector<16x4xf32>
    %492 = tpu.concatenate %477, %479, %481, %483, %485, %487, %489, %491 in 1 : vector<16x4xf32>, vector<16x4xf32>, vector<16x4xf32>, vector<16x4xf32>, vector<16x4xf32>, vector<16x4xf32>, vector<16x4xf32>, vector<16x4xf32> -> vector<16x32xf32>
    %c0_106 = arith.constant 0 : index
    %c0_107 = arith.constant 0 : index
    %493 = vector.load %arg9[%c0_106, %c0_107] : memref<32x32xf32, #tpu.memory_space<vmem>>, vector<32x32xf32>
    %cst_108 = arith.constant dense<0.000000e+00> : vector<16x32xf32>
    %494 = tpu.matmul %492, %493, %cst_108 {dimension_numbers = #tpu.dot_dimension_numbers<[1], [0], [0], [1], [0, 0, 1, 1], [], []>} : vector<16x32xf32>, vector<32x32xf32>, vector<16x32xf32> -> vector<16x32xf32>
    %c0_109 = arith.constant 0 : index
    %c0_110 = arith.constant 0 : index
    %495 = vector.load %arg10[%c0_109, %c0_110] : memref<1x32xf32, #tpu.memory_space<vmem>>, vector<1x32xf32>
    %496 = vector.broadcast %495 : vector<1x32xf32> to vector<16x32xf32>
    %497 = arith.addf %494, %496 : vector<16x32xf32>
    %cst_111 = arith.constant dense<0.000000e+00> : vector<16xf32>
    %498 = vector.multi_reduction <add>, %497, %cst_111 [1] : vector<16x32xf32> to vector<16xf32>
    %499 = vector.shape_cast %498 : vector<16xf32> to vector<16x1xf32>
    %cst_112 = arith.constant 3.200000e+01 : f32
    %500 = vector.broadcast %cst_112 : f32 to vector<16x1xf32>
    %501 = arith.divf %499, %500 : vector<16x1xf32>
    %502 = vector.broadcast %501 : vector<16x1xf32> to vector<16x32xf32>
    %503 = arith.subf %497, %502 : vector<16x32xf32>
    %504 = arith.mulf %503, %503 : vector<16x32xf32>
    %cst_113 = arith.constant dense<0.000000e+00> : vector<16xf32>
    %505 = vector.multi_reduction <add>, %504, %cst_113 [1] : vector<16x32xf32> to vector<16xf32>
    %506 = vector.shape_cast %505 : vector<16xf32> to vector<16x1xf32>
    %cst_114 = arith.constant 3.200000e+01 : f32
    %507 = vector.broadcast %cst_114 : f32 to vector<16x1xf32>
    %508 = arith.divf %506, %507 : vector<16x1xf32>
    %509 = vector.broadcast %501 : vector<16x1xf32> to vector<16x32xf32>
    %510 = arith.subf %497, %509 : vector<16x32xf32>
    %cst_115 = arith.constant 9.99999974E-6 : f32
    %511 = vector.broadcast %cst_115 : f32 to vector<16x1xf32>
    %512 = arith.addf %508, %511 : vector<16x1xf32>
    %513 = math.rsqrt %512 : vector<16x1xf32>
    %514 = vector.broadcast %513 : vector<16x1xf32> to vector<16x32xf32>
    %515 = arith.mulf %510, %514 : vector<16x32xf32>
    %c0_116 = arith.constant 0 : index
    %c0_117 = arith.constant 0 : index
    %516 = vector.load %arg11[%c0_116, %c0_117] : memref<1x32xf32, #tpu.memory_space<vmem>>, vector<1x32xf32>
    %517 = vector.broadcast %516 : vector<1x32xf32> to vector<16x32xf32>
    %518 = arith.mulf %515, %517 : vector<16x32xf32>
    %c0_118 = arith.constant 0 : index
    %c0_119 = arith.constant 0 : index
    %519 = vector.load %arg12[%c0_118, %c0_119] : memref<1x32xf32, #tpu.memory_space<vmem>>, vector<1x32xf32>
    %520 = vector.broadcast %519 : vector<1x32xf32> to vector<16x32xf32>
    %521 = arith.addf %518, %520 : vector<16x32xf32>
    %522 = arith.addf %0, %521 : vector<16x32xf32>
    %c0_120 = arith.constant 0 : index
    %c0_121 = arith.constant 0 : index
    %523 = vector.load %arg13[%c0_120, %c0_121] : memref<16x32xf32, #tpu.memory_space<vmem>>, vector<16x32xf32>
    tpu.vector_store %arg13[%c0_120, %c0_121], %522 {strides = array<i32>} : memref<16x32xf32, #tpu.memory_space<vmem>>, vector<16x32xf32>,
    return
  }
}

</mosaic_0001>

<bundles_post_ra>
// kernel: tpu_custom_call.1
= control target key start
LH: loop header
LB: loop body
LE: loop exit
PB: predicated region body
PF: predicated region fallthrough
CT: control target
= control target key end

     0   :  { %18 = vsyncpa [#allocation3], 0  ;;  %s5332_s0 = inlined_call_operand.hbm [shape: f32[16,32], index: 0, kind: input, shape index: {}]   ;;  %s5333_s1 = inlined_call_operand.hbm [shape: f32[16,16], index: 1, kind: input, shape index: {}]   ;;  %s5334_s2 = inlined_call_operand.hbm [shape: f32[32,128], index: 2, kind: input, shape index: {}]   ;;  %s5335_s3 = inlined_call_operand.hbm [shape: f32[32,128], index: 3, kind: input, shape index: {}]   ;;  %s5336_s4 = inlined_call_operand.vmem [shape: f32[1,128], index: 4, kind: input, shape index: {}]   ;;  %s5337_s5 = inlined_call_operand.hbm [shape: f32[32,32], index: 5, kind: input, shape index: {}]   ;;  %s5338_s6 = inlined_call_operand.vmem [shape: f32[1,32], index: 6, kind: input, shape index: {}]   ;;  %s5339_s7 = inlined_call_operand.hbm [shape: f32[32,64], index: 7, kind: input, shape index: {}]   ;;  %s5340_s8 = inlined_call_operand.hbm [shape: f32[1,64], index: 8, kind: input, shape index: {}]   ;;  %s5341_s9 = inlined_call_operand.vmem [shape: f32[32,32], index: 9, kind: input, shape index: {}]   ;;  %s5342_s10 = inlined_call_operand.vmem [shape: f32[1,32], index: 10, kind: input, shape index: {}]   ;;  %s5343_s11 = inlined_call_operand.vmem [shape: f32[1,32], index: 11, kind: input, shape index: {}]   ;;  %s5344_s12 = inlined_call_operand.vmem [shape: f32[1,32], index: 12, kind: input, shape index: {}]   ;;  %s5345_s13 = inlined_call_operand.hbm [shape: f32[16,32], index: 13, kind: output, shape index: {}]  }
   0x1   :  { %19 = vsyncpa [#allocation6], 0 }
   0x2   :  { %20 = vsyncpa [#allocation9], 0 }
   0x3   :  { %21 = vsyncpa [#allocation12], 0 }
   0x4   :  { %22 = vsyncpa [#allocation4], 0  ;;  %s4481_s25 = smov [#allocation5]   ;;  %s4482_s27 = smov [#allocation8]  }
   0x5   :  { %s40_s26 = sshll.u32 %s4481_s25, 4  ;;  %s64_s28 = sshll.u32 %s4482_s27, 4  ;;  %s41_s26 = int_to_ptr.vmem [resolvable:$true] %s40_s26  ;;  %s4582_s28 = int_to_ptr.vmem [resolvable:$true] %s64_s28 }
   0x6   :  { %s4295_s14 = scalar_lea.hbm %s5333_s1, 256 }
   0x7   :  { %p4296_p0 = scmp.ne.s32.totalorder %s5333_s1, %s4295_s14  ;;  %p4299_p1 = scmp.lt.u32.totalorder %s4295_s14, %s5333_s1 }
   0x9   :  { %p4301_p2 = pnand %p4299_p1, %p4296_p0 }
   0xb   :  { %4304 = shalt.err (!%p4301_p2)
}
   0xc   :  { %s4305_s19 = scalar_lea.vmem %s41_s26, 256  ;;  %p4310_p4 = scmp.lt.s32.totalorder %s41_s26, %s41_s26 }
   0xd   :  { %p4306_p3 = scmp.ne.s32.totalorder %s41_s26, %s4305_s19  ;;  %p4311_p5 = scmp.lt.s32.totalorder %s4305_s19, %s4305_s19 }
   0xf   :  { %p4312_p6 = por %p4311_p5, %p4310_p4 }
  0x11   :  { %p4313_p7 = pnand %p4312_p6, %p4306_p3 }
  0x13   :  { %4316 = shalt.err (!%p4313_p7)
}
  0x14   :  { %s4483_s20 = smov 128   ;;  %s4484_s21 = smov 8  }
  0x15   :  { %46 = dma.hbm_to_vmem [thread:$0]  %s5333_s1, 256, %s41_s26, [#allocation6], %s4483_s20, %s4483_s20, %s4484_s21  }
  0x16   :  { %s4317_s27 = scalar_lea.hbm %s5335_s3, 512 }
  0x17   :  { %p4318_p8 = scmp.ne.s32.totalorder %s5335_s3, %s4317_s27  ;;  %p4321_p9 = scmp.lt.u32.totalorder %s4317_s27, %s5335_s3 }
  0x19   :  { %p4323_p10 = pnand %p4321_p9, %p4318_p8 }
  0x1b   :  { %4326 = shalt.err (!%p4323_p10)
}
  0x1c   :  { %s4327_s16 = scalar_lea.vmem %s4582_s28, 512  ;;  %p4332_p12 = scmp.lt.s32.totalorder %s4582_s28, %s4582_s28 }
  0x1d   :  { %p4328_p11 = scmp.ne.s32.totalorder %s4582_s28, %s4327_s16  ;;  %p4333_p13 = scmp.lt.s32.totalorder %s4327_s16, %s4327_s16 }
  0x1f   :  { %p4334_p0 = por %p4333_p13, %p4332_p12 }
  0x21   :  { %p4335_p1 = pnand %p4334_p0, %p4328_p11 }
  0x23   :  { %4338 = shalt.err (!%p4335_p1)
}
  0x24   :  { %70 = dma.hbm_to_vmem [thread:$0]  %s5335_s3, 512, %s4582_s28, [#allocation9], %s4483_s20, %s4483_s20, %s4484_s21  }
  0x25   :  { %s4485_s17 = smov [#allocation11]   ;;  %s4486_s19 = smov [#allocation2]  }
  0x26   :  { %s92_s18 = sshll.u32 %s4485_s17, 4  ;;  %s28_s22 = sshll.u32 %s4486_s19, 4  ;;  %s93_s18 = int_to_ptr.vmem [resolvable:$true] %s92_s18  ;;  %s4619_s22 = int_to_ptr.vmem [resolvable:$true] %s28_s22 }
  0x27   :  { %s4339_s25 = scalar_lea.hbm %s5339_s7, 512 }
  0x28   :  { %p4340_p2 = scmp.ne.s32.totalorder %s5339_s7, %s4339_s25  ;;  %p4343_p3 = scmp.lt.u32.totalorder %s4339_s25, %s5339_s7 }
  0x2a   :  { %p4345_p4 = pnand %p4343_p3, %p4340_p2 }
  0x2c   :  { %4348 = shalt.err (!%p4345_p4)
}
  0x2d   :  { %s4349_s3 = scalar_lea.vmem %s93_s18, 512  ;;  %p4354_p6 = scmp.lt.s32.totalorder %s93_s18, %s93_s18 }
  0x2e   :  { %p4350_p5 = scmp.ne.s32.totalorder %s93_s18, %s4349_s3  ;;  %p4355_p7 = scmp.lt.s32.totalorder %s4349_s3, %s4349_s3 }
  0x30   :  { %p4356_p8 = por %p4355_p7, %p4354_p6 }
  0x32   :  { %p4357_p9 = pnand %p4356_p8, %p4350_p5 }
  0x34   :  { %4360 = shalt.err (!%p4357_p9)
}
  0x35   :  { %98 = dma.hbm_to_vmem [thread:$0]  %s5339_s7, 512, %s93_s18, [#allocation12], %s4483_s20, %s4483_s20, %s4484_s21  }
  0x36   :  { %s4361_s26 = scalar_lea.hbm %s5332_s0, 256 }
  0x37   :  { %p4362_p10 = scmp.ne.s32.totalorder %s5332_s0, %s4361_s26  ;;  %p4365_p11 = scmp.lt.u32.totalorder %s4361_s26, %s5332_s0 }
  0x39   :  { %p4367_p12 = pnand %p4365_p11, %p4362_p10 }
  0x3b   :  { %4370 = shalt.err (!%p4367_p12)
}
  0x3c   :  { %s4371_s25 = scalar_lea.vmem %s4619_s22, 256  ;;  %p4376_p0 = scmp.lt.s32.totalorder %s4619_s22, %s4619_s22 }
  0x3d   :  { %p4372_p13 = scmp.ne.s32.totalorder %s4619_s22, %s4371_s25  ;;  %p4377_p1 = scmp.lt.s32.totalorder %s4371_s25, %s4371_s25 }
  0x3f   :  { %p4378_p2 = por %p4377_p1, %p4376_p0 }
  0x41   :  { %p4379_p3 = pnand %p4378_p2, %p4372_p13 }
  0x43   :  { %4382 = shalt.err (!%p4379_p3)
}
  0x44   :  { %34 = dma.hbm_to_vmem [thread:$0]  %s5332_s0, 256, %s4619_s22, [#allocation3], %s4483_s20, %s4483_s20, %s4484_s21  }
  0x45   :  { %s4487_s27 = smov [#allocation7]   ;;  %s4488_s30 = smov [#allocation10]  }
  0x46   :  { %s52_s29 = sshll.u32 %s4487_s27, 4  ;;  %s78_s14 = sshll.u32 %s4488_s30, 4  ;;  %s53_s29 = int_to_ptr.vmem [resolvable:$true] %s52_s29  ;;  %s4656_s14 = int_to_ptr.vmem [resolvable:$true] %s78_s14 }
  0x47   :  { %s4383_s15 = scalar_lea.hbm %s5334_s2, 512 }
  0x48   :  { %p4384_p4 = scmp.ne.s32.totalorder %s5334_s2, %s4383_s15  ;;  %p4387_p5 = scmp.lt.u32.totalorder %s4383_s15, %s5334_s2 }
  0x4a   :  { %p4389_p6 = pnand %p4387_p5, %p4384_p4 }
  0x4c   :  { %4392 = shalt.err (!%p4389_p6)
}
  0x4d   :  { %s4393_s0 = scalar_lea.vmem %s53_s29, 512  ;;  %p4398_p8 = scmp.lt.s32.totalorder %s53_s29, %s53_s29 }
  0x4e   :  { %p4394_p7 = scmp.ne.s32.totalorder %s53_s29, %s4393_s0  ;;  %p4399_p9 = scmp.lt.s32.totalorder %s4393_s0, %s4393_s0 }
  0x50   :  { %p4400_p10 = por %p4399_p9, %p4398_p8 }
  0x52   :  { %p4401_p11 = pnand %p4400_p10, %p4394_p7 }
  0x54   :  { %4404 = shalt.err (!%p4401_p11)
}
  0x55   :  { %58 = dma.hbm_to_vmem [thread:$0]  %s5334_s2, 512, %s53_s29, [#allocation6], %s4483_s20, %s4483_s20, %s4484_s21  }
  0x56   :  { %s4405_s25 = scalar_lea.hbm %s5337_s5, 512 }
  0x57   :  { %p4406_p12 = scmp.ne.s32.totalorder %s5337_s5, %s4405_s25  ;;  %p4409_p13 = scmp.lt.u32.totalorder %s4405_s25, %s5337_s5 }
  0x59   :  { %p4411_p0 = pnand %p4409_p13, %p4406_p12 }
  0x5b   :  { %4414 = shalt.err (!%p4411_p0)
}
  0x5c   :  { %s4415_s3 = scalar_lea.vmem %s4656_s14, 512  ;;  %p4420_p2 = scmp.lt.s32.totalorder %s4656_s14, %s4656_s14 }
  0x5d   :  { %p4416_p1 = scmp.ne.s32.totalorder %s4656_s14, %s4415_s3  ;;  %p4421_p3 = scmp.lt.s32.totalorder %s4415_s3, %s4415_s3 }
  0x5f   :  { %p4422_p4 = por %p4421_p3, %p4420_p2 }
  0x61   :  { %p4423_p5 = pnand %p4422_p4, %p4416_p1 }
  0x63   :  { %4426 = shalt.err (!%p4423_p5)
}
  0x64   :  { %84 = dma.hbm_to_vmem [thread:$0]  %s5337_s5, 512, %s4656_s14, [#allocation9], %s4483_s20, %s4483_s20, %s4484_s21  }
  0x65   :  { %s4489_s28 = smov [#allocation13]   ;;  %s4427_s26 = scalar_lea.hbm %s5340_s8, 16 }
  0x66   :  { %s105_s15 = sshll.u32 %s4489_s28, 4  ;;  %p4428_p6 = scmp.ne.s32.totalorder %s5340_s8, %s4427_s26  ;;  %s106_s15 = int_to_ptr.vmem [resolvable:$true] %s105_s15 }
  0x67   :  { %p4431_p7 = scmp.lt.u32.totalorder %s4427_s26, %s5340_s8 }
  0x69   :  { %p4433_p8 = pnand %p4431_p7, %p4428_p6 }
  0x6b   :  { %4436 = shalt.err (!%p4433_p8)
}
  0x6c   :  { %s4437_s23 = scalar_lea.vmem %s106_s15, 16  ;;  %s4441_s5 = scalar_lea.vmem %s106_s15, 32 }
  0x6d   :  { %p4438_p9 = scmp.ne.s32.totalorder %s106_s15, %s4437_s23  ;;  %p4442_p10 = scmp.lt.s32.totalorder %s106_s15, %s106_s15 }
  0x6e   :  { %p4443_p11 = scmp.lt.s32.totalorder %s4441_s5, %s4437_s23 }
  0x70   :  { %p4444_p12 = por %p4443_p11, %p4442_p10 }
  0x72   :  { %p4445_p13 = pnand %p4444_p12, %p4438_p9 }
  0x74   :  { %4448 = shalt.err (!%p4445_p13)
}
  0x75   :  { %108 = dma.hbm_to_vmem [thread:$0]  %s5340_s8, 16, %s106_s15, [#allocation12]  }
  0x76   :  { %4471 = dma.done.wait [#allocation3], 256  }
  0x77   :  { %4472 = vsyncadd [#allocation3], 4294967040 }
  0x78   :  { %4473 = dma.done.wait [#allocation6], 768  }
  0x79   :  { %4474 = vsyncadd [#allocation6], 4294966528 }
  0x7a   :  { %4475 = dma.done.wait [#allocation9], 1024  }
  0x7b   :  { %4476 = vsyncadd [#allocation9], 4294966272 }
  0x7c   :  { %4477 = dma.done.wait [#allocation12], 528  }
  0x7d   :  { %4478 = vsyncadd [#allocation12], 4294966768  ;;  %v4490_v0 = vmov 0.0|0.0   ;;  %vm4491_vm0 = vmmov 0   ;;  %v4492_v1 = vmov 0.0   ;;  %v140_v2 = vld [vmem:[#allocation7] sm:$0xff] }
  0x7e   :  { %3839 = vmatprep.subr.bf16.mxu1 %v4490_v0  ;;  %3606 = vmatprep.mubr.msk.f32.mxu1 %vm4491_vm0, %v4492_v1  ;;  %v141_v3 = vld [vmem:[#allocation7 + $0x8] sm:$0xff]  ;;  %v233_v4 = vld [vmem:[#allocation8] sm:$0xff]  ;;  %vm151_vm1 = vcmask 261120   ;;  %v142_v7 = vld [vmem:[#allocation7 + $0x10] sm:$0xff]  ;;  %s4493_s7 = smov 64   ;;  %s4494_s18 = smov 80  }
  0x7f   :  { %v3831_v5 = vpack.c.bf16 %v141_v3, %v140_v2  ;;  %v234_v6 = vld [vmem:[#allocation8 + $0x8] sm:$0xff]  ;;  %v143_v8 = vld [vmem:[#allocation7 + $0x18] sm:$0xff]  ;;  %v235_v11 = vld [vmem:[#allocation8 + $0x10] sm:$0xff]  ;;  %s4496_s27 = smov 96   ;;  %s4497_s30 = smov 32   ;;  %vm320_vm2 = vcmask 130048  }
  0x80   :  { %v4708_v9 = vpack.c.bf16 %v234_v6, %v233_v4  ;;  %v3835_v10 = vpack.c.bf16 %v143_v8, %v142_v7  ;;  %v236_v12 = vld [vmem:[#allocation8 + $0x18] sm:$0xff]  ;;  %v4710_v13 = vld [vmem:[#allocation2] sm:$0xff]  ;;  %v4719_v15 = vld [vmem:[#allocation2 + $0x8] sm:$0xff]  ;;  %s4498_s3 = smov 48   ;;  %vm1312_vm3 = vcmask 1041408   ;;  %vm1314_vm4 = vcmask 1043456  }
  0x81   :  { %3832 = vmatprep.subr.bf16.mxu0 %v3831_v5  ;;  %3595 = vmatprep.mubr.msk.f32.mxu0 %vm151_vm1, %v4710_v13  ;;  %v4715_v14 = vpack.c.bf16 %v236_v12, %v235_v11  ;;  %v3390_v16 = vld [vmem:[%s5336_s4] ss:$0 sm:$0xff]  ;;  %s4495_s4 = smov 112   ;;  %vm1316_vm5 = vcmask 1045504   ;;  %vm1583_vm6 = vcmask 31744   ;;  %s4499_s2 = smov 124  }
  0x82   :  { %3841 = vmatpush3.bf16.msra.mxu1 %v4708_v9  ;;  %3834 = vmatpush3.bf16.msra.mxu0 %v3831_v5  ;;  %vm4962_vm7 = vmpackc.low %vm1583_vm6, %vm1583_vm6  ;;  %s4500_s29 = smov 120   ;;  %s4501_s28 = smov 116   ;;  %vm3212_vm8 = vcmask 64512   ;;  %vm3215_vm9 = vcmask 97280   ;;  %vm3220_vm10 = vcmask 162816   ;;  %vm3223_vm11 = vcmask 195584  }
  0x83   :  { %3842 = vmatprep.subr.bf16.mxu1 %v4490_v0  ;;  %3836 = vmatprep.subr.bf16.mxu0 %v3835_v10  ;;  %s4502_s15 = smov 108   ;;  %s4503_s16 = smov 104   ;;  %vm3226_vm12 = vcmask 228352  }
  0x84   :  { %s4504_s1 = smov 100   ;;  %s4506_s5 = smov 16  }
  0x86   :  { %3844 = vmatpush3.bf16.msra.mxu1 %v4715_v14  ;;  %3838 = vmatpush3.bf16.msra.mxu0 %v3835_v10 }
  0x87   :  { %3845 = vmatprep.subr.bf16.mxu0 %v4490_v0  ;;  %3851 = vmatprep.subr.bf16.mxu1 %v4490_v0 }
  0x89   :  { %3607 = vmatmul.mubr.f32.vlgmr.msra.gmra.mrb[0].mxu1 %v4492_v1  ;;  %3596 = vmatmul.mubr.msk.f32.vlgmr.msra.gmra.mrb[0].mxu0 %vm151_vm1, %v4719_v15 }
  0x8a   :  { %3847 = vmatpush3.bf16.msra.mxu0 %v4708_v9  ;;  %3617 = vmatprep.mubr.msk.f32.mxu0 %vm4491_vm0, %v4492_v1 }
  0x8b   :  { %3848 = vmatprep.subr.bf16.mxu0 %v4490_v0  ;;  %3853 = vmatpush3.bf16.msra.mxu1 %v4708_v9 }
  0x8c   :  { %3854 = vmatprep.subr.bf16.mxu1 %v4490_v0  ;;  %3628 = vmatprep.mubr.msk.f32.mxu1 %vm4491_vm0, %v4492_v1 }
  0x8e   :  { %3850 = vmatpush3.bf16.msra.mxu0 %v4715_v14 }
  0x8f   :  { %3856 = vmatpush3.bf16.msra.mxu1 %v4715_v14  ;;  %3857 = vmatprep.subr.bf16.mxu0 %v4490_v0 }
  0x90   :  { %3863 = vmatprep.subr.bf16.mxu1 %v4490_v0 }
 0x15c   :  { %v306_v17 = vpop.f32.mrb[0].mxu1  ;;  %v3597_v18 = vpop.f32.mrb[0].mxu0 }
 0x15d   :  { %v312_v19 = vrot.slane %v306_v17, 2  ;;  %v4741_v20 = vadd.f32 %v3597_v18, %v3390_v16  ;;  %v3608_v21 = vpop.f32.mrb[1].mxu1  ;;  %v224_v22 = vpop.f32.mrb[1].mxu0 }
 0x15e   :  { %v4744_v24 = vadd.f32 %v3390_v16, %v224_v22 }
 0x15f   :  { %v314_v23 = vadd.f32 %v312_v19, %v4741_v20 }
 0x160   :  { %v310_v26 = vadd.f32 %v306_v17, %v4744_v24 }
 0x161   :  { %v316_v25 = vrot.slane %v314_v23, 6 }
 0x163   :  { %332 = vrot.lane.b32.xlu1 %v316_v25, %s4493_s7  ;;  %317 = vrot.lane.b32.xlu0 %v316_v25, %s4494_s18 }
 0x167   :  { %350 = vrot.lane.b32.xlu1 %v310_v26, %s4494_s18  ;;  %329 = vrot.lane.b32.xlu0 %v310_v26, %s4495_s4 }
 0x16b   :  { %342 = vrot.lane.b32.xlu1 %v310_v26, %s4496_s27  ;;  %353 = vrot.lane.b32.xlu0 %v316_v25, %s4497_s30 }
 0x16f   :  { %345 = vrot.lane.b32.xlu0 %v316_v25, %s4498_s3 }
 0x1d5   :  { %v318_v27 = vpop.permute.xlu0 %317  ;;  %v333_v29 = vpop.permute.xlu1 %332 }
 0x1d6   :  { %v321_v28 = vsel %vm320_vm2, %v310_v26, %v318_v27 }
 0x1d7   :  { %v322_v30 = vsub.f32 0.0, %v321_v28 }
 0x1d9   :  { %v323_v31 = vmul.f32 1.442695, %v322_v30  ;;  %v330_v32 = vpop.permute.xlu0 %329  ;;  %v351_v35 = vpop.permute.xlu1 %350 }
 0x1da   :  { %v335_v33 = vsel %vm320_vm2, %v330_v32, %v333_v29 }
 0x1db   :  { %4097 = vpow2.f32 %v323_v31  ;;  %v336_v34 = vsub.f32 0.0, %v335_v33 }
 0x1dd   :  { %v337_v36 = vmul.f32 1.442695, %v336_v34  ;;  %v354_v37 = vpop.permute.xlu0 %353  ;;  %v343_v44 = vpop.permute.xlu1 %342 }
 0x1de   :  { %v356_v38 = vsel %vm320_vm2, %v351_v35, %v354_v37 }
 0x1df   :  { %4099 = vpow2.f32 %v337_v36  ;;  %v357_v39 = vsub.f32 0.0, %v356_v38 }
 0x1e1   :  { %v358_v41 = vmul.f32 1.442695, %v357_v39  ;;  %v346_v42 = vpop.permute.xlu0 %345 }
 0x1e2   :  { %v348_v45 = vsel %vm320_vm2, %v343_v44, %v346_v42 }
 0x1e3   :  { %4101 = vpow2.f32 %v358_v41 }
 0x1e5   :  { %v4098_v40 = vpop.eup %4097 }
 0x1e6   :  { %v325_v43 = vadd.f32 1.0, %v4098_v40 }
 0x1e8   :  { %4103 = vrcp.f32 %v325_v43 }
 0x1e9   :  { %v4100_v46 = vpop.eup %4099  ;;  %4105 = vtanh.f32 %v348_v45 }
 0x1ea   :  { %v339_v47 = vadd.f32 1.0, %v4100_v46 }
 0x1ec   :  { %4107 = vrcp.f32 %v339_v47 }
 0x1ed   :  { %v4102_v48 = vpop.eup %4101 }
 0x1ee   :  { %v360_v52 = vadd.f32 1.0, %v4102_v48 }
 0x1f0   :  { %4109 = vrcp.f32 %v360_v52 }
 0x1f2   :  { %v4104_v49 = vpop.eup %4103 }
 0x1f3   :  { %v4106_v50 = vpop.eup %4105 }
 0x1f4   :  { %v364_v54 = vmul.f32 %v4106_v50, %v4104_v49 }
 0x1f6   :  { %v4108_v51 = vpop.eup %4107 }
 0x1f7   :  { %v363_v53 = vmul.f32 0.0, %v4108_v51 }
 0x1f9   :  { %v365_v55 = vadd.f32 %v364_v54, %v363_v53 }
 0x1fa   :  { %v4110_v56 = vpop.eup %4109 }
 0x1fb   :  { %4111 = vtanh.f32 %v365_v55  ;;  %v496_v34 = vrot.slane %v365_v55, 6 }
 0x205   :  { %v4112_v57 = vpop.eup %4111 }
 0x206   :  { %v4758_v58 = vmul.f32 %v4112_v57, %v4110_v56 }
 0x208   :  { %3618 = vmatmul.mubr.msk.f32.vlgmr.msra.gmra.mrb[2].mxu0 %vm151_vm1, %v4758_v58 }
 0x209   :  { %3859 = vmatpush3.bf16.msra.mxu0 %v4708_v9  ;;  %3639 = vmatprep.mubr.msk.f32.mxu0 %vm4491_vm0, %v4492_v1 }
 0x20a   :  { %3860 = vmatprep.subr.bf16.mxu0 %v4490_v0 }
 0x20d   :  { %3862 = vmatpush3.bf16.msra.mxu0 %v4715_v14 }
 0x20e   :  { %3869 = vmatprep.subr.bf16.mxu0 %v4490_v0 }
 0x2db   :  { %v437_v59 = vpop.f32.mrb[2].mxu0 }
 0x2dc   :  { %v442_v60 = vrot.slane %v437_v59, 6  ;;  %v445_v61 = vrot.slane %v437_v59, 4  ;;  %v3619_v62 = vpop.f32.mrb[3].mxu0 }
 0x2de   :  { %v444_v63 = vadd.f32 %v442_v60, %v4744_v24  ;;  %v447_v2 = vadd.f32 %v445_v61, %v4741_v20 }
 0x2e0   :  { %v449_v3 = vrot.slane %v447_v2, 2  ;;  %461 = vrot.lane.b32.xlu0 %v444_v63, %s4495_s4 }
 0x2e2   :  { %450 = vrot.lane.b32.xlu1 %v449_v3, %s4494_s18 }
 0x2e4   :  { %482 = vrot.lane.b32.xlu0 %v444_v63, %s4494_s18 }
 0x2e6   :  { %464 = vrot.lane.b32.xlu1 %v449_v3, %s4493_s7 }
 0x2e8   :  { %474 = vrot.lane.b32.xlu0 %v444_v63, %s4496_s27 }
 0x2ea   :  { %485 = vrot.lane.b32.xlu1 %v449_v3, %s4497_s30 }
 0x2ee   :  { %477 = vrot.lane.b32.xlu1 %v449_v3, %s4498_s3 }
 0x352   :  { %v462_v6 = vpop.permute.xlu0 %461 }
 0x354   :  { %v451_v4 = vpop.permute.xlu1 %450 }
 0x355   :  { %v453_v5 = vsel %vm320_vm2, %v444_v63, %v451_v4 }
 0x356   :  { %v454_v7 = vsub.f32 0.0, %v453_v5  ;;  %v483_v16 = vpop.permute.xlu0 %482 }
 0x358   :  { %v455_v8 = vmul.f32 1.442695, %v454_v7  ;;  %v465_v10 = vpop.permute.xlu1 %464 }
 0x359   :  { %v467_v11 = vsel %vm320_vm2, %v462_v6, %v465_v10 }
 0x35a   :  { %4113 = vpow2.f32 %v455_v8  ;;  %v468_v12 = vsub.f32 0.0, %v467_v11  ;;  %v475_v27 = vpop.permute.xlu0 %474 }
 0x35c   :  { %v469_v17 = vmul.f32 1.442695, %v468_v12  ;;  %v486_v18 = vpop.permute.xlu1 %485 }
 0x35d   :  { %v488_v19 = vsel %vm320_vm2, %v483_v16, %v486_v18 }
 0x35e   :  { %4115 = vpow2.f32 %v469_v17  ;;  %v489_v21 = vsub.f32 0.0, %v488_v19 }
 0x360   :  { %v490_v23 = vmul.f32 1.442695, %v489_v21  ;;  %v478_v25 = vpop.permute.xlu1 %477 }
 0x361   :  { %v480_v28 = vsel %vm320_vm2, %v475_v27, %v478_v25 }
 0x362   :  { %4117 = vpow2.f32 %v490_v23 }
 0x364   :  { %v4114_v22 = vpop.eup %4113 }
 0x365   :  { %v457_v26 = vadd.f32 1.0, %v4114_v22 }
 0x367   :  { %4119 = vrcp.f32 %v457_v26 }
 0x368   :  { %v4116_v29 = vpop.eup %4115  ;;  %4121 = vtanh.f32 %v480_v28 }
 0x369   :  { %v471_v30 = vadd.f32 1.0, %v4116_v29 }
 0x36b   :  { %4123 = vrcp.f32 %v471_v30 }
 0x36c   :  { %v4118_v31 = vpop.eup %4117 }
 0x36d   :  { %v492_v36 = vadd.f32 1.0, %v4118_v31 }
 0x36f   :  { %4125 = vrcp.f32 %v492_v36 }
 0x371   :  { %v4120_v32 = vpop.eup %4119 }
 0x372   :  { %v4122_v33 = vpop.eup %4121 }
 0x373   :  { %v499_v38 = vmul.f32 %v4122_v33, %v4120_v32 }
 0x375   :  { %v4124_v35 = vpop.eup %4123 }
 0x376   :  { %v498_v37 = vmul.f32 %v4124_v35, %v496_v34 }
 0x378   :  { %v500_v39 = vadd.f32 %v499_v38, %v498_v37 }
 0x379   :  { %v4126_v40 = vpop.eup %4125 }
 0x37a   :  { %4127 = vtanh.f32 %v500_v39  ;;  %v632_v18 = vrot.slane %v500_v39, 6 }
 0x384   :  { %v4128_v41 = vpop.eup %4127 }
 0x385   :  { %v4781_v42 = vmul.f32 %v4128_v41, %v4126_v40 }
 0x387   :  { %v504_v43 = vrot.slane %v4781_v42, 2  ;;  %v1313_v29 = vsel %vm1312_vm3, %v4758_v58, %v4781_v42 }
 0x389   :  { %3629 = vmatmul.mubr.msk.f32.vlgmr.msra.gmra.mrb[2].mxu1 %vm151_vm1, %v504_v43 }
 0x38a   :  { %3865 = vmatpush3.bf16.msra.mxu1 %v4708_v9  ;;  %3650 = vmatprep.mubr.msk.f32.mxu1 %vm4491_vm0, %v4492_v1 }
 0x38b   :  { %3866 = vmatprep.subr.bf16.mxu1 %v4490_v0 }
 0x38e   :  { %3868 = vmatpush3.bf16.msra.mxu1 %v4715_v14 }
 0x38f   :  { %3875 = vmatprep.subr.bf16.mxu1 %v4490_v0 }
 0x45c   :  { %v573_v44 = vpop.f32.mrb[2].mxu1 }
 0x45d   :  { %v578_v45 = vrot.slane %v573_v44, 4  ;;  %v581_v46 = vrot.slane %v573_v44, 6  ;;  %v3630_v47 = vpop.f32.mrb[3].mxu1 }
 0x45f   :  { %v580_v48 = vadd.f32 %v578_v45, %v4744_v24  ;;  %v583_v49 = vadd.f32 %v581_v46, %v4741_v20 }
 0x461   :  { %v585_v50 = vrot.slane %v583_v49, 6  ;;  %597 = vrot.lane.b32.xlu1 %v580_v48, %s4495_s4 }
 0x463   :  { %586 = vrot.lane.b32.xlu0 %v585_v50, %s4494_s18 }
 0x465   :  { %618 = vrot.lane.b32.xlu1 %v580_v48, %s4494_s18 }
 0x467   :  { %600 = vrot.lane.b32.xlu0 %v585_v50, %s4493_s7 }
 0x469   :  { %610 = vrot.lane.b32.xlu1 %v580_v48, %s4496_s27 }
 0x46b   :  { %621 = vrot.lane.b32.xlu0 %v585_v50, %s4497_s30 }
 0x46f   :  { %613 = vrot.lane.b32.xlu0 %v585_v50, %s4498_s3 }
 0x4d3   :  { %v598_v53 = vpop.permute.xlu1 %597 }
 0x4d5   :  { %v587_v51 = vpop.permute.xlu0 %586 }
 0x4d6   :  { %v589_v52 = vsel %vm320_vm2, %v580_v48, %v587_v51 }
 0x4d7   :  { %v590_v54 = vsub.f32 0.0, %v589_v52  ;;  %v619_v60 = vpop.permute.xlu1 %618 }
 0x4d9   :  { %v591_v55 = vmul.f32 1.442695, %v590_v54  ;;  %v601_v56 = vpop.permute.xlu0 %600 }
 0x4da   :  { %v603_v57 = vsel %vm320_vm2, %v598_v53, %v601_v56 }
 0x4db   :  { %4129 = vpow2.f32 %v591_v55  ;;  %v604_v59 = vsub.f32 0.0, %v603_v57  ;;  %v611_v7 = vpop.permute.xlu1 %610 }
 0x4dd   :  { %v605_v61 = vmul.f32 1.442695, %v604_v59  ;;  %v622_v62 = vpop.permute.xlu0 %621 }
 0x4de   :  { %v624_v63 = vsel %vm320_vm2, %v619_v60, %v622_v62 }
 0x4df   :  { %4131 = vpow2.f32 %v605_v61  ;;  %v625_v2 = vsub.f32 0.0, %v624_v63 }
 0x4e1   :  { %v626_v4 = vmul.f32 1.442695, %v625_v2  ;;  %v614_v5 = vpop.permute.xlu0 %613 }
 0x4e2   :  { %v616_v8 = vsel %vm320_vm2, %v611_v7, %v614_v5 }
 0x4e3   :  { %4133 = vpow2.f32 %v626_v4 }
 0x4e5   :  { %v4130_v3 = vpop.eup %4129 }
 0x4e6   :  { %v593_v6 = vadd.f32 1.0, %v4130_v3 }
 0x4e8   :  { %4135 = vrcp.f32 %v593_v6 }
 0x4e9   :  { %v4132_v10 = vpop.eup %4131  ;;  %4137 = vtanh.f32 %v616_v8 }
 0x4ea   :  { %v607_v11 = vadd.f32 1.0, %v4132_v10 }
 0x4ec   :  { %4139 = vrcp.f32 %v607_v11 }
 0x4ed   :  { %v4134_v12 = vpop.eup %4133 }
 0x4ee   :  { %v628_v21 = vadd.f32 1.0, %v4134_v12 }
 0x4f0   :  { %4141 = vrcp.f32 %v628_v21 }
 0x4f2   :  { %v4136_v16 = vpop.eup %4135 }
 0x4f3   :  { %v4138_v17 = vpop.eup %4137 }
 0x4f4   :  { %v635_v23 = vmul.f32 %v4138_v17, %v4136_v16 }
 0x4f6   :  { %v4140_v19 = vpop.eup %4139 }
 0x4f7   :  { %v634_v22 = vmul.f32 %v4140_v19, %v632_v18  ;;  %v1333_v18 = vrot.slane %v4781_v42, 6 }
 0x4f9   :  { %v4804_v25 = vadd.f32 %v635_v23, %v634_v22 }
 0x4fa   :  { %v4142_v26 = vpop.eup %4141 }
 0x4fb   :  { %4143 = vtanh.f32 %v4804_v25  ;;  %v766_v2 = vrot.slane %v4804_v25, 6 }
 0x505   :  { %v4144_v27 = vpop.eup %4143 }
 0x506   :  { %v4807_v28 = vmul.f32 %v4144_v27, %v4142_v26 }
 0x508   :  { %v640_v30 = vrot.slane %v4807_v28, 4  ;;  %v4815_v31 = vsel %vm1314_vm4, %v1313_v29, %v4807_v28  ;;  %v1331_v17 = vrot.slane %v4807_v28, 2 }
 0x50a   :  { %3640 = vmatmul.mubr.msk.f32.vlgmr.msra.gmra.mrb[4].mxu0 %vm151_vm1, %v640_v30 }
 0x50b   :  { %3871 = vmatpush3.bf16.msra.mxu0 %v4708_v9  ;;  %3661 = vmatprep.mubr.msk.f32.mxu0 %vm4491_vm0, %v4492_v1 }
 0x50c   :  { %3872 = vmatprep.subr.bf16.mxu0 %v4490_v0 }
 0x50f   :  { %3874 = vmatpush3.bf16.msra.mxu0 %v4715_v14 }
 0x510   :  { %3881 = vmatprep.subr.bf16.mxu0 %v4490_v0 }
 0x5dd   :  { %v709_v32 = vpop.f32.mrb[4].mxu0 }
 0x5de   :  { %v714_v33 = vrot.slane %v709_v32, 2  ;;  %v717_v34 = vadd.f32 %v709_v32, %v4741_v20  ;;  %v3641_v35 = vpop.f32.mrb[5].mxu0 }
 0x5e0   :  { %v716_v36 = vadd.f32 %v714_v33, %v4744_v24  ;;  %v719_v37 = vrot.slane %v717_v34, 2 }
 0x5e2   :  { %720 = vrot.lane.b32.xlu1 %v719_v37, %s4494_s18  ;;  %731 = vrot.lane.b32.xlu0 %v716_v36, %s4495_s4 }
 0x5e6   :  { %734 = vrot.lane.b32.xlu1 %v719_v37, %s4493_s7  ;;  %752 = vrot.lane.b32.xlu0 %v716_v36, %s4494_s18 }
 0x5ea   :  { %755 = vrot.lane.b32.xlu1 %v719_v37, %s4497_s30  ;;  %744 = vrot.lane.b32.xlu0 %v716_v36, %s4496_s27 }
 0x5ee   :  { %747 = vrot.lane.b32.xlu1 %v719_v37, %s4498_s3 }
 0x654   :  { %v721_v38 = vpop.permute.xlu1 %720  ;;  %v732_v41 = vpop.permute.xlu0 %731 }
 0x655   :  { %v723_v39 = vsel %vm320_vm2, %v716_v36, %v721_v38 }
 0x656   :  { %v724_v40 = vsub.f32 0.0, %v723_v39 }
 0x658   :  { %v725_v43 = vmul.f32 1.442695, %v724_v40  ;;  %v735_v44 = vpop.permute.xlu1 %734  ;;  %v753_v48 = vpop.permute.xlu0 %752 }
 0x659   :  { %v737_v45 = vsel %vm320_vm2, %v732_v41, %v735_v44 }
 0x65a   :  { %4145 = vpow2.f32 %v725_v43  ;;  %v738_v46 = vsub.f32 0.0, %v737_v45 }
 0x65c   :  { %v739_v47 = vmul.f32 1.442695, %v738_v46  ;;  %v756_v49 = vpop.permute.xlu1 %755  ;;  %v745_v56 = vpop.permute.xlu0 %744 }
 0x65d   :  { %v758_v50 = vsel %vm320_vm2, %v753_v48, %v756_v49 }
 0x65e   :  { %4147 = vpow2.f32 %v739_v47  ;;  %v759_v51 = vsub.f32 0.0, %v758_v50 }
 0x660   :  { %v760_v53 = vmul.f32 1.442695, %v759_v51  ;;  %v748_v54 = vpop.permute.xlu1 %747 }
 0x661   :  { %v750_v57 = vsel %vm320_vm2, %v745_v56, %v748_v54 }
 0x662   :  { %4149 = vpow2.f32 %v760_v53 }
 0x664   :  { %v4146_v52 = vpop.eup %4145 }
 0x665   :  { %v727_v55 = vadd.f32 1.0, %v4146_v52 }
 0x667   :  { %4151 = vrcp.f32 %v727_v55 }
 0x668   :  { %v4148_v59 = vpop.eup %4147  ;;  %4153 = vtanh.f32 %v750_v57 }
 0x669   :  { %v741_v60 = vadd.f32 1.0, %v4148_v59 }
 0x66b   :  { %4155 = vrcp.f32 %v741_v60 }
 0x66c   :  { %v4150_v61 = vpop.eup %4149 }
 0x66d   :  { %v762_v4 = vadd.f32 1.0, %v4150_v61 }
 0x66f   :  { %4157 = vrcp.f32 %v762_v4 }
 0x671   :  { %v4152_v62 = vpop.eup %4151 }
 0x672   :  { %v4154_v63 = vpop.eup %4153 }
 0x673   :  { %v769_v6 = vmul.f32 %v4154_v63, %v4152_v62 }
 0x675   :  { %v4156_v3 = vpop.eup %4155 }
 0x676   :  { %v768_v5 = vmul.f32 %v4156_v3, %v766_v2 }
 0x678   :  { %v4838_v7 = vadd.f32 %v769_v6, %v768_v5 }
 0x679   :  { %v4158_v8 = vpop.eup %4157 }
 0x67a   :  { %4159 = vtanh.f32 %v4838_v7  ;;  %v900_v53 = vrot.slane %v4838_v7, 6 }
 0x684   :  { %v4160_v10 = vpop.eup %4159 }
 0x685   :  { %v772_v11 = vmul.f32 %v4160_v10, %v4158_v8 }
 0x687   :  { %v774_v12 = vrot.slane %v772_v11, 6  ;;  %v4843_v16 = vsel %vm1316_vm5, %v4815_v31, %v772_v11 }
 0x689   :  { %3651 = vmatmul.mubr.msk.f32.vlgmr.msra.gmra.mrb[4].mxu1 %vm151_vm1, %v774_v12  ;;  %v1340_v19 = vsel %vm1312_vm3, %v774_v12, %v1331_v17 }
 0x68a   :  { %3877 = vmatpush3.bf16.msra.mxu1 %v4708_v9  ;;  %3672 = vmatprep.mubr.msk.f32.mxu1 %vm4491_vm0, %v4492_v1  ;;  %v4853_v21 = vsel %vm1314_vm4, %v1340_v19, %v1333_v18 }
 0x68b   :  { %3878 = vmatprep.subr.bf16.mxu1 %v4490_v0 }
 0x68e   :  { %3880 = vmatpush3.bf16.msra.mxu1 %v4715_v14 }
 0x75c   :  { %v843_v22 = vpop.f32.mrb[4].mxu1 }
 0x75d   :  { %v847_v23 = vadd.f32 %v843_v22, %v4741_v20  ;;  %v849_v42 = vrot.slane %v843_v22, 2  ;;  %v3652_v25 = vpop.f32.mrb[5].mxu1 }
 0x75f   :  { %v851_v26 = vadd.f32 %v849_v42, %v4744_v24  ;;  %865 = vrot.lane.b32.xlu1 %v847_v23, %s4495_s4 }
 0x761   :  { %v853_v27 = vrot.slane %v851_v26, 6 }
 0x763   :  { %854 = vrot.lane.b32.xlu0 %v853_v27, %s4494_s18  ;;  %886 = vrot.lane.b32.xlu1 %v847_v23, %s4494_s18 }
 0x767   :  { %868 = vrot.lane.b32.xlu0 %v853_v27, %s4493_s7  ;;  %878 = vrot.lane.b32.xlu1 %v847_v23, %s4496_s27 }
 0x76b   :  { %889 = vrot.lane.b32.xlu0 %v853_v27, %s4497_s30 }
 0x76f   :  { %881 = vrot.lane.b32.xlu0 %v853_v27, %s4498_s3 }
 0x7d1   :  { %v866_v30 = vpop.permute.xlu1 %865 }
 0x7d5   :  { %v855_v28 = vpop.permute.xlu0 %854  ;;  %v887_v36 = vpop.permute.xlu1 %886 }
 0x7d6   :  { %v857_v29 = vsel %vm320_vm2, %v847_v23, %v855_v28 }
 0x7d7   :  { %v858_v31 = vsub.f32 0.0, %v857_v29 }
 0x7d9   :  { %v859_v32 = vmul.f32 1.442695, %v858_v31  ;;  %v869_v33 = vpop.permute.xlu0 %868  ;;  %v879_v46 = vpop.permute.xlu1 %878 }
 0x7da   :  { %v871_v34 = vsel %vm320_vm2, %v866_v30, %v869_v33 }
 0x7db   :  { %4161 = vpow2.f32 %v859_v32  ;;  %v872_v35 = vsub.f32 0.0, %v871_v34 }
 0x7dd   :  { %v873_v37 = vmul.f32 1.442695, %v872_v35  ;;  %v890_v38 = vpop.permute.xlu0 %889 }
 0x7de   :  { %v892_v39 = vsel %vm320_vm2, %v887_v36, %v890_v38 }
 0x7df   :  { %4163 = vpow2.f32 %v873_v37  ;;  %v893_v40 = vsub.f32 0.0, %v892_v39 }
 0x7e1   :  { %v894_v43 = vmul.f32 1.442695, %v893_v40  ;;  %v882_v44 = vpop.permute.xlu0 %881 }
 0x7e2   :  { %v884_v47 = vsel %vm320_vm2, %v879_v46, %v882_v44 }
 0x7e3   :  { %4165 = vpow2.f32 %v894_v43 }
 0x7e5   :  { %v4162_v41 = vpop.eup %4161 }
 0x7e6   :  { %v861_v45 = vadd.f32 1.0, %v4162_v41 }
 0x7e8   :  { %4167 = vrcp.f32 %v861_v45 }
 0x7e9   :  { %v4164_v48 = vpop.eup %4163  ;;  %4169 = vtanh.f32 %v884_v47 }
 0x7ea   :  { %v875_v49 = vadd.f32 1.0, %v4164_v48 }
 0x7ec   :  { %4171 = vrcp.f32 %v875_v49 }
 0x7ed   :  { %v4166_v50 = vpop.eup %4165 }
 0x7ee   :  { %v896_v55 = vadd.f32 1.0, %v4166_v50 }
 0x7f0   :  { %4173 = vrcp.f32 %v896_v55 }
 0x7f2   :  { %v4168_v51 = vpop.eup %4167 }
 0x7f3   :  { %v4170_v52 = vpop.eup %4169 }
 0x7f4   :  { %v903_v57 = vmul.f32 %v4170_v52, %v4168_v51 }
 0x7f6   :  { %v4172_v54 = vpop.eup %4171 }
 0x7f7   :  { %v902_v56 = vmul.f32 %v4172_v54, %v900_v53 }
 0x7f9   :  { %v904_v59 = vadd.f32 %v903_v57, %v902_v56 }
 0x7fa   :  { %v4174_v60 = vpop.eup %4173 }
 0x7fb   :  { %4175 = vtanh.f32 %v904_v59  ;;  %v1035_v35 = vrot.slane %v904_v59, 6 }
 0x805   :  { %v4176_v61 = vpop.eup %4175 }
 0x806   :  { %v4871_v62 = vmul.f32 %v4176_v61, %v4174_v60 }
 0x808   :  { %3662 = vmatmul.mubr.msk.f32.vlgmr.msra.gmra.mrb[6].mxu0 %vm151_vm1, %v4871_v62 }
 0x809   :  { %3883 = vmatpush3.bf16.msra.mxu0 %v4708_v9  ;;  %3683 = vmatprep.mubr.msk.f32.mxu0 %vm4491_vm0, %v4492_v1 }
 0x80a   :  { %3884 = vmatprep.subr.bf16.mxu0 %v4490_v0 }
 0x80d   :  { %3886 = vmatpush3.bf16.msra.mxu0 %v4715_v14 }
 0x8db   :  { %v976_v63 = vpop.f32.mrb[6].mxu0 }
 0x8dc   :  { %v981_v2 = vrot.slane %v976_v63, 6  ;;  %v984_v3 = vrot.slane %v976_v63, 4  ;;  %v3663_v4 = vpop.f32.mrb[7].mxu0 }
 0x8de   :  { %v983_v5 = vadd.f32 %v981_v2, %v4741_v20  ;;  %v986_v6 = vadd.f32 %v984_v3, %v4744_v24 }
 0x8e0   :  { %v988_v7 = vrot.slane %v986_v6, 2  ;;  %1000 = vrot.lane.b32.xlu0 %v983_v5, %s4495_s4 }
 0x8e2   :  { %989 = vrot.lane.b32.xlu1 %v988_v7, %s4494_s18 }
 0x8e4   :  { %1021 = vrot.lane.b32.xlu0 %v983_v5, %s4494_s18 }
 0x8e6   :  { %1003 = vrot.lane.b32.xlu1 %v988_v7, %s4493_s7 }
 0x8e8   :  { %1013 = vrot.lane.b32.xlu0 %v983_v5, %s4496_s27 }
 0x8ea   :  { %1024 = vrot.lane.b32.xlu1 %v988_v7, %s4497_s30 }
 0x8ee   :  { %1016 = vrot.lane.b32.xlu1 %v988_v7, %s4498_s3 }
 0x952   :  { %v1001_v9 = vpop.permute.xlu0 %1000 }
 0x954   :  { %v990_v0 = vpop.permute.xlu1 %989 }
 0x955   :  { %v992_v1 = vsel %vm320_vm2, %v983_v5, %v990_v0 }
 0x956   :  { %v993_v14 = vsub.f32 0.0, %v992_v1  ;;  %v1022_v17 = vpop.permute.xlu0 %1021 }
 0x958   :  { %v994_v8 = vmul.f32 1.442695, %v993_v14  ;;  %v1004_v10 = vpop.permute.xlu1 %1003 }
 0x959   :  { %v1006_v11 = vsel %vm320_vm2, %v1001_v9, %v1004_v10 }
 0x95a   :  { %4177 = vpow2.f32 %v994_v8  ;;  %v1007_v12 = vsub.f32 0.0, %v1006_v11  ;;  %v1014_v28 = vpop.permute.xlu0 %1013 }
 0x95c   :  { %v1008_v18 = vmul.f32 1.442695, %v1007_v12  ;;  %v1025_v19 = vpop.permute.xlu1 %1024 }
 0x95d   :  { %v1027_v22 = vsel %vm320_vm2, %v1022_v17, %v1025_v19 }
 0x95e   :  { %4179 = vpow2.f32 %v1008_v18  ;;  %v1028_v23 = vsub.f32 0.0, %v1027_v22 }
 0x960   :  { %v1029_v25 = vmul.f32 1.442695, %v1028_v23  ;;  %v1017_v26 = vpop.permute.xlu1 %1016 }
 0x961   :  { %v1019_v29 = vsel %vm320_vm2, %v1014_v28, %v1017_v26 }
 0x962   :  { %4181 = vpow2.f32 %v1029_v25 }
 0x964   :  { %v4178_v42 = vpop.eup %4177 }
 0x965   :  { %v996_v27 = vadd.f32 1.0, %v4178_v42 }
 0x967   :  { %4183 = vrcp.f32 %v996_v27 }
 0x968   :  { %v4180_v30 = vpop.eup %4179  ;;  %4185 = vtanh.f32 %v1019_v29 }
 0x969   :  { %v1010_v31 = vadd.f32 1.0, %v4180_v30 }
 0x96b   :  { %4187 = vrcp.f32 %v1010_v31 }
 0x96c   :  { %v4182_v32 = vpop.eup %4181 }
 0x96d   :  { %v1031_v37 = vadd.f32 1.0, %v4182_v32 }
 0x96f   :  { %4189 = vrcp.f32 %v1031_v37 }
 0x971   :  { %v4184_v33 = vpop.eup %4183 }
 0x972   :  { %v4186_v34 = vpop.eup %4185 }
 0x973   :  { %v1038_v39 = vmul.f32 %v4186_v34, %v4184_v33 }
 0x975   :  { %v4188_v36 = vpop.eup %4187 }
 0x976   :  { %v1037_v38 = vmul.f32 %v4188_v36, %v1035_v35 }
 0x978   :  { %v1039_v40 = vadd.f32 %v1038_v39, %v1037_v38  ;;  %v1437_v38 = vld [vmem:[#allocation11] sm:$0xff]  ;;  %v1438_v39 = vld [vmem:[#allocation11 + $0x8] sm:$0xff] }
 0x979   :  { %v4190_v41 = vpop.eup %4189 }
 0x97a   :  { %4191 = vtanh.f32 %v1039_v40  ;;  %v1171_v18 = vrot.slane %v1039_v40, 6  ;;  %v3895_v40 = vpack.c.bf16 %v1438_v39, %v1437_v38 }
 0x97c   :  { %3896 = vmatprep.subr.bf16.mxu0 %v3895_v40 }
 0x984   :  { %v4192_v43 = vpop.eup %4191 }
 0x985   :  { %v4893_v44 = vmul.f32 %v4192_v43, %v4190_v41  ;;  %v1345_v41 = vld [vmem:[#allocation10] sm:$0xff]  ;;  %v1346_v43 = vld [vmem:[#allocation10 + $0x8] sm:$0xff] }
 0x987   :  { %v1043_v45 = vrot.slane %v4893_v44, 2  ;;  %v1318_v29 = vsel %vm1312_vm3, %v4871_v62, %v4893_v44 }
 0x989   :  { %3673 = vmatmul.mubr.msk.f32.vlgmr.msra.gmra.mrb[6].mxu1 %vm151_vm1, %v1043_v45  ;;  %v1347_v45 = vld [vmem:[#allocation10 + $0x10] sm:$0xff] }
 0xa5c   :  { %v1112_v46 = vpop.f32.mrb[6].mxu1 }
 0xa5d   :  { %v1117_v47 = vrot.slane %v1112_v46, 4  ;;  %v1120_v48 = vrot.slane %v1112_v46, 6  ;;  %v3674_v49 = vpop.f32.mrb[7].mxu1  ;;  %v3887_v46 = vpack.c.bf16 %v1346_v43, %v1345_v41 }
 0xa5f   :  { %v1119_v50 = vadd.f32 %v1117_v47, %v4741_v20  ;;  %v1122_v51 = vadd.f32 %v1120_v48, %v4744_v24  ;;  %v1348_v47 = vld [vmem:[#allocation10 + $0x18] sm:$0xff]  ;;  %3888 = vmatprep.subr.bf16.mxu1 %v3887_v46 }
 0xa60   :  { %v3891_v48 = vpack.c.bf16 %v1348_v47, %v1347_v45  ;;  %3890 = vmatpush3.bf16.msra.mxu1 %v3887_v46 }
 0xa61   :  { %v1124_v52 = vrot.slane %v1122_v51, 6  ;;  %1136 = vrot.lane.b32.xlu1 %v1119_v50, %s4495_s4 }
 0xa62   :  { %3892 = vmatprep.subr.bf16.mxu1 %v3891_v48 }
 0xa63   :  { %1125 = vrot.lane.b32.xlu0 %v1124_v52, %s4494_s18 }
 0xa64   :  { %3894 = vmatpush3.bf16.msra.mxu1 %v3891_v48 }
 0xa65   :  { %1157 = vrot.lane.b32.xlu1 %v1119_v50, %s4494_s18 }
 0xa67   :  { %1139 = vrot.lane.b32.xlu0 %v1124_v52, %s4493_s7 }
 0xa69   :  { %1149 = vrot.lane.b32.xlu1 %v1119_v50, %s4496_s27 }
 0xa6b   :  { %1160 = vrot.lane.b32.xlu0 %v1124_v52, %s4497_s30 }
 0xa6f   :  { %1152 = vrot.lane.b32.xlu0 %v1124_v52, %s4498_s3 }
 0xad3   :  { %v1137_v55 = vpop.permute.xlu1 %1136 }
 0xad5   :  { %v1126_v53 = vpop.permute.xlu0 %1125 }
 0xad6   :  { %v1128_v54 = vsel %vm320_vm2, %v1119_v50, %v1126_v53 }
 0xad7   :  { %v1129_v56 = vsub.f32 0.0, %v1128_v54  ;;  %v1158_v63 = vpop.permute.xlu1 %1157 }
 0xad9   :  { %v1130_v57 = vmul.f32 1.442695, %v1129_v56  ;;  %v1140_v59 = vpop.permute.xlu0 %1139 }
 0xada   :  { %v1142_v60 = vsel %vm320_vm2, %v1137_v55, %v1140_v59 }
 0xadb   :  { %4193 = vpow2.f32 %v1130_v57  ;;  %v1143_v61 = vsub.f32 0.0, %v1142_v60  ;;  %v1150_v9 = vpop.permute.xlu1 %1149 }
 0xadd   :  { %v1144_v2 = vmul.f32 1.442695, %v1143_v61  ;;  %v1161_v3 = vpop.permute.xlu0 %1160 }
 0xade   :  { %v1163_v4 = vsel %vm320_vm2, %v1158_v63, %v1161_v3 }
 0xadf   :  { %4195 = vpow2.f32 %v1144_v2  ;;  %v1164_v5 = vsub.f32 0.0, %v1163_v4 }
 0xae1   :  { %v1165_v7 = vmul.f32 1.442695, %v1164_v5  ;;  %v1153_v0 = vpop.permute.xlu0 %1152 }
 0xae2   :  { %v1155_v14 = vsel %vm320_vm2, %v1150_v9, %v1153_v0 }
 0xae3   :  { %4197 = vpow2.f32 %v1165_v7 }
 0xae5   :  { %v4194_v6 = vpop.eup %4193 }
 0xae6   :  { %v1132_v1 = vadd.f32 1.0, %v4194_v6 }
 0xae8   :  { %4199 = vrcp.f32 %v1132_v1 }
 0xae9   :  { %v4196_v8 = vpop.eup %4195  ;;  %4201 = vtanh.f32 %v1155_v14 }
 0xaea   :  { %v1146_v10 = vadd.f32 1.0, %v4196_v8 }
 0xaec   :  { %4203 = vrcp.f32 %v1146_v10 }
 0xaed   :  { %v4198_v11 = vpop.eup %4197 }
 0xaee   :  { %v1167_v22 = vadd.f32 1.0, %v4198_v11 }
 0xaf0   :  { %4205 = vrcp.f32 %v1167_v22 }
 0xaf2   :  { %v4200_v12 = vpop.eup %4199 }
 0xaf3   :  { %v4202_v17 = vpop.eup %4201 }
 0xaf4   :  { %v1174_v42 = vmul.f32 %v4202_v17, %v4200_v12 }
 0xaf6   :  { %v4204_v19 = vpop.eup %4203 }
 0xaf7   :  { %v1173_v23 = vmul.f32 %v4204_v19, %v1171_v18 }
 0xaf9   :  { %v4910_v25 = vadd.f32 %v1174_v42, %v1173_v23  ;;  %v1335_v42 = vrot.slane %v4758_v58, 2 }
 0xafa   :  { %v4206_v26 = vpop.eup %4205 }
 0xafb   :  { %4207 = vtanh.f32 %v4910_v25  ;;  %v1305_v8 = vrot.slane %v4910_v25, 6  ;;  %v1342_v25 = vsel %vm1316_vm5, %v4853_v21, %v1335_v42  ;;  %v3403_v21 = vld [vmem:[#allocation13] ss:$0 sm:$0xff] }
 0xb05   :  { %v4208_v27 = vpop.eup %4207 }
 0xb06   :  { %v4913_v28 = vmul.f32 %v4208_v27, %v4206_v26 }
 0xb08   :  { %v1179_v30 = vrot.slane %v4913_v28, 4  ;;  %v4921_v31 = vsel %vm1314_vm4, %v1318_v29, %v4913_v28  ;;  %v1324_v27 = vrot.slane %v4913_v28, 2 }
 0xb0a   :  { %3684 = vmatmul.mubr.msk.f32.vlgmr.msra.gmra.mrb[8].mxu0 %vm151_vm1, %v1179_v30  ;;  %v1326_v30 = vrot.slane %v4893_v44, 6 }
 0xb0b   :  { %3705 = vmatprep.mubr.msk.f32.mxu0 %vm151_vm1, %v4710_v13  ;;  %v1439_v13 = vld [vmem:[#allocation11 + $0x10] sm:$0xff]  ;;  %3898 = vmatpush3.bf16.msra.mxu0 %v3895_v40 }
 0xbdd   :  { %v1248_v32 = vpop.f32.mrb[8].mxu0 }
 0xbde   :  { %v1253_v33 = vrot.slane %v1248_v32, 2  ;;  %v1256_v34 = vadd.f32 %v1248_v32, %v4744_v24  ;;  %v3685_v35 = vpop.f32.mrb[9].mxu0  ;;  %v1440_v24 = vld [vmem:[#allocation11 + $0x18] sm:$0xff] }
 0xbe0   :  { %v1255_v36 = vadd.f32 %v1253_v33, %v4741_v20  ;;  %v1258_v37 = vrot.slane %v1256_v34, 2  ;;  %v3899_v20 = vpack.c.bf16 %v1440_v24, %v1439_v13  ;;  %v1328_v33 = vrot.slane %v4871_v62, 2 }
 0xbe2   :  { %1259 = vrot.lane.b32.xlu1 %v1258_v37, %s4494_s18  ;;  %1270 = vrot.lane.b32.xlu0 %v1255_v36, %s4495_s4 }
 0xbe3   :  { %3900 = vmatprep.subr.bf16.mxu0 %v3899_v20 }
 0xbe4   :  { %3902 = vmatpush3.bf16.msra.mxu0 %v3899_v20 }
 0xbe6   :  { %1273 = vrot.lane.b32.xlu1 %v1258_v37, %s4493_s7  ;;  %1291 = vrot.lane.b32.xlu0 %v1255_v36, %s4494_s18  ;;  %s4507_s7 = smov 12   ;;  %s4508_s18 = smov 20  }
 0xbe7   :  { %3706 = vmatmul.mubr.msk.f32.vlgmr.msra.gmra.mrb[10].mxu0 %vm151_vm1, %v4719_v15 }
 0xbea   :  { %1294 = vrot.lane.b32.xlu1 %v1258_v37, %s4497_s30  ;;  %1283 = vrot.lane.b32.xlu0 %v1255_v36, %s4496_s27 }
 0xbee   :  { %1286 = vrot.lane.b32.xlu1 %v1258_v37, %s4498_s3 }
 0xc54   :  { %v1260_v49 = vpop.permute.xlu1 %1259  ;;  %v1271_v52 = vpop.permute.xlu0 %1270 }
 0xc55   :  { %v1262_v50 = vsel %vm320_vm2, %v1255_v36, %v1260_v49 }
 0xc56   :  { %v1263_v51 = vsub.f32 0.0, %v1262_v50 }
 0xc58   :  { %v1264_v53 = vmul.f32 1.442695, %v1263_v51  ;;  %v1274_v54 = vpop.permute.xlu1 %1273  ;;  %v1292_v57 = vpop.permute.xlu0 %1291 }
 0xc59   :  { %v1276_v55 = vsel %vm320_vm2, %v1271_v52, %v1274_v54 }
 0xc5a   :  { %4209 = vpow2.f32 %v1264_v53  ;;  %v1277_v15 = vsub.f32 0.0, %v1276_v55 }
 0xc5c   :  { %v1278_v56 = vmul.f32 1.442695, %v1277_v15  ;;  %v1295_v59 = vpop.permute.xlu1 %1294  ;;  %v1284_v5 = vpop.permute.xlu0 %1283 }
 0xc5d   :  { %v1297_v60 = vsel %vm320_vm2, %v1292_v57, %v1295_v59 }
 0xc5e   :  { %4211 = vpow2.f32 %v1278_v56  ;;  %v1298_v61 = vsub.f32 0.0, %v1297_v60 }
 0xc60   :  { %v1299_v2 = vmul.f32 1.442695, %v1298_v61  ;;  %v1287_v3 = vpop.permute.xlu1 %1286 }
 0xc61   :  { %v1289_v6 = vsel %vm320_vm2, %v1284_v5, %v1287_v3 }
 0xc62   :  { %4213 = vpow2.f32 %v1299_v2 }
 0xc64   :  { %v4210_v63 = vpop.eup %4209 }
 0xc65   :  { %v1266_v4 = vadd.f32 1.0, %v4210_v63  ;;  %v3400_v63 = vld [vmem:[%s5338_s6] ss:$0 sm:$0xff]  ;;  %s4505_s6 = smov 4  }
 0xc67   :  { %4215 = vrcp.f32 %v1266_v4 }
 0xc68   :  { %v4212_v7 = vpop.eup %4211  ;;  %4217 = vtanh.f32 %v1289_v6 }
 0xc69   :  { %v1280_v0 = vadd.f32 1.0, %v4212_v7 }
 0xc6b   :  { %4219 = vrcp.f32 %v1280_v0 }
 0xc6c   :  { %v4214_v1 = vpop.eup %4213 }
 0xc6d   :  { %v1301_v11 = vadd.f32 1.0, %v4214_v1 }
 0xc6f   :  { %4221 = vrcp.f32 %v1301_v11 }
 0xc71   :  { %v4216_v9 = vpop.eup %4215 }
 0xc72   :  { %v4218_v14 = vpop.eup %4217 }
 0xc73   :  { %v1308_v17 = vmul.f32 %v4218_v14, %v4216_v9 }
 0xc75   :  { %v4220_v10 = vpop.eup %4219 }
 0xc76   :  { %v1307_v12 = vmul.f32 %v4220_v10, %v1305_v8 }
 0xc78   :  { %v1309_v18 = vadd.f32 %v1308_v17, %v1307_v12 }
 0xc79   :  { %v4222_v19 = vpop.eup %4221 }
 0xc7a   :  { %4223 = vtanh.f32 %v1309_v18 }
 0xc84   :  { %v4224_v22 = vpop.eup %4223 }
 0xc85   :  { %v1311_v23 = vmul.f32 %v4224_v22, %v4222_v19 }
 0xc87   :  { %v1322_v26 = vrot.slane %v1311_v23, 6  ;;  %v1320_v29 = vsel %vm1316_vm5, %v4921_v31, %v1311_v23 }
 0xc88   :  { %v1344_v32 = vsel %vm320_vm2, %v1320_v29, %v1342_v25 }
 0xc89   :  { %v1337_v34 = vsel %vm1312_vm3, %v1322_v26, %v1324_v27 }
 0xc8a   :  { %v1338_v35 = vsel %vm1314_vm4, %v1337_v34, %v1326_v30 }
 0xc8b   :  { %v1339_v58 = vsel %vm1316_vm5, %v1338_v35, %v1328_v33 }
 0xc8c   :  { %v1343_v28 = vsel %vm320_vm2, %v4843_v16, %v1339_v58 }
 0xc8d   :  { %3694 = vmatprep.mubr.msk.f32.mxu1 %vm151_vm1, %v1343_v28 }
 0xc8e   :  { %3695 = vmatmul.mubr.msk.f32.vlgmr.msra.gmra.mrb[8].mxu1 %vm151_vm1, %v1344_v32 }
 0xcba   :  { %v3707_v31 = vpop.f32.mrb[10].mxu0 }
 0xcbb   :  { %v1520_v44 = vadd.f32 %v3707_v31, %v3403_v21  ;;  %v1514_v36 = vpop.f32.mrb[11].mxu0 }
 0xcbc   :  { %v1515_v37 = vadd.f32 %v3403_v21, %v1514_v36  ;;  %v5069_v21 = vld [vmem:[#allocation5 + $0x8] sm:$0xff]  ;;  %v5071_v36 = vld [vmem:[#allocation5] sm:$0xff] }
 0xcbe   :  { %v4958_v62 = vpack.i.bf16 %v1520_v44, %v1515_v37  ;;  %v3903_v39 = vpack.c.bf16 %v1520_v44, %v1515_v37 }
 0xcc0   :  { %4023 = vrot.lane.b32.xlu0 %v4958_v62, %s4499_s2  ;;  %4028 = vrot.lane.b32.xlu1 %v4958_v62, %s4500_s29 }
 0xcc1   :  { %3905 = vmatprep.subr.msk.bf16.mxu1 %vm4962_vm7, %v3903_v39 }
 0xcc2   :  { %3908 = vmatpush3.bf16.xpose.msk.msra.mxu1 %vm4962_vm7, %v3903_v39 }
 0xcc4   :  { %4033 = vrot.lane.b32.xlu0 %v4958_v62, %s4501_s28  ;;  %4038 = vrot.lane.b32.xlu1 %v4958_v62, %s4495_s4 }
 0xcc8   :  { %4043 = vrot.lane.b32.xlu0 %v4958_v62, %s4502_s15  ;;  %4048 = vrot.lane.b32.xlu1 %v4958_v62, %s4503_s16 }
 0xccc   :  { %4053 = vrot.lane.b32.xlu0 %v4958_v62, %s4504_s1 }
 0xd32   :  { %v4024_v16 = vpop.permute.xlu0 %4023  ;;  %v4029_v40 = vpop.permute.xlu1 %4028 }
 0xd33   :  { %v4026_v13 = vunpack.i.h.bf16 %v4024_v16  ;;  %v4025_v24 = vunpack.i.l.bf16 %v4024_v16  ;;  %v4031_v20 = vunpack.i.h.bf16 %v4029_v40  ;;  %v4030_v41 = vunpack.i.l.bf16 %v4029_v40 }
 0xd35   :  { %v3909_v43 = vpack.c.bf16 %v4026_v13, %v4025_v24  ;;  %v3915_v45 = vpack.c.bf16 %v4031_v20, %v4030_v41 }
 0xd36   :  { %v4034_v46 = vpop.permute.xlu0 %4033  ;;  %v4984_v47 = vpop.permute.xlu1 %4038 }
 0xd37   :  { %v4036_v48 = vunpack.i.h.bf16 %v4034_v46  ;;  %v4035_v49 = vunpack.i.l.bf16 %v4034_v46  ;;  %v4041_v50 = vunpack.i.h.bf16 %v4984_v47  ;;  %v4040_v51 = vunpack.i.l.bf16 %v4984_v47  ;;  %3911 = vmatprep.subr.msk.bf16.mxu0 %vm4962_vm7, %v3909_v43  ;;  %3917 = vmatprep.subr.msk.bf16.mxu1 %vm4962_vm7, %v3915_v45 }
 0xd38   :  { %3914 = vmatpush3.bf16.xpose.msk.msra.mxu0 %vm4962_vm7, %v3909_v43 }
 0xd39   :  { %v3921_v52 = vpack.c.bf16 %v4036_v48, %v4035_v49  ;;  %v3927_v6 = vpack.c.bf16 %v4041_v50, %v4040_v51 }
 0xd3a   :  { %v4994_v53 = vpop.permute.xlu0 %4043  ;;  %v4996_v54 = vpop.permute.xlu1 %4048 }
 0xd3b   :  { %v4046_v55 = vunpack.i.h.bf16 %v4994_v53  ;;  %v4045_v15 = vunpack.i.l.bf16 %v4994_v53  ;;  %v4051_v56 = vunpack.i.h.bf16 %v4996_v54  ;;  %v4050_v57 = vunpack.i.l.bf16 %v4996_v54  ;;  %3923 = vmatprep.subr.msk.bf16.mxu0 %vm4962_vm7, %v3921_v52 }
 0xd3d   :  { %v3933_v1 = vpack.c.bf16 %v4046_v55, %v4045_v15  ;;  %v3939_v8 = vpack.c.bf16 %v4051_v56, %v4050_v57 }
 0xd3e   :  { %v5004_v59 = vpop.permute.xlu0 %4053 }
 0xd3f   :  { %v4056_v60 = vunpack.i.h.bf16 %v5004_v59  ;;  %v4055_v61 = vunpack.i.l.bf16 %v5004_v59 }
 0xd41   :  { %v3945_v12 = vpack.c.bf16 %v4056_v60, %v4055_v61 }
 0xd61   :  { %v3696_v2 = vpop.f32.mrb[8].mxu1 }
 0xd62   :  { %v1434_v3 = vadd.f32 %v3696_v2, %v3400_v63  ;;  %v1428_v4 = vpop.f32.mrb[9].mxu1 }
 0xd63   :  { %v1429_v5 = vadd.f32 %v3400_v63, %v1428_v4 }
 0xd64   :  { %1527 = vrot.lane.b32.xlu0 %v1434_v3, %s4499_s2 }
 0xd65   :  { %3712 = vmatprep.mubr.msk.f32.mxu1 %vm1583_vm6, %v1429_v5  ;;  %1525 = vrot.lane.b32.xlu1 %v1429_v5, %s4499_s2 }
 0xd66   :  { %3713 = vmatmul.mubr.msk.f32.vlgmr.msra.gmra.mrb[10].mxu1 %vm1583_vm6, %v1434_v3 }
 0xd67   :  { %3920 = vmatpush3.bf16.xpose.msk.msra.mxu1 %vm4962_vm7, %v3915_v45 }
 0xd68   :  { %1531 = vrot.lane.b32.xlu0 %v1434_v3, %s4500_s29  ;;  %3929 = vmatprep.subr.msk.bf16.mxu1 %vm4962_vm7, %v3927_v6 }
 0xd69   :  { %1529 = vrot.lane.b32.xlu1 %v1429_v5, %s4500_s29 }
 0xd6c   :  { %1535 = vrot.lane.b32.xlu0 %v1434_v3, %s4501_s28 }
 0xd6d   :  { %1533 = vrot.lane.b32.xlu1 %v1429_v5, %s4501_s28  ;;  %s4511_s28 = smov [#allocation14]  }
 0xd70   :  { %1539 = vrot.lane.b32.xlu0 %v1434_v3, %s4495_s4 }
 0xd71   :  { %1537 = vrot.lane.b32.xlu1 %v1429_v5, %s4495_s4  ;;  %s4509_s4 = smov 24  }
 0xd74   :  { %1543 = vrot.lane.b32.xlu0 %v1434_v3, %s4502_s15 }
 0xd75   :  { %1541 = vrot.lane.b32.xlu1 %v1429_v5, %s4502_s15  ;;  %s3375_s15 = sshll.u32 %s4511_s28, 4  ;;  %s3376_s15 = int_to_ptr.vmem [resolvable:$true] %s3375_s15 }
 0xd76   :  { %p4454_p1 = scmp.lt.s32.totalorder %s3376_s15, %s3376_s15 }
 0xd78   :  { %1547 = vrot.lane.b32.xlu0 %v1434_v3, %s4503_s16 }
 0xd79   :  { %1545 = vrot.lane.b32.xlu1 %v1429_v5, %s4503_s16 }
 0xd7c   :  { %1551 = vrot.lane.b32.xlu0 %v1434_v3, %s4504_s1 }
 0xd7d   :  { %1549 = vrot.lane.b32.xlu1 %v1429_v5, %s4504_s1 }
 0xd80   :  { %4058 = vrot.lane.b32.xlu0 %v4958_v62, %s4496_s27 }
 0xd81   :  { %4063 = vrot.lane.b32.xlu1 %v4024_v16, %s4496_s27 }
 0xd84   :  { %4073 = vrot.lane.b32.xlu0 %v4034_v46, %s4496_s27 }
 0xd85   :  { %4068 = vrot.lane.b32.xlu1 %v4029_v40, %s4496_s27 }
 0xdd6   :  { %v1528_v7 = vpop.permute.xlu0 %1527 }
 0xdd7   :  { %v1526_v0 = vpop.permute.xlu1 %1525 }
 0xdd8   :  { %3719 = vmatprep.mubr.msk.f32.mxu0 %vm1583_vm6, %v1526_v0 }
 0xdd9   :  { %3720 = vmatmul.mubr.msk.f32.vlgmr.msra.gmra.mrb[12].mxu0 %vm1583_vm6, %v1528_v7 }
 0xdda   :  { %3926 = vmatpush3.bf16.xpose.msk.msra.mxu0 %vm4962_vm7, %v3921_v52  ;;  %v1532_v9 = vpop.permute.xlu0 %1531 }
 0xddb   :  { %3935 = vmatprep.subr.msk.bf16.mxu0 %vm4962_vm7, %v3933_v1  ;;  %v1530_v14 = vpop.permute.xlu1 %1529 }
 0xddc   :  { %3726 = vmatprep.mubr.msk.f32.mxu1 %vm1583_vm6, %v1530_v14 }
 0xddd   :  { %3727 = vmatmul.mubr.msk.f32.vlgmr.msra.gmra.mrb[12].mxu1 %vm1583_vm6, %v1532_v9 }
 0xdde   :  { %3932 = vmatpush3.bf16.xpose.msk.msra.mxu1 %vm4962_vm7, %v3927_v6  ;;  %v1536_v10 = vpop.permute.xlu0 %1535 }
 0xddf   :  { %3941 = vmatprep.subr.msk.bf16.mxu1 %vm4962_vm7, %v3939_v8  ;;  %v1534_v11 = vpop.permute.xlu1 %1533 }
 0xde0   :  { %3733 = vmatprep.mubr.msk.f32.mxu0 %vm1583_vm6, %v1534_v11 }
 0xde1   :  { %3734 = vmatmul.mubr.msk.f32.vlgmr.msra.gmra.mrb[14].mxu0 %vm1583_vm6, %v1536_v10 }
 0xde2   :  { %3938 = vmatpush3.bf16.xpose.msk.msra.mxu0 %vm4962_vm7, %v3933_v1  ;;  %v1540_v17 = vpop.permute.xlu0 %1539 }
 0xde3   :  { %3947 = vmatprep.subr.msk.bf16.mxu0 %vm4962_vm7, %v3945_v12  ;;  %v1538_v18 = vpop.permute.xlu1 %1537 }
 0xde4   :  { %3740 = vmatprep.mubr.msk.f32.mxu1 %vm1583_vm6, %v1538_v18 }
 0xde5   :  { %3741 = vmatmul.mubr.msk.f32.vlgmr.msra.gmra.mrb[14].mxu1 %vm1583_vm6, %v1540_v17 }
 0xde6   :  { %3944 = vmatpush3.bf16.xpose.msk.msra.mxu1 %vm4962_vm7, %v3939_v8  ;;  %v1544_v19 = vpop.permute.xlu0 %1543 }
 0xde7   :  { %v1542_v22 = vpop.permute.xlu1 %1541 }
 0xde8   :  { %3747 = vmatprep.mubr.msk.f32.mxu0 %vm1583_vm6, %v1542_v22 }
 0xde9   :  { %3748 = vmatmul.mubr.msk.f32.vlgmr.msra.gmra.mrb[16].mxu0 %vm1583_vm6, %v1544_v19 }
 0xdea   :  { %3950 = vmatpush3.bf16.xpose.msk.msra.mxu0 %vm4962_vm7, %v3945_v12  ;;  %v1548_v23 = vpop.permute.xlu0 %1547 }
 0xdeb   :  { %v1546_v42 = vpop.permute.xlu1 %1545 }
 0xdec   :  { %3754 = vmatprep.mubr.msk.f32.mxu1 %vm1583_vm6, %v1546_v42 }
 0xded   :  { %3755 = vmatmul.mubr.msk.f32.vlgmr.msra.gmra.mrb[16].mxu1 %vm1583_vm6, %v1548_v23 }
 0xdee   :  { %v1552_v26 = vpop.permute.xlu0 %1551 }
 0xdef   :  { %v1550_v27 = vpop.permute.xlu1 %1549 }
 0xdf0   :  { %3761 = vmatprep.mubr.msk.f32.mxu0 %vm1583_vm6, %v1550_v27 }
 0xdf1   :  { %3762 = vmatmul.mubr.msk.f32.vlgmr.msra.gmra.mrb[18].mxu0 %vm1583_vm6, %v1552_v26 }
 0xdf2   :  { %v4059_v29 = vpop.permute.xlu0 %4058 }
 0xdf3   :  { %v4061_v25 = vunpack.i.h.bf16 %v4059_v29  ;;  %v4060_v30 = vunpack.i.l.bf16 %v4059_v29  ;;  %v4064_v32 = vpop.permute.xlu1 %4063 }
 0xdf4   :  { %v4066_v33 = vunpack.i.h.bf16 %v4064_v32  ;;  %v4065_v34 = vunpack.i.l.bf16 %v4064_v32 }
 0xdf5   :  { %v3951_v35 = vpack.c.bf16 %v4061_v25, %v4060_v30 }
 0xdf6   :  { %v5066_v58 = vpack.c.bf16 %v4066_v33, %v4065_v34 }
 0xdf7   :  { %3952 = vmatprep.subr.bf16.mxu1 %v3951_v35 }
 0xdf8   :  { %3954 = vmatpush3.bf16.msra.mxu1 %v3951_v35 }
 0xdf9   :  { %3956 = vmatprep.subr.bf16.mxu1 %v5066_v58 }
 0xe39   :  { %v3714_v28 = vpop.f32.mrb[10].mxu1 }
 0xe3a   :  { %v2249_v31 = vmul.f32 0.5, %v3714_v28  ;;  %v1658_v44 = vpop.f32.mrb[11].mxu1 }
 0xe3b   :  { %v2248_v37 = vmul.f32 0.5, %v1658_v44 }
 0xe3c   :  { %v5074_v62 = vadd.f32 %v5069_v21, %v2249_v31 }
 0xe3d   :  { %v5077_v38 = vadd.f32 %v5071_v36, %v2248_v37 }
 0xe3e   :  { %v2285_v39 = vsel %vm320_vm2, %v5074_v62, -inf }
 0xe3f   :  { %2286 = vmax.xlane.f32.xlu0 %v2285_v39  ;;  %v2282_v16 = vsel %vm320_vm2, %v5077_v38, -inf }
 0xe40   :  { %2283 = vmax.xlane.f32.xlu1 %v2282_v16 }
 0xeac   :  { %v3721_v40 = vpop.f32.mrb[12].mxu0 }
 0xead   :  { %v2251_v13 = vmul.f32 0.5, %v3721_v40  ;;  %v1741_v24 = vpop.f32.mrb[13].mxu0 }
 0xeae   :  { %v2250_v20 = vmul.f32 0.5, %v1741_v24 }
 0xeaf   :  { %v5084_v41 = vadd.f32 %v5069_v21, %v2251_v13  ;;  %v5157_v13 = vpop.permute.xlu0 %4073 }
 0xeb0   :  { %v3728_v43 = vpop.f32.mrb[12].mxu1  ;;  %v5087_v45 = vadd.f32 %v5071_v36, %v2250_v20 }
 0xeb1   :  { %v2253_v46 = vmul.f32 0.5, %v3728_v43  ;;  %v1824_v48 = vpop.f32.mrb[13].mxu1  ;;  %v2291_v49 = vsel %vm320_vm2, %v5084_v41, -inf }
 0xeb2   :  { %v2252_v50 = vmul.f32 0.5, %v1824_v48  ;;  %2292 = vmax.xlane.f32.xlu1 %v2291_v49  ;;  %v2288_v51 = vsel %vm320_vm2, %v5087_v45, -inf }
 0xeb3   :  { %2289 = vmax.xlane.f32.xlu0 %v2288_v51  ;;  %v5094_v52 = vadd.f32 %v5069_v21, %v2253_v46 }
 0xeb4   :  { %v3735_v55 = vpop.f32.mrb[14].mxu0  ;;  %v5097_v15 = vadd.f32 %v5071_v36, %v2252_v50 }
 0xeb5   :  { %v2255_v56 = vmul.f32 0.5, %v3735_v55  ;;  %v1907_v57 = vpop.f32.mrb[15].mxu0  ;;  %v2297_v60 = vsel %vm320_vm2, %v5094_v52, -inf }
 0xeb6   :  { %v2254_v61 = vmul.f32 0.5, %v1907_v57  ;;  %2298 = vmax.xlane.f32.xlu1 %v2297_v60  ;;  %v2294_v63 = vsel %vm320_vm2, %v5097_v15, -inf }
 0xeb7   :  { %2295 = vmax.xlane.f32.xlu0 %v2294_v63  ;;  %v5104_v2 = vadd.f32 %v5069_v21, %v2255_v56 }
 0xeb8   :  { %v3742_v3 = vpop.f32.mrb[14].mxu1  ;;  %v5107_v4 = vadd.f32 %v5071_v36, %v2254_v61 }
 0xeb9   :  { %v2257_v5 = vmul.f32 0.5, %v3742_v3  ;;  %v1990_v6 = vpop.f32.mrb[15].mxu1  ;;  %v2303_v7 = vsel %vm320_vm2, %v5104_v2, -inf }
 0xeba   :  { %v2256_v0 = vmul.f32 0.5, %v1990_v6  ;;  %2304 = vmax.xlane.f32.xlu1 %v2303_v7  ;;  %v2300_v1 = vsel %vm320_vm2, %v5107_v4, -inf }
 0xebb   :  { %2301 = vmax.xlane.f32.xlu0 %v2300_v1  ;;  %v5114_v9 = vadd.f32 %v5069_v21, %v2257_v5 }
 0xebc   :  { %v3749_v14 = vpop.f32.mrb[16].mxu0  ;;  %v5117_v8 = vadd.f32 %v5071_v36, %v2256_v0 }
 0xebd   :  { %v2259_v10 = vmul.f32 0.5, %v3749_v14  ;;  %v2073_v11 = vpop.f32.mrb[17].mxu0  ;;  %v2309_v12 = vsel %vm320_vm2, %v5114_v9, -inf }
 0xebe   :  { %v2258_v17 = vmul.f32 0.5, %v2073_v11  ;;  %2310 = vmax.xlane.f32.xlu1 %v2309_v12  ;;  %v2306_v18 = vsel %vm320_vm2, %v5117_v8, -inf }
 0xebf   :  { %2307 = vmax.xlane.f32.xlu0 %v2306_v18  ;;  %v5124_v19 = vadd.f32 %v5069_v21, %v2259_v10 }
 0xec0   :  { %v3756_v22 = vpop.f32.mrb[16].mxu1  ;;  %v5127_v23 = vadd.f32 %v5071_v36, %v2258_v17 }
 0xec1   :  { %v2261_v42 = vmul.f32 0.5, %v3756_v22  ;;  %v2156_v26 = vpop.f32.mrb[17].mxu1  ;;  %v2315_v27 = vsel %vm320_vm2, %v5124_v19, -inf }
 0xec2   :  { %v2260_v29 = vmul.f32 0.5, %v2156_v26  ;;  %2316 = vmax.xlane.f32.xlu1 %v2315_v27  ;;  %v2312_v25 = vsel %vm320_vm2, %v5127_v23, -inf }
 0xec3   :  { %2313 = vmax.xlane.f32.xlu0 %v2312_v25  ;;  %v5134_v30 = vadd.f32 %v5069_v21, %v2261_v42 }
 0xec4   :  { %v3763_v32 = vpop.f32.mrb[18].mxu0  ;;  %v5137_v33 = vadd.f32 %v5071_v36, %v2260_v29 }
 0xec5   :  { %v2263_v34 = vmul.f32 0.5, %v3763_v32  ;;  %v2239_v35 = vpop.f32.mrb[19].mxu0  ;;  %v2321_v28 = vsel %vm320_vm2, %v5134_v30, -inf }
 0xec6   :  { %v2262_v31 = vmul.f32 0.5, %v2239_v35  ;;  %2322 = vmax.xlane.f32.xlu1 %v2321_v28  ;;  %v2318_v44 = vsel %vm320_vm2, %v5137_v33, -inf }
 0xec7   :  { %2319 = vmax.xlane.f32.xlu0 %v2318_v44  ;;  %v5144_v37 = vadd.f32 %v5069_v21, %v2263_v34  ;;  %v5159_v21 = vpop.permute.xlu1 %4068 }
 0xec8   :  { %v5147_v39 = vadd.f32 %v5071_v36, %v2262_v31 }
 0xec9   :  { %v2327_v16 = vsel %vm320_vm2, %v5144_v37, -inf }
 0xeca   :  { %2328 = vmax.xlane.f32.xlu1 %v2327_v16  ;;  %v2324_v40 = vsel %vm320_vm2, %v5147_v39, -inf }
 0xecb   :  { %2325 = vmax.xlane.f32.xlu0 %v2324_v40 }
 0xecc   :  { %v2287_v36 = vpop.xlane.xlu0 %2286 }
 0xecd   :  { %v2284_v24 = vpop.xlane.xlu1 %2283  ;;  %v2331_v20 = vsub.f32 %v5074_v62, %v2287_v36 }
 0xece   :  { %v2330_v43 = vsub.f32 %v5077_v38, %v2284_v24 }
 0xecf   :  { %v2348_v46 = vmul.f32 1.442695, %v2331_v20 }
 0xed0   :  { %v2346_v48 = vmul.f32 1.442695, %v2330_v43 }
 0xed1   :  { %4225 = vpow2.f32 %v2348_v46 }
 0xed2   :  { %4227 = vpow2.f32 %v2346_v48 }
 0xedb   :  { %4078 = vrot.lane.b32.xlu1 %v4984_v47, %s4496_s27  ;;  %v5163_v49 = vpop.eup %4225 }
 0xedc   :  { %v5165_v47 = vpop.eup %4227 }
 0xedd   :  { %v2378_v50 = vsel %vm320_vm2, %v5165_v47, 0.0 }
 0xee1   :  { %4083 = vrot.lane.b32.xlu0 %v4994_v53, %s4496_s27  ;;  %v2381_v53 = vsel %vm320_vm2, %v5163_v49, 0.0 }
 0xeff   :  { %2382 = vadd.xlane.f32.xlu1 %v2381_v53 }
 0xf00   :  { %2379 = vadd.xlane.f32.xlu0 %v2378_v50 }
 0xf3f   :  { %v2293_v51 = vpop.xlane.xlu1 %2292 }
 0xf40   :  { %v2333_v62 = vsub.f32 %v5084_v41, %v2293_v51  ;;  %v2290_v38 = vpop.xlane.xlu0 %2289 }
 0xf41   :  { %v2332_v55 = vsub.f32 %v5087_v45, %v2290_v38 }
 0xf42   :  { %v2352_v56 = vmul.f32 1.442695, %v2333_v62 }
 0xf43   :  { %v2350_v57 = vmul.f32 1.442695, %v2332_v55  ;;  %v2299_v60 = vpop.xlane.xlu1 %2298 }
 0xf44   :  { %4229 = vpow2.f32 %v2352_v56  ;;  %v2335_v61 = vsub.f32 %v5094_v52, %v2299_v60  ;;  %v2296_v63 = vpop.xlane.xlu0 %2295 }
 0xf45   :  { %4231 = vpow2.f32 %v2350_v57  ;;  %v2334_v3 = vsub.f32 %v5097_v15, %v2296_v63 }
 0xf46   :  { %v2356_v5 = vmul.f32 1.442695, %v2335_v61 }
 0xf47   :  { %v2354_v6 = vmul.f32 1.442695, %v2334_v3  ;;  %v2305_v7 = vpop.xlane.xlu1 %2304 }
 0xf48   :  { %4233 = vpow2.f32 %v2356_v5  ;;  %v2337_v0 = vsub.f32 %v5104_v2, %v2305_v7  ;;  %v2302_v41 = vpop.xlane.xlu0 %2301 }
 0xf49   :  { %4235 = vpow2.f32 %v2354_v6  ;;  %v2336_v45 = vsub.f32 %v5107_v4, %v2302_v41 }
 0xf4a   :  { %v2360_v1 = vmul.f32 1.442695, %v2337_v0 }
 0xf4b   :  { %v2358_v14 = vmul.f32 1.442695, %v2336_v45  ;;  %v2311_v10 = vpop.xlane.xlu1 %2310 }
 0xf4c   :  { %4237 = vpow2.f32 %v2360_v1  ;;  %v2339_v52 = vsub.f32 %v5114_v9, %v2311_v10  ;;  %v2308_v11 = vpop.xlane.xlu0 %2307 }
 0xf4d   :  { %4239 = vpow2.f32 %v2358_v14  ;;  %v2338_v15 = vsub.f32 %v5117_v8, %v2308_v11 }
 0xf4e   :  { %v5179_v12 = vpop.eup %4229  ;;  %v2364_v17 = vmul.f32 1.442695, %v2339_v52 }
 0xf4f   :  { %v5181_v18 = vpop.eup %4231  ;;  %v2362_v2 = vmul.f32 1.442695, %v2338_v15  ;;  %v2317_v22 = vpop.xlane.xlu1 %2316  ;;  %v2387_v4 = vsel %vm320_vm2, %v5179_v12, 0.0 }
 0xf50   :  { %4241 = vpow2.f32 %v2364_v17  ;;  %v2341_v42 = vsub.f32 %v5124_v19, %v2317_v22  ;;  %v2314_v26 = vpop.xlane.xlu0 %2313  ;;  %2388 = vadd.xlane.f32.xlu1 %v2387_v4  ;;  %v2384_v9 = vsel %vm320_vm2, %v5181_v18, 0.0  ;;  %v4071_v17 = vunpack.i.h.bf16 %v5159_v21 }
 0xf51   :  { %4243 = vpow2.f32 %v2362_v2  ;;  %v2340_v8 = vsub.f32 %v5127_v23, %v2314_v26  ;;  %2385 = vadd.xlane.f32.xlu0 %v2384_v9  ;;  %v4070_v2 = vunpack.i.l.bf16 %v5159_v21 }
 0xf52   :  { %v5189_v27 = vpop.eup %4233  ;;  %v2368_v29 = vmul.f32 1.442695, %v2341_v42 }
 0xf53   :  { %v5191_v25 = vpop.eup %4235  ;;  %v2366_v32 = vmul.f32 1.442695, %v2340_v8  ;;  %v2323_v34 = vpop.xlane.xlu1 %2322  ;;  %v2393_v35 = vsel %vm320_vm2, %v5189_v27, 0.0 }
 0xf54   :  { %4245 = vpow2.f32 %v2368_v29  ;;  %v2343_v19 = vsub.f32 %v5134_v30, %v2323_v34  ;;  %2394 = vadd.xlane.f32.xlu1 %v2393_v35  ;;  %v2320_v28 = vpop.xlane.xlu0 %2319  ;;  %v2390_v31 = vsel %vm320_vm2, %v5191_v25, 0.0  ;;  %v4076_v29 = vunpack.i.h.bf16 %v5157_v13 }
 0xf55   :  { %4247 = vpow2.f32 %v2366_v32  ;;  %v2342_v23 = vsub.f32 %v5137_v33, %v2320_v28  ;;  %2391 = vadd.xlane.f32.xlu0 %v2390_v31  ;;  %v4075_v32 = vunpack.i.l.bf16 %v5157_v13 }
 0xf56   :  { %v5199_v44 = vpop.eup %4237  ;;  %v2372_v16 = vmul.f32 1.442695, %v2343_v19 }
 0xf57   :  { %v5201_v40 = vpop.eup %4239  ;;  %v2370_v36 = vmul.f32 1.442695, %v2342_v23  ;;  %v2329_v24 = vpop.xlane.xlu1 %2328  ;;  %v2399_v20 = vsel %vm320_vm2, %v5199_v44, 0.0  ;;  %v3963_v23 = vpack.c.bf16 %v4076_v29, %v4075_v32 }
 0xf58   :  { %4249 = vpow2.f32 %v2372_v16  ;;  %v2345_v30 = vsub.f32 %v5144_v37, %v2329_v24  ;;  %2400 = vadd.xlane.f32.xlu1 %v2399_v20  ;;  %v2326_v43 = vpop.xlane.xlu0 %2325  ;;  %v2396_v46 = vsel %vm320_vm2, %v5201_v40, 0.0 }
 0xf59   :  { %4251 = vpow2.f32 %v2370_v36  ;;  %v2344_v33 = vsub.f32 %v5147_v39, %v2326_v43  ;;  %2397 = vadd.xlane.f32.xlu0 %v2396_v46 }
 0xf5a   :  { %v5209_v48 = vpop.eup %4241  ;;  %v2376_v53 = vmul.f32 1.442695, %v2345_v30 }
 0xf5b   :  { %v5211_v50 = vpop.eup %4243  ;;  %v2374_v51 = vmul.f32 1.442695, %v2344_v33  ;;  %v4079_v62 = vpop.permute.xlu1 %4078  ;;  %v2405_v38 = vsel %vm320_vm2, %v5209_v48, 0.0 }
 0xf5c   :  { %4253 = vpow2.f32 %v2376_v53  ;;  %v4081_v37 = vunpack.i.h.bf16 %v4079_v62  ;;  %v4080_v55 = vunpack.i.l.bf16 %v4079_v62  ;;  %2406 = vadd.xlane.f32.xlu1 %v2405_v38  ;;  %v2402_v56 = vsel %vm320_vm2, %v5211_v50, 0.0  ;;  %v4084_v14 = vpop.permute.xlu0 %4083 }
 0xf5d   :  { %4255 = vpow2.f32 %v2374_v51  ;;  %2403 = vadd.xlane.f32.xlu0 %v2402_v56  ;;  %v4086_v16 = vunpack.i.h.bf16 %v4084_v14  ;;  %v4085_v36 = vunpack.i.l.bf16 %v4084_v14 }
 0xf5e   :  { %v5217_v39 = vpop.eup %4245  ;;  %v3967_v57 = vpack.c.bf16 %v4081_v37, %v4080_v55 }
 0xf5f   :  { %v5219_v60 = vpop.eup %4247  ;;  %v2411_v61 = vsel %vm320_vm2, %v5217_v39, 0.0  ;;  %v3971_v43 = vpack.c.bf16 %v4086_v16, %v4085_v36 }
 0xf60   :  { %2412 = vadd.xlane.f32.xlu1 %v2411_v61  ;;  %3968 = vmatprep.subr.bf16.mxu0 %v3967_v57  ;;  %v2408_v63 = vsel %vm320_vm2, %v5219_v60, 0.0 }
 0xf61   :  { %3970 = vmatpush3.bf16.msra.mxu0 %v3967_v57  ;;  %2409 = vadd.xlane.f32.xlu0 %v2408_v63 }
 0xf62   :  { %v5225_v3 = vpop.eup %4249 }
 0xf63   :  { %v5227_v5 = vpop.eup %4251  ;;  %v2417_v6 = vsel %vm320_vm2, %v5225_v3, 0.0 }
 0xf64   :  { %2418 = vadd.xlane.f32.xlu1 %v2417_v6  ;;  %v2414_v7 = vsel %vm320_vm2, %v5227_v5, 0.0 }
 0xf65   :  { %2415 = vadd.xlane.f32.xlu0 %v2414_v7 }
 0xf66   :  { %v5233_v0 = vpop.eup %4253 }
 0xf67   :  { %v5235_v41 = vpop.eup %4255  ;;  %v2423_v45 = vsel %vm320_vm2, %v5233_v0, 0.0 }
 0xf68   :  { %2424 = vadd.xlane.f32.xlu1 %v2423_v45  ;;  %v2420_v1 = vsel %vm320_vm2, %v5235_v41, 0.0 }
 0xf69   :  { %2421 = vadd.xlane.f32.xlu0 %v2420_v1 }
 0xf79   :  { %4088 = vrot.lane.b32.xlu1 %v4996_v54, %s4496_s27  ;;  %v3959_v54 = vpack.c.bf16 %v4071_v17, %v4070_v2 }
 0xf7f   :  { %4093 = vrot.lane.b32.xlu0 %v5004_v59, %s4496_s27 }
 0xf8c   :  { %v2383_v10 = vpop.xlane.xlu1 %2382 }
 0xf8d   :  { %4257 = vrcp.f32 %v2383_v10  ;;  %v2380_v52 = vpop.xlane.xlu0 %2379 }
 0xf8e   :  { %4259 = vrcp.f32 %v2380_v52 }
 0xf97   :  { %v4258_v11 = vpop.eup %4257 }
 0xf98   :  { %v4260_v15 = vpop.eup %4259  ;;  %v2429_v4 = vmul.f32 %v4258_v11, %v5163_v49 }
 0xf99   :  { %v2427_v22 = vmul.f32 %v4260_v15, %v5165_v47 }
 0xf9b   :  { %3768 = vmatprep.mubr.msk.f32.mxu1 %vm320_vm2, %v2427_v22 }
 0xf9c   :  { %3769 = vmatmul.mubr.msk.f32.vlgmr.msra.gmra.mrb[18].mxu1 %vm320_vm2, %v2429_v4 }
 0xf9d   :  { %3958 = vmatpush3.bf16.msra.mxu1 %v5066_v58 }
 0xf9e   :  { %3960 = vmatprep.subr.bf16.mxu1 %v3959_v54 }
 0xfdd   :  { %v2389_v59 = vpop.xlane.xlu1 %2388 }
 0xfde   :  { %4261 = vrcp.f32 %v2389_v59  ;;  %v2386_v42 = vpop.xlane.xlu0 %2385 }
 0xfdf   :  { %4263 = vrcp.f32 %v2386_v42  ;;  %v3230_v42 = vld [vmem:[%s5341_s9 + $0x8] sm:$0xff] }
 0xfe1   :  { %v2395_v26 = vpop.xlane.xlu1 %2394 }
 0xfe2   :  { %4265 = vrcp.f32 %v2395_v26  ;;  %v2392_v9 = vpop.xlane.xlu0 %2391 }
 0xfe3   :  { %4267 = vrcp.f32 %v2392_v9 }
 0xfe5   :  { %v2401_v21 = vpop.xlane.xlu1 %2400 }
 0xfe6   :  { %4269 = vrcp.f32 %v2401_v21  ;;  %v2398_v47 = vpop.xlane.xlu0 %2397 }
 0xfe7   :  { %4271 = vrcp.f32 %v2398_v47  ;;  %v3231_v47 = vld [vmem:[%s5341_s9 + $0x10] sm:$0xff] }
 0xfe8   :  { %v4262_v49 = vpop.eup %4261 }
 0xfe9   :  { %v4264_v8 = vpop.eup %4263  ;;  %v2407_v58 = vpop.xlane.xlu1 %2406  ;;  %v2433_v19 = vmul.f32 %v4262_v49, %v5179_v12  ;;  %v3232_v49 = vld [vmem:[%s5341_s9 + $0x18] sm:$0xff] }
 0xfea   :  { %4273 = vrcp.f32 %v2407_v58  ;;  %v2404_v34 = vpop.xlane.xlu0 %2403  ;;  %v2431_v35 = vmul.f32 %v4264_v8, %v5181_v18  ;;  %v3987_v8 = vpack.c.bf16 %v3232_v49, %v3231_v47  ;;  %v3458_v49 = vld [vmem:[%s5344_s12] ss:$0 sm:$0xff] }
 0xfeb   :  { %4275 = vrcp.f32 %v2404_v34 }
 0xfec   :  { %v4266_v28 = vpop.eup %4265  ;;  %3775 = vmatprep.mubr.msk.f32.mxu1 %vm320_vm2, %v2431_v35 }
 0xfed   :  { %v4268_v31 = vpop.eup %4267  ;;  %v2413_v24 = vpop.xlane.xlu1 %2412  ;;  %3776 = vmatmul.mubr.msk.f32.vlgmr.msra.gmra.mrb[20].mxu1 %vm320_vm2, %v2433_v19  ;;  %v2437_v18 = vmul.f32 %v4266_v28, %v5189_v27 }
 0xfee   :  { %4277 = vrcp.f32 %v2413_v24  ;;  %3962 = vmatpush3.bf16.msra.mxu1 %v3959_v54  ;;  %v2410_v13 = vpop.xlane.xlu0 %2409  ;;  %v2435_v20 = vmul.f32 %v4268_v31, %v5191_v25 }
 0xfef   :  { %3964 = vmatprep.subr.bf16.mxu1 %v3963_v23  ;;  %4279 = vrcp.f32 %v2410_v13 }
 0xff0   :  { %v4270_v12 = vpop.eup %4269  ;;  %3782 = vmatprep.mubr.msk.f32.mxu1 %vm320_vm2, %v2435_v20 }
 0xff1   :  { %v4272_v30 = vpop.eup %4271  ;;  %v2419_v46 = vpop.xlane.xlu1 %2418  ;;  %3783 = vmatmul.mubr.msk.f32.vlgmr.msra.gmra.mrb[22].mxu1 %vm320_vm2, %v2437_v18  ;;  %v2441_v51 = vmul.f32 %v4270_v12, %v5199_v44 }
 0xff2   :  { %4281 = vrcp.f32 %v2419_v46  ;;  %3966 = vmatpush3.bf16.msra.mxu1 %v3963_v23  ;;  %v2416_v33 = vpop.xlane.xlu0 %2415  ;;  %v2439_v53 = vmul.f32 %v4272_v30, %v5201_v40 }
 0xff3   :  { %4283 = vrcp.f32 %v2416_v33  ;;  %3972 = vmatprep.subr.bf16.mxu1 %v3971_v43 }
 0xff4   :  { %v4274_v27 = vpop.eup %4273  ;;  %3789 = vmatprep.mubr.msk.f32.mxu1 %vm320_vm2, %v2439_v53 }
 0xff5   :  { %v4276_v25 = vpop.eup %4275  ;;  %v2425_v62 = vpop.xlane.xlu1 %2424  ;;  %3790 = vmatmul.mubr.msk.f32.vlgmr.msra.gmra.mrb[24].mxu1 %vm320_vm2, %v2441_v51  ;;  %v2445_v55 = vmul.f32 %v4274_v27, %v5209_v48 }
 0xff6   :  { %4285 = vrcp.f32 %v2425_v62  ;;  %3974 = vmatpush3.bf16.msra.mxu1 %v3971_v43  ;;  %v2422_v38 = vpop.xlane.xlu0 %2421  ;;  %v2443_v37 = vmul.f32 %v4276_v25, %v5211_v50 }
 0xff7   :  { %4287 = vrcp.f32 %v2422_v38 }
 0xff8   :  { %v4278_v40 = vpop.eup %4277  ;;  %3796 = vmatprep.mubr.msk.f32.mxu0 %vm320_vm2, %v2443_v37 }
 0xff9   :  { %v4280_v44 = vpop.eup %4279  ;;  %v4089_v56 = vpop.permute.xlu1 %4088  ;;  %3797 = vmatmul.mubr.msk.f32.vlgmr.msra.gmra.mrb[20].mxu0 %vm320_vm2, %v2445_v55  ;;  %v2449_v7 = vmul.f32 %v4278_v40, %v5217_v39 }
 0xffa   :  { %v4091_v57 = vunpack.i.h.bf16 %v4089_v56  ;;  %v4090_v61 = vunpack.i.l.bf16 %v4089_v56  ;;  %v4094_v63 = vpop.permute.xlu0 %4093  ;;  %v2447_v6 = vmul.f32 %v4280_v44, %v5219_v60 }
 0xffb   :  { %v4096_v45 = vunpack.i.h.bf16 %v4094_v63  ;;  %v4095_v1 = vunpack.i.l.bf16 %v4094_v63 }
 0xffc   :  { %v4282_v50 = vpop.eup %4281  ;;  %v3975_v14 = vpack.c.bf16 %v4091_v57, %v4090_v61  ;;  %3803 = vmatprep.mubr.msk.f32.mxu1 %vm320_vm2, %v2447_v6  ;;  %v3454_v6 = vld [vmem:[%s5342_s10] ss:$0 sm:$0xff] }
 0xffd   :  { %v4284_v48 = vpop.eup %4283  ;;  %v3979_v10 = vpack.c.bf16 %v4096_v45, %v4095_v1  ;;  %3804 = vmatmul.mubr.msk.f32.vlgmr.msra.gmra.mrb[26].mxu1 %vm320_vm2, %v2449_v7  ;;  %v2453_v60 = vmul.f32 %v4282_v50, %v5225_v3 }
 0xffe   :  { %3976 = vmatprep.subr.bf16.mxu0 %v3975_v14  ;;  %v2451_v52 = vmul.f32 %v4284_v48, %v5227_v5 }
 0xfff   :  { %3978 = vmatpush3.bf16.msra.mxu0 %v3975_v14  ;;  %3980 = vmatprep.subr.bf16.mxu1 %v3979_v10 }
0x1000   :  { %v4286_v11 = vpop.eup %4285  ;;  %3810 = vmatprep.mubr.msk.f32.mxu0 %vm320_vm2, %v2451_v52  ;;  %3982 = vmatpush3.bf16.msra.mxu1 %v3979_v10 }
0x1001   :  { %v4288_v39 = vpop.eup %4287  ;;  %v2457_v17 = vmul.f32 %v4286_v11, %v5233_v0  ;;  %v3229_v0 = vld [vmem:[%s5341_s9] sm:$0xff]  ;;  %s4510_s9 = smov 28  }
0x1002   :  { %3811 = vmatmul.mubr.msk.f32.vlgmr.msra.gmra.mrb[22].mxu0 %vm320_vm2, %v2453_v60  ;;  %v2455_v15 = vmul.f32 %v4288_v39, %v5235_v41  ;;  %v3983_v26 = vpack.c.bf16 %v3230_v42, %v3229_v0 }
0x1004   :  { %3817 = vmatprep.mubr.msk.f32.mxu1 %vm320_vm2, %v2455_v15  ;;  %3984 = vmatprep.subr.bf16.mxu0 %v3983_v26 }
0x1005   :  { %3818 = vmatmul.mubr.msk.f32.vlgmr.msra.gmra.mrb[28].mxu1 %vm320_vm2, %v2457_v17  ;;  %3986 = vmatpush3.bf16.msra.mxu0 %v3983_v26  ;;  %v3457_v26 = vld [vmem:[%s5343_s11] ss:$0 sm:$0xff]  ;;  %s4449_s11 = scalar_lea.vmem %s3376_s15, 256 }
0x1006   :  { %3988 = vmatprep.subr.bf16.mxu0 %v3987_v8  ;;  %p4450_p0 = scmp.ne.s32.totalorder %s3376_s15, %s4449_s11  ;;  %p4455_p2 = scmp.lt.s32.totalorder %s4449_s11, %s4449_s11 }
0x1008   :  { %p4456_p3 = por %p4455_p2, %p4454_p1 }
0x1009   :  { %3990 = vmatpush3.bf16.msra.mxu0 %v3987_v8 }
0x100a   :  { %p4457_p4 = pnand %p4456_p3, %p4450_p0 }
0x106f   :  { %v3770_v5 = vpop.f32.mrb[18].mxu1 }
0x1070   :  { %v2536_v2 = vpop.f32.mrb[19].mxu1 }
0x10c0   :  { %v3777_v22 = vpop.f32.mrb[20].mxu1 }
0x10c1   :  { %3158 = vrot.lane.b32.xlu0 %v3777_v22, %s4505_s6  ;;  %v2623_v3 = vpop.f32.mrb[21].mxu1 }
0x10c2   :  { %3156 = vrot.lane.b32.xlu1 %v2623_v3, %s4505_s6 }
0x10c4   :  { %v3784_v4 = vpop.f32.mrb[22].mxu1 }
0x10c5   :  { %3166 = vrot.lane.b32.xlu0 %v3784_v4, %s4484_s21  ;;  %v2710_v54 = vpop.f32.mrb[23].mxu1 }
0x10c6   :  { %3164 = vrot.lane.b32.xlu1 %v2710_v54, %s4484_s21 }
0x10c8   :  { %v3791_v41 = vpop.f32.mrb[24].mxu1 }
0x10c9   :  { %v2797_v59 = vpop.f32.mrb[25].mxu1 }
0x10cc   :  { %v3798_v9 = vpop.f32.mrb[20].mxu0 }
0x10cd   :  { %3182 = vrot.lane.b32.xlu0 %v3798_v9, %s4506_s5  ;;  %v2884_v21 = vpop.f32.mrb[21].mxu0 }
0x10ce   :  { %3180 = vrot.lane.b32.xlu1 %v2884_v21, %s4506_s5 }
0x10d0   :  { %v3805_v29 = vpop.f32.mrb[26].mxu1 }
0x10d1   :  { %3174 = vrot.lane.b32.xlu0 %v3791_v41, %s4507_s7  ;;  %v2971_v32 = vpop.f32.mrb[27].mxu1 }
0x10d2   :  { %3172 = vrot.lane.b32.xlu1 %v2797_v59, %s4507_s7 }
0x10d5   :  { %v3812_v58 = vpop.f32.mrb[22].mxu0  ;;  %3190 = vrot.lane.b32.xlu0 %v3805_v29, %s4508_s18 }
0x10d6   :  { %v3058_v34 = vpop.f32.mrb[23].mxu0  ;;  %3188 = vrot.lane.b32.xlu1 %v2971_v32, %s4508_s18 }
0x10d8   :  { %v3819_v35 = vpop.f32.mrb[28].mxu1 }
0x10d9   :  { %3198 = vrot.lane.b32.xlu0 %v3812_v58, %s4509_s4  ;;  %v3145_v19 = vpop.f32.mrb[29].mxu1 }
0x10da   :  { %3196 = vrot.lane.b32.xlu1 %v3058_v34, %s4509_s4  ;;  %v4293_v34 = vld [vmem:[#allocation2 + $0x8] sm:$0xff] }
0x10dd   :  { %3206 = vrot.lane.b32.xlu0 %v3819_v35, %s4510_s9 }
0x10de   :  { %3204 = vrot.lane.b32.xlu1 %v3145_v19, %s4510_s9  ;;  %v4294_v19 = vld [vmem:[#allocation2] sm:$0xff] }
0x1133   :  { %v3159_v28 = vpop.permute.xlu0 %3158 }
0x1134   :  { %v3157_v31 = vpop.permute.xlu1 %3156  ;;  %v3211_v43 = vsel %vm1583_vm6, %v3770_v5, %v3159_v28 }
0x1135   :  { %v3210_v30 = vsel %vm1583_vm6, %v2536_v2, %v3157_v31 }
0x1137   :  { %v3167_v23 = vpop.permute.xlu0 %3166 }
0x1138   :  { %v3165_v16 = vpop.permute.xlu1 %3164  ;;  %v3214_v33 = vsel %vm3212_vm8, %v3211_v43, %v3167_v23 }
0x1139   :  { %v3213_v46 = vsel %vm3212_vm8, %v3210_v30, %v3165_v16 }
0x113f   :  { %v3183_v36 = vpop.permute.xlu0 %3182 }
0x1140   :  { %v3181_v24 = vpop.permute.xlu1 %3180 }
0x1143   :  { %v3175_v13 = vpop.permute.xlu0 %3174 }
0x1144   :  { %v3173_v20 = vpop.permute.xlu1 %3172  ;;  %v3217_v27 = vsel %vm3215_vm9, %v3214_v33, %v3175_v13 }
0x1145   :  { %v3216_v53 = vsel %vm3215_vm9, %v3213_v46, %v3173_v20  ;;  %v3219_v38 = vsel %vm320_vm2, %v3217_v27, %v3183_v36 }
0x1146   :  { %v3218_v62 = vsel %vm320_vm2, %v3216_v53, %v3181_v24 }
0x1147   :  { %v3191_v18 = vpop.permute.xlu0 %3190 }
0x1148   :  { %v3189_v12 = vpop.permute.xlu1 %3188  ;;  %v3222_v40 = vsel %vm3220_vm10, %v3219_v38, %v3191_v18 }
0x1149   :  { %v3221_v37 = vsel %vm3220_vm10, %v3218_v62, %v3189_v12 }
0x114b   :  { %v3199_v51 = vpop.permute.xlu0 %3198 }
0x114c   :  { %v3197_v25 = vpop.permute.xlu1 %3196  ;;  %v3225_v57 = vsel %vm3223_vm11, %v3222_v40, %v3199_v51 }
0x114d   :  { %v3224_v44 = vsel %vm3223_vm11, %v3221_v37, %v3197_v25 }
0x114f   :  { %v3207_v55 = vpop.permute.xlu0 %3206 }
0x1150   :  { %v3205_v56 = vpop.permute.xlu1 %3204  ;;  %v3228_v63 = vsel %vm3226_vm12, %v3225_v57, %v3207_v55 }
0x1151   :  { %v3227_v61 = vsel %vm3226_vm12, %v3224_v44, %v3205_v56 }
0x1152   :  { %3828 = vmatprep.mubr.msk.f32.mxu0 %vm151_vm1, %v3227_v61 }
0x1153   :  { %3829 = vmatmul.mubr.msk.f32.vlgmr.msra.gmra.mrb[24].mxu0 %vm151_vm1, %v3228_v63 }
0x1226   :  { %v3830_v7 = vpop.f32.mrb[24].mxu0 }
0x1227   :  { %v3318_v45 = vadd.f32 %v3830_v7, %v3454_v6  ;;  %v3312_v1 = vpop.f32.mrb[25].mxu0 }
0x1228   :  { %v3313_v50 = vadd.f32 %v3454_v6, %v3312_v1 }
0x1229   :  { %v3324_v14 = vsel %vm151_vm1, %v3318_v45, 0.0 }
0x122a   :  { %3325 = vadd.xlane.f32.xlu0 %v3324_v14  ;;  %v3321_v48 = vsel %vm151_vm1, %v3313_v50, 0.0 }
0x122b   :  { %3322 = vadd.xlane.f32.xlu1 %v3321_v48 }
0x12b7   :  { %v3326_v10 = vpop.xlane.xlu0 %3325 }
0x12b8   :  { %v3329_v52 = vmul.f32 0.03125, %v3326_v10  ;;  %v3323_v11 = vpop.xlane.xlu1 %3322 }
0x12b9   :  { %v3328_v60 = vmul.f32 0.03125, %v3323_v11 }
0x12ba   :  { %v3331_v39 = vsub.f32 %v3318_v45, %v3329_v52 }
0x12bb   :  { %v3330_v15 = vsub.f32 %v3313_v50, %v3328_v60 }
0x12bc   :  { %v3333_v17 = vmul.f32 %v3331_v39, %v3331_v39 }
0x12bd   :  { %v3332_v5 = vmul.f32 %v3330_v15, %v3330_v15 }
0x12be   :  { %v3337_v2 = vsel %vm151_vm1, %v3333_v17, 0.0 }
0x12bf   :  { %3338 = vadd.xlane.f32.xlu1 %v3337_v2  ;;  %v3334_v22 = vsel %vm151_vm1, %v3332_v5, 0.0 }
0x12c0   :  { %3335 = vadd.xlane.f32.xlu0 %v3334_v22 }
0x134c   :  { %v3339_v3 = vpop.xlane.xlu1 %3338 }
0x134d   :  { %v3341_v4 = vmul.f32 0.03125, %v3339_v3  ;;  %v3336_v54 = vpop.xlane.xlu0 %3335 }
0x134e   :  { %v3340_v41 = vmul.f32 0.03125, %v3336_v54 }
0x134f   :  { %v3343_v59 = vadd.f32 1e-05, %v3341_v4 }
0x1350   :  { %v3342_v0 = vadd.f32 1e-05, %v3340_v41 }
0x1351   :  { %4289 = vrsqrt.f32 %v3343_v59 }
0x1352   :  { %4291 = vrsqrt.f32 %v3342_v0 }
0x135b   :  { %v4290_v42 = vpop.eup %4289 }
0x135c   :  { %v4292_v9 = vpop.eup %4291  ;;  %v3347_v21 = vmul.f32 %v4290_v42, %v3331_v39 }
0x135d   :  { %v3346_v47 = vmul.f32 %v4292_v9, %v3330_v15 }
0x135e   :  { %v3356_v8 = vmul.f32 %v3457_v26, %v3347_v21 }
0x135f   :  { %v3355_v29 = vmul.f32 %v3457_v26, %v3346_v47 }
0x1360   :  { %v3365_v32 = vadd.f32 %v3458_v49, %v3356_v8 }
0x1361   :  { %v3364_v58 = vadd.f32 %v3458_v49, %v3355_v29 }
0x1362   :  { %v3367_v35 = vadd.f32 %v4293_v34, %v3365_v32 }
0x1363   :  { %v3366_v28 = vadd.f32 %v4294_v19, %v3364_v58 }
0x1364   :  { %3369 = vst.msk [vmem:[#allocation14 + $0x8] sm:$0xff] %vm151_vm1, %v3367_v35 }
0x1365   :  { %3368 = vst.msk [vmem:[#allocation14] sm:$0xff] %vm151_vm1, %v3366_v28 }
0x1366   :  { %4460 = shalt.err (!%p4457_p4)
}
0x1367   :  { %s4461_s1 = scalar_lea.hbm %s5345_s13, 256 }
0x1368   :  { %p4462_p5 = scmp.ne.s32.totalorder %s5345_s13, %s4461_s1  ;;  %p4465_p6 = scmp.lt.u32.totalorder %s4461_s1, %s5345_s13 }
0x136a   :  { %p4467_p7 = pnand %p4465_p6, %p4462_p5 }
0x136c   :  { %4470 = shalt.err (!%p4467_p7)
}
0x136d   :  { %3381 = dma.vmem_to_hbm [thread:$0]  %s3376_s15, 256, %s5345_s13, [#allocation4], %s4483_s20, %s4483_s20, %s4484_s21  }
0x136e   :  { %4479 = dma.done.wait [#allocation4], 256  }
0x136f   :  { %4480 = vsyncadd [#allocation4], 4294967040 }
0x1370   :  { %3385 = vsyncpa [#allocation3], 1 }
0x1371   :  { %3386 = vsyncpa [#allocation6], 1 }
0x1372   :  { %3387 = vsyncpa [#allocation9], 1 }
0x1373   :  { %3388 = vsyncpa [#allocation12], 1 }
0x1374   :  { %3389 = vsyncpa [#allocation4], 1 }

</bundles_post_ra>
